<compile_context>
chip_gen: v7x
topology: tpu7x:2x2x1
jax: 0.10.0
libtpu: 0.0.40
codegen_flags: <defaults>
</compile_context>

<pallas_src>
import math

import jax
import jax.numpy as jnp
from jax.experimental import pallas as pl
from jax.experimental.pallas import tpu as pltpu

# ---- small, module-consistent configuration (PyTorch uses E=384, T=256, B=64) ----
EMBED_SIZE = 128    # module-level `embed_size` (real: 384; 128 keeps lanes dense)
NUM_HEADS = 1       # residual add requires num_heads == 1 (see faithfulness note)
BATCH = 2
SEQ = 128           # context length of the input (<= the 256-wide tril buffer)
EPS = 1e-5          # nn.LayerNorm default eps

HEAD_SIZE_BLK = EMBED_SIZE // NUM_HEADS          # Block.head_size -> MHSA "embed_size"
SA_HEAD_SIZE = HEAD_SIZE_BLK // NUM_HEADS        # per-SelfAttention head size
HIDDEN = 4 * EMBED_SIZE                          # ffwd hidden width
assert HEAD_SIZE_BLK == EMBED_SIZE, "residual add requires num_heads == 1 in this module"


def _layernorm(h, gamma, beta):
    # One-pass variance: mean(x*x) - mean(x)^2 (single cross-lane reduction pair).
    mu = jnp.mean(h, axis=-1, keepdims=True)
    ms = jnp.mean(h * h, axis=-1, keepdims=True)
    var = ms - mu * mu
    return (h - mu) * jax.lax.rsqrt(var + EPS) * gamma + beta


def block_kernel(x_ref, bias_ref, gamma_ref, beta_ref, wqkv_ref, wproj_ref,
                 bproj_ref, w1_ref, b1_ref, w2_ref, b2_ref, o_ref):
    # x_ref: (T, E) f32 (batch dim squeezed by BlockSpec); weights are bf16 operands.
    T, E = x_ref.shape
    hs = wproj_ref.shape[0]          # == E for num_heads == 1

    x = x_ref[...]                   # (T, E) f32
    gamma = gamma_ref[...]           # (1, E) f32
    beta = beta_ref[...]             # (1, E) f32

    # ---------------- x = x + sa(layer_norm(x)) ----------------
    ln1 = _layernorm(x, gamma, beta)                                       # (T, E) f32

    # Fused QKV matmul: bf16 operands, f32 accumulation.  The 1/sqrt(hs) attention
    # scale is already folded into the Q columns of wqkv (done once in prepare_params).
    qkv = jnp.dot(ln1.astype(jnp.bfloat16), wqkv_ref[...],
                  preferred_element_type=jnp.float32)                      # (T, 3*hs)
    qkv_b = qkv.astype(jnp.bfloat16)
    q = qkv_b[:, 0:hs]
    k = qkv_b[:, hs:2 * hs]
    v = qkv_b[:, 2 * hs:3 * hs]

    # q @ k^T with the transpose folded into the contraction (no XLU transpose).
    s = jax.lax.dot_general(q, k, (((1,), (1,)), ((), ())),
                            preferred_element_type=jnp.float32)            # (T, T) f32
    s = s + bias_ref[...]            # additive causal mask: 0 / -1e30 (grid-invariant)

    m = jnp.max(s, axis=-1, keepdims=True)
    e = jnp.exp(s - m)
    denom = jnp.sum(e, axis=-1, keepdims=True)
    p = e * pl.reciprocal(denom, approx=True)        # EUP slot, effectively free

    att = jnp.dot(p.astype(jnp.bfloat16), v,
                  preferred_element_type=jnp.float32)                      # (T, hs) f32
    sa = jnp.dot(att.astype(jnp.bfloat16), wproj_ref[...],
                 preferred_element_type=jnp.float32) + bproj_ref[...]      # (T, E)
    x1 = x + sa

    # ---------------- x = x + ffwd(layer_norm(x)) ----------------
    ln2 = _layernorm(x1, gamma, beta)
    h = jnp.dot(ln2.astype(jnp.bfloat16), w1_ref[...],
                preferred_element_type=jnp.float32) + b1_ref[...]          # (T, 4E)
    h = jnp.maximum(h, 0.0)
    ff = jnp.dot(h.astype(jnp.bfloat16), w2_ref[...],
                 preferred_element_type=jnp.float32) + b2_ref[...]         # (T, E)

    o_ref[...] = (x1 + ff).astype(o_ref.dtype)       # lane-dense f32 store


def transformer_block(x, prepared):
    """x: (B, T, E) f32; prepared: output of prepare_params()."""
    bias, gamma, beta, wqkv, wproj, bproj, w1, b1, w2, b2 = prepared
    B, T, E = x.shape

    def const(shape):
        # Grid-invariant operand: constant block index -> fetched once, re-DMA skipped.
        return pl.BlockSpec(shape, lambda b: (0,) * len(shape))

    return pl.pallas_call(
        block_kernel,
        out_shape=jax.ShapeDtypeStruct(x.shape, x.dtype),
        grid=(B,),
        in_specs=[
            pl.BlockSpec((None, T, E), lambda b: (b, 0, 0)),   # x: one sequence / step
            const(bias.shape),     # (T, T) causal bias
            const(gamma.shape),    # (1, E)
            const(beta.shape),     # (1, E)
            const(wqkv.shape),     # (E, 3*hs) bf16
            const(wproj.shape),    # (hs, E)   bf16
            const(bproj.shape),    # (1, E)
            const(w1.shape),       # (E, 4E)   bf16
            const(b1.shape),       # (1, 4E)
            const(w2.shape),       # (4E, E)   bf16
            const(b2.shape),       # (1, E)
        ],
        out_specs=pl.BlockSpec((None, T, E), lambda b: (b, 0, 0)),
        compiler_params=pltpu.CompilerParams(
            dimension_semantics=("parallel",),           # shard batch over TensorCores
            vmem_limit_bytes=48 * 1024 * 1024,           # leaves headroom on v7x (64 MiB)
        ),
    )(x, bias, gamma, beta, wqkv, wproj, bproj, w1, b1, w2, b2)


def init_params(key):
    """Deterministic PyTorch-style uniform(-1/sqrt(fan_in), 1/sqrt(fan_in)) init."""
    def uni(k, shape, fan_in):
        bound = 1.0 / math.sqrt(fan_in)
        return jax.random.uniform(k, shape, jnp.float32, -bound, bound)

    ks = jax.random.split(key, 9)
    gamma = jnp.ones((1, EMBED_SIZE), jnp.float32)
    beta = jnp.zeros((1, EMBED_SIZE), jnp.float32)
    # Per-head k/q/v: nn.Linear(embed_size, SA_HEAD_SIZE, bias=False); stored (in, out).
    wq = uni(ks[0], (NUM_HEADS, EMBED_SIZE, SA_HEAD_SIZE), EMBED_SIZE)
    wk = uni(ks[1], (NUM_HEADS, EMBED_SIZE, SA_HEAD_SIZE), EMBED_SIZE)
    wv = uni(ks[2], (NUM_HEADS, EMBED_SIZE, SA_HEAD_SIZE), EMBED_SIZE)
    wproj = uni(ks[3], (SA_HEAD_SIZE * NUM_HEADS, HEAD_SIZE_BLK), SA_HEAD_SIZE * NUM_HEADS)
    bproj = uni(ks[4], (1, HEAD_SIZE_BLK), SA_HEAD_SIZE * NUM_HEADS)
    w1 = uni(ks[5], (EMBED_SIZE, HIDDEN), EMBED_SIZE)
    b1 = uni(ks[6], (1, HIDDEN), EMBED_SIZE)
    w2 = uni(ks[7], (HIDDEN, EMBED_SIZE), HIDDEN)
    b2 = uni(ks[8], (1, EMBED_SIZE), HIDDEN)
    return (gamma, beta, wq, wk, wv, wproj, bproj, w1, b1, w2, b2)


def prepare_params(params, seq_len):
    """One-time parameter prep (NOT per forward call): fuse Q/K/V, fold the attention
    scale into the Q columns, cast matmul weights to bf16, build the causal bias."""
    gamma, beta, wq, wk, wv, wproj, bproj, w1, b1, w2, b2 = params
    scale = float(SA_HEAD_SIZE) ** -0.5
    # NUM_HEADS == 1 (asserted above); fused (E, 3*hs) operand, Q columns pre-scaled.
    wqkv = jnp.concatenate([wq[0] * scale, wk[0], wv[0]], axis=-1)

    idx = jnp.arange(seq_len)
    causal_bias = jnp.where(idx[:, None] >= idx[None, :], 0.0, -1e30).astype(jnp.float32)

    bf16 = jnp.bfloat16
    return (causal_bias, gamma, beta,
            wqkv.astype(bf16), wproj.astype(bf16), bproj,
            w1.astype(bf16), b1, w2.astype(bf16), b2)


def reference(x, params):
    """Pure-JAX f32 reference replicating the PyTorch forward (dropout = identity)."""
    gamma, beta, wq, wk, wv, wproj, bproj, w1, b1, w2, b2 = params

    def ln(h):
        mu = h.mean(-1, keepdims=True)
        var = ((h - mu) ** 2).mean(-1, keepdims=True)
        return (h - mu) / jnp.sqrt(var + EPS) * gamma[0] + beta[0]

    T = x.shape[1]
    mask = jnp.tril(jnp.ones((T, T), bool))
    h = ln(x)
    outs = []
    for hd in range(NUM_HEADS):
        q = h @ wq[hd]
        k = h @ wk[hd]
        v = h @ wv[hd]
        s = (q @ jnp.swapaxes(k, -1, -2)) * (SA_HEAD_SIZE ** -0.5)
        s = jnp.where(mask, s, -jnp.inf)
        p = jax.nn.softmax(s, axis=-1)
        outs.append(p @ v)
    cat = jnp.concatenate(outs, axis=-1)
    sa = cat @ wproj + bproj[0]
    x1 = x + sa
    h2 = ln(x1)
    ff = jnp.maximum(h2 @ w1 + b1[0], 0.0) @ w2 + b2[0]
    return x1 + ff


if __name__ == "__main__":
    key = jax.random.PRNGKey(0)
    kx, kp = jax.random.split(key)
    x = jax.random.normal(kx, (BATCH, SEQ, EMBED_SIZE), jnp.float32)
    params = init_params(kp)
    prepared = prepare_params(params, SEQ)

    out = transformer_block(x, prepared)
    jax.block_until_ready(out)

    ref = reference(x, params)
    assert out.shape == (BATCH, SEQ, EMBED_SIZE)
    # Tolerance reflects bf16 matmul operands (f32 accumulation) + approx reciprocal
    # versus the all-f32 reference; expected max abs error ~1e-2 at these shapes.
    max_err = float(jnp.max(jnp.abs(out - ref)))
    assert jnp.allclose(out, ref, atol=5e-2, rtol=5e-2), f"max_err={max_err}"
    print("KERNEL_OK")
</pallas_src>

<mosaic_0001>
module attributes {stable_mosaic.version = 11 : i64} {
  func.func @block_kernel(%arg0: i32, %arg1: memref<1x128x128xf32, #tpu.memory_space<vmem>>, %arg2: memref<128x128xf32, #tpu.memory_space<vmem>>, %arg3: memref<1x128xf32, #tpu.memory_space<vmem>>, %arg4: memref<1x128xf32, #tpu.memory_space<vmem>>, %arg5: memref<128x384xbf16, #tpu.memory_space<vmem>>, %arg6: memref<128x128xbf16, #tpu.memory_space<vmem>>, %arg7: memref<1x128xf32, #tpu.memory_space<vmem>>, %arg8: memref<128x512xbf16, #tpu.memory_space<vmem>>, %arg9: memref<1x512xf32, #tpu.memory_space<vmem>>, %arg10: memref<512x128xbf16, #tpu.memory_space<vmem>>, %arg11: memref<1x128xf32, #tpu.memory_space<vmem>>, %arg12: memref<1x128x128xf32, #tpu.memory_space<vmem>>) attributes {dimension_semantics = [#tpu.dimension_semantics<parallel>], iteration_bounds = array<i64: 2>, scalar_prefetch = 0 : i64, scratch_operands = 0 : i64, tpu.core_type = #tpu.core_type<tc>, window_params = [{transform_indices = @transform_0, window_bounds = array<i64: 1, 128, 128>}, {pipeline_mode = #tpu.pipeline_mode<synchronous>, transform_indices = @transform_1, window_bounds = array<i64: 128, 128>}, {pipeline_mode = #tpu.pipeline_mode<synchronous>, transform_indices = @transform_2, window_bounds = array<i64: 1, 128>}, {pipeline_mode = #tpu.pipeline_mode<synchronous>, transform_indices = @transform_3, window_bounds = array<i64: 1, 128>}, {pipeline_mode = #tpu.pipeline_mode<synchronous>, transform_indices = @transform_4, window_bounds = array<i64: 128, 384>}, {pipeline_mode = #tpu.pipeline_mode<synchronous>, transform_indices = @transform_5, window_bounds = array<i64: 128, 128>}, {pipeline_mode = #tpu.pipeline_mode<synchronous>, transform_indices = @transform_6, window_bounds = array<i64: 1, 128>}, {pipeline_mode = #tpu.pipeline_mode<synchronous>, transform_indices = @transform_7, window_bounds = array<i64: 128, 512>}, {pipeline_mode = #tpu.pipeline_mode<synchronous>, transform_indices = @transform_8, window_bounds = array<i64: 1, 512>}, {pipeline_mode = #tpu.pipeline_mode<synchronous>, transform_indices = @transform_9, window_bounds = array<i64: 512, 128>}, {pipeline_mode = #tpu.pipeline_mode<synchronous>, transform_indices = @transform_10, window_bounds = array<i64: 1, 128>}, {transform_indices = @transform_11, window_bounds = array<i64: 1, 128, 128>}]} {
    %c0 = arith.constant 0 : index
    %c0_0 = arith.constant 0 : index
    %c0_1 = arith.constant 0 : index
    %0 = vector.load %arg1[%c0, %c0_0, %c0_1] : memref<1x128x128xf32, #tpu.memory_space<vmem>>, vector<1x128x128xf32>
    %1 = vector.shape_cast %0 : vector<1x128x128xf32> to vector<128x128xf32>
    %c0_2 = arith.constant 0 : index
    %c0_3 = arith.constant 0 : index
    %2 = vector.load %arg3[%c0_2, %c0_3] : memref<1x128xf32, #tpu.memory_space<vmem>>, vector<1x128xf32>
    %c0_4 = arith.constant 0 : index
    %c0_5 = arith.constant 0 : index
    %3 = vector.load %arg4[%c0_4, %c0_5] : memref<1x128xf32, #tpu.memory_space<vmem>>, vector<1x128xf32>
    %cst = arith.constant dense<0.000000e+00> : vector<128xf32>
    %4 = vector.multi_reduction <add>, %1, %cst [1] : vector<128x128xf32> to vector<128xf32>
    %5 = vector.shape_cast %4 : vector<128xf32> to vector<128x1xf32>
    %cst_6 = arith.constant 1.280000e+02 : f32
    %6 = vector.broadcast %cst_6 : f32 to vector<128x1xf32>
    %7 = arith.divf %5, %6 : vector<128x1xf32>
    %8 = arith.mulf %1, %1 : vector<128x128xf32>
    %cst_7 = arith.constant dense<0.000000e+00> : vector<128xf32>
    %9 = vector.multi_reduction <add>, %8, %cst_7 [1] : vector<128x128xf32> to vector<128xf32>
    %10 = vector.shape_cast %9 : vector<128xf32> to vector<128x1xf32>
    %cst_8 = arith.constant 1.280000e+02 : f32
    %11 = vector.broadcast %cst_8 : f32 to vector<128x1xf32>
    %12 = arith.divf %10, %11 : vector<128x1xf32>
    %13 = arith.mulf %7, %7 : vector<128x1xf32>
    %14 = arith.subf %12, %13 : vector<128x1xf32>
    %15 = vector.broadcast %7 : vector<128x1xf32> to vector<128x128xf32>
    %16 = arith.subf %1, %15 : vector<128x128xf32>
    %cst_9 = arith.constant 9.99999974E-6 : f32
    %17 = vector.broadcast %cst_9 : f32 to vector<128x1xf32>
    %18 = arith.addf %14, %17 : vector<128x1xf32>
    %19 = math.rsqrt %18 : vector<128x1xf32>
    %20 = vector.broadcast %19 : vector<128x1xf32> to vector<128x128xf32>
    %21 = arith.mulf %16, %20 : vector<128x128xf32>
    %22 = vector.broadcast %2 : vector<1x128xf32> to vector<128x128xf32>
    %23 = arith.mulf %21, %22 : vector<128x128xf32>
    %24 = vector.broadcast %3 : vector<1x128xf32> to vector<128x128xf32>
    %25 = arith.addf %23, %24 : vector<128x128xf32>
    %26 = arith.truncf %25 : vector<128x128xf32> to vector<128x128xbf16>
    %c0_10 = arith.constant 0 : index
    %c0_11 = arith.constant 0 : index
    %27 = vector.load %arg5[%c0_10, %c0_11] : memref<128x384xbf16, #tpu.memory_space<vmem>>, vector<128x384xbf16>
    %cst_12 = arith.constant dense<0.000000e+00> : vector<128x384xf32>
    %28 = tpu.matmul %26, %27, %cst_12 {dimension_numbers = #tpu.dot_dimension_numbers<[1], [0], [0], [1], [0, 0, 1, 1], [], []>} : vector<128x128xbf16>, vector<128x384xbf16>, vector<128x384xf32> -> vector<128x384xf32>
    %29 = arith.truncf %28 : vector<128x384xf32> to vector<128x384xbf16>
    %30 = vector.extract_strided_slice %29 {offsets = [0, 0], sizes = [128, 128], strides = [1, 1]} : vector<128x384xbf16> to vector<128x128xbf16>
    %31 = vector.extract_strided_slice %29 {offsets = [0, 128], sizes = [128, 128], strides = [1, 1]} : vector<128x384xbf16> to vector<128x128xbf16>
    %32 = vector.extract_strided_slice %29 {offsets = [0, 256], sizes = [128, 128], strides = [1, 1]} : vector<128x384xbf16> to vector<128x128xbf16>
    %cst_13 = arith.constant dense<0.000000e+00> : vector<128x128xf32>
    %33 = tpu.matmul %30, %31, %cst_13 {dimension_numbers = #tpu.dot_dimension_numbers<[1], [1], [0], [0], [0, 0, 1, 0], [], []>} : vector<128x128xbf16>, vector<128x128xbf16>, vector<128x128xf32> -> vector<128x128xf32>
    %c0_14 = arith.constant 0 : index
    %c0_15 = arith.constant 0 : index
    %34 = vector.load %arg2[%c0_14, %c0_15] : memref<128x128xf32, #tpu.memory_space<vmem>>, vector<128x128xf32>
    %35 = arith.addf %33, %34 : vector<128x128xf32>
    %cst_16 = arith.constant dense<0xFF800000> : vector<128xf32>
    %36 = vector.multi_reduction <maximumf>, %35, %cst_16 [1] : vector<128x128xf32> to vector<128xf32>
    %37 = vector.shape_cast %36 : vector<128xf32> to vector<128x1xf32>
    %38 = vector.broadcast %37 : vector<128x1xf32> to vector<128x128xf32>
    %39 = arith.subf %35, %38 : vector<128x128xf32>
    %40 = math.exp %39 : vector<128x128xf32>
    %cst_17 = arith.constant dense<0.000000e+00> : vector<128xf32>
    %41 = vector.multi_reduction <add>, %40, %cst_17 [1] : vector<128x128xf32> to vector<128xf32>
    %42 = vector.shape_cast %41 : vector<128xf32> to vector<128x1xf32>
    %43 = tpu.reciprocal %42 {approx = true} : vector<128x1xf32> -> vector<128x1xf32>
    %44 = vector.broadcast %43 : vector<128x1xf32> to vector<128x128xf32>
    %45 = arith.mulf %40, %44 : vector<128x128xf32>
    %46 = arith.truncf %45 : vector<128x128xf32> to vector<128x128xbf16>
    %cst_18 = arith.constant dense<0.000000e+00> : vector<128x128xf32>
    %47 = tpu.matmul %46, %32, %cst_18 {dimension_numbers = #tpu.dot_dimension_numbers<[1], [0], [0], [1], [0, 0, 1, 1], [], []>} : vector<128x128xbf16>, vector<128x128xbf16>, vector<128x128xf32> -> vector<128x128xf32>
    %48 = arith.truncf %47 : vector<128x128xf32> to vector<128x128xbf16>
    %c0_19 = arith.constant 0 : index
    %c0_20 = arith.constant 0 : index
    %49 = vector.load %arg6[%c0_19, %c0_20] : memref<128x128xbf16, #tpu.memory_space<vmem>>, vector<128x128xbf16>
    %cst_21 = arith.constant dense<0.000000e+00> : vector<128x128xf32>
    %50 = tpu.matmul %48, %49, %cst_21 {dimension_numbers = #tpu.dot_dimension_numbers<[1], [0], [0], [1], [0, 0, 1, 1], [], []>} : vector<128x128xbf16>, vector<128x128xbf16>, vector<128x128xf32> -> vector<128x128xf32>
    %c0_22 = arith.constant 0 : index
    %c0_23 = arith.constant 0 : index
    %51 = vector.load %arg7[%c0_22, %c0_23] : memref<1x128xf32, #tpu.memory_space<vmem>>, vector<1x128xf32>
    %52 = vector.broadcast %51 : vector<1x128xf32> to vector<128x128xf32>
    %53 = arith.addf %50, %52 : vector<128x128xf32>
    %54 = arith.addf %1, %53 : vector<128x128xf32>
    %cst_24 = arith.constant dense<0.000000e+00> : vector<128xf32>
    %55 = vector.multi_reduction <add>, %54, %cst_24 [1] : vector<128x128xf32> to vector<128xf32>
    %56 = vector.shape_cast %55 : vector<128xf32> to vector<128x1xf32>
    %cst_25 = arith.constant 1.280000e+02 : f32
    %57 = vector.broadcast %cst_25 : f32 to vector<128x1xf32>
    %58 = arith.divf %56, %57 : vector<128x1xf32>
    %59 = arith.mulf %54, %54 : vector<128x128xf32>
    %cst_26 = arith.constant dense<0.000000e+00> : vector<128xf32>
    %60 = vector.multi_reduction <add>, %59, %cst_26 [1] : vector<128x128xf32> to vector<128xf32>
    %61 = vector.shape_cast %60 : vector<128xf32> to vector<128x1xf32>
    %cst_27 = arith.constant 1.280000e+02 : f32
    %62 = vector.broadcast %cst_27 : f32 to vector<128x1xf32>
    %63 = arith.divf %61, %62 : vector<128x1xf32>
    %64 = arith.mulf %58, %58 : vector<128x1xf32>
    %65 = arith.subf %63, %64 : vector<128x1xf32>
    %66 = vector.broadcast %58 : vector<128x1xf32> to vector<128x128xf32>
    %67 = arith.subf %54, %66 : vector<128x128xf32>
    %cst_28 = arith.constant 9.99999974E-6 : f32
    %68 = vector.broadcast %cst_28 : f32 to vector<128x1xf32>
    %69 = arith.addf %65, %68 : vector<128x1xf32>
    %70 = math.rsqrt %69 : vector<128x1xf32>
    %71 = vector.broadcast %70 : vector<128x1xf32> to vector<128x128xf32>
    %72 = arith.mulf %67, %71 : vector<128x128xf32>
    %73 = vector.broadcast %2 : vector<1x128xf32> to vector<128x128xf32>
    %74 = arith.mulf %72, %73 : vector<128x128xf32>
    %75 = vector.broadcast %3 : vector<1x128xf32> to vector<128x128xf32>
    %76 = arith.addf %74, %75 : vector<128x128xf32>
    %77 = arith.truncf %76 : vector<128x128xf32> to vector<128x128xbf16>
    %c0_29 = arith.constant 0 : index
    %c0_30 = arith.constant 0 : index
    %78 = vector.load %arg8[%c0_29, %c0_30] : memref<128x512xbf16, #tpu.memory_space<vmem>>, vector<128x512xbf16>
    %cst_31 = arith.constant dense<0.000000e+00> : vector<128x512xf32>
    %79 = tpu.matmul %77, %78, %cst_31 {dimension_numbers = #tpu.dot_dimension_numbers<[1], [0], [0], [1], [0, 0, 1, 1], [], []>} : vector<128x128xbf16>, vector<128x512xbf16>, vector<128x512xf32> -> vector<128x512xf32>
    %c0_32 = arith.constant 0 : index
    %c0_33 = arith.constant 0 : index
    %80 = vector.load %arg9[%c0_32, %c0_33] : memref<1x512xf32, #tpu.memory_space<vmem>>, vector<1x512xf32>
    %81 = vector.broadcast %80 : vector<1x512xf32> to vector<128x512xf32>
    %82 = arith.addf %79, %81 : vector<128x512xf32>
    %cst_34 = arith.constant 0.000000e+00 : f32
    %83 = vector.broadcast %cst_34 : f32 to vector<128x512xf32>
    %84 = arith.maximumf %82, %83 : vector<128x512xf32>
    %85 = arith.truncf %84 : vector<128x512xf32> to vector<128x512xbf16>
    %c0_35 = arith.constant 0 : index
    %c0_36 = arith.constant 0 : index
    %86 = vector.load %arg10[%c0_35, %c0_36] : memref<512x128xbf16, #tpu.memory_space<vmem>>, vector<512x128xbf16>
    %cst_37 = arith.constant dense<0.000000e+00> : vector<128x128xf32>
    %87 = tpu.matmul %85, %86, %cst_37 {dimension_numbers = #tpu.dot_dimension_numbers<[1], [0], [0], [1], [0, 0, 1, 1], [], []>} : vector<128x512xbf16>, vector<512x128xbf16>, vector<128x128xf32> -> vector<128x128xf32>
    %c0_38 = arith.constant 0 : index
    %c0_39 = arith.constant 0 : index
    %88 = vector.load %arg11[%c0_38, %c0_39] : memref<1x128xf32, #tpu.memory_space<vmem>>, vector<1x128xf32>
    %89 = vector.broadcast %88 : vector<1x128xf32> to vector<128x128xf32>
    %90 = arith.addf %87, %89 : vector<128x128xf32>
    %91 = arith.addf %54, %90 : vector<128x128xf32>
    %c0_40 = arith.constant 0 : index
    %c0_41 = arith.constant 0 : index
    %c0_42 = arith.constant 0 : index
    %92 = vector.load %arg12[%c0_40, %c0_41, %c0_42] : memref<1x128x128xf32, #tpu.memory_space<vmem>>, vector<1x128x128xf32>
    %93 = vector.shape_cast %92 : vector<1x128x128xf32> to vector<128x128xf32>
    %94 = vector.shape_cast %91 : vector<128x128xf32> to vector<1x128x128xf32>
    tpu.vector_store %arg12[%c0_40, %c0_41, %c0_42], %94 {strides = array<i32>} : memref<1x128x128xf32, #tpu.memory_space<vmem>>, vector<1x128x128xf32>,
    return
  }
  func.func @transform_0(%arg0: i32) -> (i32, i32, i32) {
    %c0_i32 = arith.constant 0 : i32
    %c0_i32_0 = arith.constant 0 : i32
    %c0_i32_1 = arith.constant 0 : i32
    return %arg0, %c0_i32, %c0_i32_0 : i32, i32, i32
  }
  func.func @transform_1(%arg0: i32) -> (i32, i32) {
    %c0_i32 = arith.constant 0 : i32
    %c0_i32_0 = arith.constant 0 : i32
    %c0_i32_1 = arith.constant 0 : i32
    return %c0_i32, %c0_i32_0 : i32, i32
  }
  func.func @transform_2(%arg0: i32) -> (i32, i32) {
    %c0_i32 = arith.constant 0 : i32
    %c0_i32_0 = arith.constant 0 : i32
    %c0_i32_1 = arith.constant 0 : i32
    return %c0_i32, %c0_i32_0 : i32, i32
  }
  func.func @transform_3(%arg0: i32) -> (i32, i32) {
    %c0_i32 = arith.constant 0 : i32
    %c0_i32_0 = arith.constant 0 : i32
    %c0_i32_1 = arith.constant 0 : i32
    return %c0_i32, %c0_i32_0 : i32, i32
  }
  func.func @transform_4(%arg0: i32) -> (i32, i32) {
    %c0_i32 = arith.constant 0 : i32
    %c0_i32_0 = arith.constant 0 : i32
    %c0_i32_1 = arith.constant 0 : i32
    return %c0_i32, %c0_i32_0 : i32, i32
  }
  func.func @transform_5(%arg0: i32) -> (i32, i32) {
    %c0_i32 = arith.constant 0 : i32
    %c0_i32_0 = arith.constant 0 : i32
    %c0_i32_1 = arith.constant 0 : i32
    return %c0_i32, %c0_i32_0 : i32, i32
  }
  func.func @transform_6(%arg0: i32) -> (i32, i32) {
    %c0_i32 = arith.constant 0 : i32
    %c0_i32_0 = arith.constant 0 : i32
    %c0_i32_1 = arith.constant 0 : i32
    return %c0_i32, %c0_i32_0 : i32, i32
  }
  func.func @transform_7(%arg0: i32) -> (i32, i32) {
    %c0_i32 = arith.constant 0 : i32
    %c0_i32_0 = arith.constant 0 : i32
    %c0_i32_1 = arith.constant 0 : i32
    return %c0_i32, %c0_i32_0 : i32, i32
  }
  func.func @transform_8(%arg0: i32) -> (i32, i32) {
    %c0_i32 = arith.constant 0 : i32
    %c0_i32_0 = arith.constant 0 : i32
    %c0_i32_1 = arith.constant 0 : i32
    return %c0_i32, %c0_i32_0 : i32, i32
  }
  func.func @transform_9(%arg0: i32) -> (i32, i32) {
    %c0_i32 = arith.constant 0 : i32
    %c0_i32_0 = arith.constant 0 : i32
    %c0_i32_1 = arith.constant 0 : i32
    return %c0_i32, %c0_i32_0 : i32, i32
  }
  func.func @transform_10(%arg0: i32) -> (i32, i32) {
    %c0_i32 = arith.constant 0 : i32
    %c0_i32_0 = arith.constant 0 : i32
    %c0_i32_1 = arith.constant 0 : i32
    return %c0_i32, %c0_i32_0 : i32, i32
  }
  func.func @transform_11(%arg0: i32) -> (i32, i32, i32) {
    %c0_i32 = arith.constant 0 : i32
    %c0_i32_0 = arith.constant 0 : i32
    %c0_i32_1 = arith.constant 0 : i32
    return %arg0, %c0_i32, %c0_i32_0 : i32, i32, i32
  }
}

</mosaic_0001>

<bundles_post_ra>
// kernel: tpu_custom_call.1
= control target key start
LH: loop header
LB: loop body
LE: loop exit
PB: predicated region body
PF: predicated region fallthrough
CT: control target
= control target key end

     0   :  { %s5339_s0 = inlined_call_operand.hbm [shape: f32[2,128,128], index: 0, kind: input, shape index: {}]   ;;  %s5340_s1 = inlined_call_operand.hbm [shape: f32[128,128], index: 1, kind: input, shape index: {}]   ;;  %s5341_s2 = inlined_call_operand.vmem [shape: f32[1,128], index: 2, kind: input, shape index: {}]   ;;  %s5342_s3 = inlined_call_operand.vmem [shape: f32[1,128], index: 3, kind: input, shape index: {}]   ;;  %s5343_s4 = inlined_call_operand.hbm [shape: bf16[128,384], index: 4, kind: input, shape index: {}]   ;;  %s5344_s5 = inlined_call_operand.hbm [shape: bf16[128,128], index: 5, kind: input, shape index: {}]   ;;  %s5345_s6 = inlined_call_operand.vmem [shape: f32[1,128], index: 6, kind: input, shape index: {}]   ;;  %s5346_s7 = inlined_call_operand.hbm [shape: bf16[128,512], index: 7, kind: input, shape index: {}]   ;;  %s5347_s8 = inlined_call_operand.vmem [shape: f32[1,512], index: 8, kind: input, shape index: {}]   ;;  %s5348_s9 = inlined_call_operand.hbm [shape: bf16[512,128], index: 9, kind: input, shape index: {}]   ;;  %s5349_s10 = inlined_call_operand.vmem [shape: f32[1,128], index: 10, kind: input, shape index: {}]   ;;  %s5350_s11 = inlined_call_operand.hbm [shape: f32[2,128,128], index: 11, kind: output, shape index: {}]  }
   0x1   :  { %5359 = sst [smem:[#allocation19_spill]] %s5347_s8 }
   0x2   :  { %5360 = sst [smem:[#allocation20_spill]] %s5349_s10 }
   0x3   :  { %5361 = sst [smem:[#allocation21_spill]] %s5350_s11 }
   0x4   :  { %16 = vsyncpa [#allocation3], 0 }
   0x5   :  { %18 = vsyncpa [#allocation3 + $0x1], 0 }
   0x6   :  { %19 = vsyncpa [#allocation6], 0 }
   0x7   :  { %20 = vsyncpa [#allocation9], 0 }
   0x8   :  { %21 = vsyncpa [#allocation12], 0 }
   0x9   :  { %22 = vsyncpa [#allocation4], 0 }
   0xa   :  { %24 = vsyncpa [#allocation4 + $0x1], 0  ;;  %s4262_s17 = smov 0   ;;  %s4264_s18 = smov 0  }
   0xb   :  { %s4266_s19 = smov 0   ;;  %s4268_s20 = smov 0  }
   0xc LB: > { %s4184_s21 = smov [#allocation5]   ;;  %s4283_s23 = sadd.s32 4294967295, %s4182_s20   ;;  %s4182_s20 = sphi %s4268_s20, %s5390_s20   ;;  %s4178_s19 = sphi %s4266_s19, %s5389_s19   ;;  %s4174_s18 = sphi %s4264_s18, %s5388_s18   ;;  %s4170_s17 = sphi %s4262_s17, %s5387_s17  }
   0xd   : > { %s309_s22 = sshll.u32 %s4184_s21, 4  ;;  %p3115_p0 = scmp.ge.s32.totalorder %s4182_s20, 1  ;;  %s4288_s22 = int_to_ptr.vmem [resolvable:$true] %s309_s22 }
   0xe   : > { %p5353_p1 = scmp.eq.s32.totalorder %s4283_s23, 0  ;;  %p297_p2 = scmp.lt.s32.totalorder %s4182_s20, 3 }
   0xf   : > { %s4185_s25 = smov [#allocation8]   ;;  %s4186_s28 = smov [#allocation7]  }
  0x10   : > { %p4290_p3 = pnand %p3115_p0, %p297_p2  ;;  %s341_s26 = sshll.u32 %s4185_s25, 4  ;;  %s4303_s26 = int_to_ptr.vmem [resolvable:$true] %s341_s26 }
  0x11   : > { %s4305_s29 = sshll.u32 %s4186_s28, 4  ;;  %s3934_s13 = scalar_lea.hbm %s5340_s1, 2048  ;;  %s329_s29 = int_to_ptr.vmem [resolvable:$true] %s4305_s29 }
  0x12   : > { %s5362_s24 = scalar_select %p4290_p3, 1, 0 }
  0x13   : > { %p3584_p5 = pneg %p4290_p3  ;;  %p3935_p7 = scmp.ne.s32.totalorder %s5340_s1, %s3934_s13 }
  0x14   : > { %p3941_p11 = scmp.lt.u32.totalorder %s3934_s13, %s5340_s1 }
  0x15   : > { %p4299_p6 = pnand %p3584_p5, %p5353_p1 }
  0x17   : > { %p4315_p8 = pneg %p4299_p6 }
  0x19   : > { %p3937_p9 = pnand %p4315_p8, %p3935_p7 }
  0x1b   : > { %p3938_p10 = pneg %p3937_p9 }
  0x1d   : > { %p3943_p12 = pnand %p3941_p11, %p3938_p10 }
  0x1f   : > { %3946 = shalt.err (!%p3943_p12)
}
  0x20   : > { %s3947_s28 = scalar_lea.vmem %s4288_s22, 2048  ;;  %p3955_p5 = scmp.lt.s32.totalorder %s4288_s22, %s4288_s22 }
  0x21   : > { %p3948_p13 = scmp.ne.s32.totalorder %s4288_s22, %s3947_s28  ;;  %p3956_p4 = scmp.lt.s32.totalorder %s3947_s28, %s3947_s28 }
  0x23   : > { %p3950_p0 = pnand %p3948_p13, %p4315_p8  ;;  %p3957_p7 = por %p3956_p4, %p3955_p5 }
  0x25   : > { %p3951_p2 = pneg %p3950_p0 }
  0x27   : > { %p3958_p9 = pnand %p3957_p7, %p3951_p2 }
  0x29   : > { %3961 = shalt.err (!%p3958_p9)
}
  0x2a   : > { %s5352_s30 = smov 128   ;;  %s5355_s12 = smov 8  }
  0x2b   : > { %3587 = dma.hbm_to_vmem [thread:$0]  (!%p4299_p6), %s5340_s1, 2048, %s4288_s22, [#allocation6], %s5352_s30, %s5352_s30, %s5355_s12  }
  0x2c   : > { %s3962_s25 = scalar_lea.hbm %s5344_s5, 1024 }
  0x2d   : > { %p3963_p4 = scmp.ne.s32.totalorder %s5344_s5, %s3962_s25  ;;  %p3969_p12 = scmp.lt.u32.totalorder %s3962_s25, %s5344_s5 }
  0x2f   : > { %p3965_p10 = pnand %p3963_p4, %p4315_p8 }
  0x31   : > { %p3966_p11 = pneg %p3965_p10 }
  0x33   : > { %p3971_p13 = pnand %p3969_p12, %p3966_p11 }
  0x35   : > { %3974 = shalt.err (!%p3971_p13)
}
  0x36   : > { %s3975_s22 = scalar_lea.vmem %s4303_s26, 1024  ;;  %p3983_p7 = scmp.lt.s32.totalorder %s4303_s26, %s4303_s26 }
  0x37   : > { %p3976_p0 = scmp.ne.s32.totalorder %s4303_s26, %s3975_s22  ;;  %p3984_p9 = scmp.lt.s32.totalorder %s3975_s22, %s3975_s22 }
  0x39   : > { %p3978_p2 = pnand %p3976_p0, %p4315_p8  ;;  %p3985_p4 = por %p3984_p9, %p3983_p7 }
  0x3b   : > { %p3979_p5 = pneg %p3978_p2 }
  0x3d   : > { %p3986_p10 = pnand %p3985_p4, %p3979_p5 }
  0x3f   : > { %3989 = shalt.err (!%p3986_p10)
}
  0x40   : > { %s5356_s11 = smov 64   ;;  %s5357_s8 = smov 4  }
  0x41   : > { %3593 = dma.hbm_to_vmem [thread:$0]  (!%p4299_p6), %s5344_s5, 1024, %s4303_s26, [#allocation9], %s5356_s11, %s5356_s11, %s5357_s8  }
  0x42   : > { %s3990_s21 = scalar_lea.hbm %s5343_s4, 3072 }
  0x43   : > { %p3991_p11 = scmp.ne.s32.totalorder %s5343_s4, %s3990_s21  ;;  %p3997_p0 = scmp.lt.u32.totalorder %s3990_s21, %s5343_s4 }
  0x45   : > { %p3993_p12 = pnand %p3991_p11, %p4315_p8 }
  0x47   : > { %p3994_p13 = pneg %p3993_p12 }
  0x49   : > { %p3999_p2 = pnand %p3997_p0, %p3994_p13 }
  0x4b   : > { %4002 = shalt.err (!%p3999_p2)
}
  0x4c   : > { %s4003_s10 = scalar_lea.vmem %s329_s29, 3072  ;;  %p4011_p4 = scmp.lt.s32.totalorder %s329_s29, %s329_s29 }
  0x4d   : > { %p4004_p5 = scmp.ne.s32.totalorder %s329_s29, %s4003_s10  ;;  %p4012_p10 = scmp.lt.s32.totalorder %s4003_s10, %s4003_s10 }
  0x4f   : > { %p4006_p7 = pnand %p4004_p5, %p4315_p8  ;;  %p4013_p1 = por %p4012_p10, %p4011_p4 }
  0x51   : > { %p4007_p9 = pneg %p4006_p7 }
  0x53   : > { %p4014_p3 = pnand %p4013_p1, %p4007_p9 }
  0x55   : > { %4017 = shalt.err (!%p4014_p3)
}
  0x56   : > { %s4191_s26 = smov 192   ;;  %s4192_s13 = smov 12  }
  0x57   : > { %3590 = dma.hbm_to_vmem [thread:$0]  (!%p4299_p6), %s5343_s4, 3072, %s329_s29, [#allocation6], %s4191_s26, %s4191_s26, %s4192_s13  }
  0x58   : > { %s4193_s15 = smov [#allocation10]   ;;  %s4018_s22 = scalar_lea.hbm %s5346_s7, 4096 }
  0x59   : > { %s357_s21 = sshll.u32 %s4193_s15, 4  ;;  %p4019_p1 = scmp.ne.s32.totalorder %s5346_s7, %s4018_s22  ;;  %s358_s21 = int_to_ptr.vmem [resolvable:$true] %s357_s21 }
  0x5a   : > { %p4025_p12 = scmp.lt.u32.totalorder %s4018_s22, %s5346_s7 }
  0x5b   : > { %p4021_p3 = pnand %p4019_p1, %p4315_p8 }
  0x5d   : > { %p4022_p11 = pneg %p4021_p3 }
  0x5f   : > { %p4027_p13 = pnand %p4025_p12, %p4022_p11 }
  0x61   : > { %4030 = shalt.err (!%p4027_p13)
}
  0x62   : > { %s4031_s29 = scalar_lea.vmem %s358_s21, 4096  ;;  %p4039_p7 = scmp.lt.s32.totalorder %s358_s21, %s358_s21 }
  0x63   : > { %p4032_p0 = scmp.ne.s32.totalorder %s358_s21, %s4031_s29  ;;  %p4040_p9 = scmp.lt.s32.totalorder %s4031_s29, %s4031_s29 }
  0x65   : > { %p4034_p2 = pnand %p4032_p0, %p4315_p8  ;;  %p4041_p4 = por %p4040_p9, %p4039_p7 }
  0x67   : > { %p4035_p5 = pneg %p4034_p2 }
  0x69   : > { %p4042_p10 = pnand %p4041_p4, %p4035_p5 }
  0x6b   : > { %4045 = shalt.err (!%p4042_p10)
}
  0x6c   : > { %s4194_s12 = smov 256   ;;  %s4195_s26 = smov 16  }
  0x6d   : > { %3596 = dma.hbm_to_vmem [thread:$0]  (!%p4299_p6), %s5346_s7, 4096, %s358_s21, [#allocation9], %s4194_s12, %s4194_s12, %s4195_s26  }
  0x6e   : > { %s4196_s13 = smov [#allocation11]   ;;  %s4046_s25 = scalar_lea.hbm %s5348_s9, 4096 }
  0x6f   : > { %s373_s30 = sshll.u32 %s4196_s13, 4  ;;  %p4047_p1 = scmp.ne.s32.totalorder %s5348_s9, %s4046_s25  ;;  %s374_s30 = int_to_ptr.vmem [resolvable:$true] %s373_s30 }
  0x70   : > { %p4053_p12 = scmp.lt.u32.totalorder %s4046_s25, %s5348_s9 }
  0x71   : > { %p4049_p3 = pnand %p4047_p1, %p4315_p8 }
  0x73   : > { %p4050_p11 = pneg %p4049_p3 }
  0x75   : > { %p4055_p13 = pnand %p4053_p12, %p4050_p11 }
  0x77   : > { %4058 = shalt.err (!%p4055_p13)
}
  0x78   : > { %s4059_s21 = scalar_lea.vmem %s374_s30, 4096  ;;  %p4067_p7 = scmp.lt.s32.totalorder %s374_s30, %s374_s30 }
  0x79   : > { %p4060_p0 = scmp.ne.s32.totalorder %s374_s30, %s4059_s21  ;;  %p4068_p9 = scmp.lt.s32.totalorder %s4059_s21, %s4059_s21 }
  0x7b   : > { %p4062_p2 = pnand %p4060_p0, %p4315_p8  ;;  %p4069_p4 = por %p4068_p9, %p4067_p7 }
  0x7d   : > { %p4063_p5 = pneg %p4062_p2 }
  0x7f   : > { %p4070_p10 = pnand %p4069_p4, %p4063_p5 }
  0x81   : > { %4073 = shalt.err (!%p4070_p10)
}
  0x82   : > { %s5365_s12 = smov 4   ;;  %s5366_s26 = smov 64  }
  0x83   : > { %3599 = dma.hbm_to_vmem [thread:$0]  (!%p4299_p6), %s5348_s9, 4096, %s374_s30, [#allocation12], %s5366_s26, %s5366_s26, %s5365_s12  }
  0x84   : > { %s3114_s27 = sadd.s32 4294967294, %s4182_s20   ;;  %s4425_s16 = sadd.s32 1, %s4182_s20  }
  0x85   : > { %s37_s13 = sadd.s32 1, %s4178_s19  ;;  %s34_s14 = ssub.s32 %s4182_s20, %s4425_s16 }
  0x86   : > { %p44_p8 = scmp.ne.s32.totalorder %s4178_s19, %s4174_s18  ;;  %p35_p1 = scmp.eq.s32.totalorder %s34_s14, 0 }
  0x87   : > { %p45_p3 = scmp.eq.s32.totalorder %s4182_s20, 0  ;;  %p50_p11 = scmp.ne.s32.totalorder %s4174_s18, %s4170_s17 }
  0x88   : > { %p284_p12 = scmp.eq.s32.totalorder %s4283_s23, 1  ;;  %p5367_p0 = scmp.eq.s32.totalorder %s4283_s23, 0 }
  0x89   : > { %s4437_s15 = scalar_select %p35_p1, %s4178_s19, %s37_s13  }
  0x8a   : > { %p46_p13 = por %p45_p3, %p44_p8  ;;  %p4441_p2 = por %p5367_p0, %p50_p11 }
  0x8b   : > { %p4445_p6 = por %p284_p12, %p44_p8  ;;  %p290_p5 = scmp.eq.s32.totalorder %s3114_s27, 1 }
  0x8c   : > { %p3613_p7 = scmp.lt.s32.totalorder %s4182_s20, 2  ;;  %s390_s28 = sand.u32 1, %s4178_s19  }
  0x8d   : > { %s5369_s30 = scalar_select %p4445_p6, 1, 0 }
  0x8e   : > { %p4451_p9 = por %p290_p5, %p50_p11  ;;  %s3122_s10 = sshll.u32 %s390_s28, 7 }
  0x8f   : > { %s3238_s29 = sshll.u32 %s4182_s20, 11  ;;  %s394_s11 = scalar_lea.vmem [#allocation2], %s3122_s10 }
  0x90   : > { %s5370_s22 = scalar_select %p4451_p9, 1, 0 }
  0x91   : > { %s4459_s26 = scalar_lea.hbm %s5339_s0, %s3238_s29  ;;  %s401_s8 = sshll.u32 %s394_s11, 4  ;;  %s4465_s8 = int_to_ptr.vmem [resolvable:$true] %s401_s8 }
  0x92   : > { %p4461_p4 = pnand %p3613_p7, %p46_p13  ;;  %s4467_s13 = scalar_lea.sflag [#allocation3], %s390_s28 }
  0x93   : > { %s4074_s14 = scalar_lea.hbm %s4459_s26, 2048  ;;  %s4079_s21 = scalar_lea.hbm %s5339_s0, 4096 }
  0x94   : > { %p4075_p10 = scmp.ne.s32.totalorder %s4459_s26, %s4074_s14  ;;  %p4076_p8 = pneg %p4461_p4 }
  0x95   : > { %p4080_p11 = scmp.lt.u32.totalorder %s4459_s26, %s5339_s0  ;;  %p4081_p12 = scmp.lt.u32.totalorder %s4079_s21, %s4074_s14 }
  0x96   : > { %p4077_p1 = pnand %p4076_p8, %p4075_p10  ;;  %p4083_p0 = scmp.lt.u32.totalorder %s4074_s14, %s4459_s26 }
  0x97   : > { %p4082_p13 = por %p4081_p12, %p4080_p11 }
  0x98   : > { %p4078_p3 = pneg %p4077_p1 }
  0x99   : > { %p4084_p5 = por %p4083_p0, %p4082_p13 }
  0x9b   : > { %p4085_p7 = pnand %p4084_p5, %p4078_p3 }
  0x9d   : > { %4088 = shalt.err (!%p4085_p7)
}
  0x9e   : > { %s4089_s28 = scalar_lea.vmem %s4465_s8, 2048  ;;  %s4197_s10 = smov [#allocation2]  }
  0x9f   : > { %p4090_p10 = scmp.ne.s32.totalorder %s4465_s8, %s4089_s28  ;;  %s4094_s29 = sshll.u32 %s4197_s10, 4  ;;  %s4095_s29 = int_to_ptr.vmem [resolvable:$false] %s4094_s29 }
  0xa0   : > { %s4096_s12 = scalar_lea.vmem %s4095_s29, 4096  ;;  %p4097_p6 = scmp.lt.s32.totalorder %s4465_s8, %s4095_s29 }
  0xa1   : > { %p4092_p1 = pnand %p4090_p10, %p4076_p8  ;;  %p4098_p11 = scmp.lt.s32.totalorder %s4096_s12, %s4089_s28 }
  0xa3   : > { %p4093_p9 = pneg %p4092_p1  ;;  %p4099_p12 = por %p4098_p11, %p4097_p6 }
  0xa5   : > { %p4100_p13 = pnand %p4099_p12, %p4093_p9 }
  0xa7   : > { %4103 = shalt.err (!%p4100_p13)
}
  0xa8   : > { %s5372_s14 = smov 8   ;;  %s5373_s21 = smov 128  }
  0xa9   : > { %3603 = dma.hbm_to_vmem [thread:$0]  (!%p4461_p4), %s4459_s26, 2048, %s4465_s8, %s4467_s13, %s5373_s21, %s5373_s21, %s5372_s14  }
  0xaa   : > { %p5374_p8 = scmp.ne.s32.totalorder %s5362_s24, 0 }
  0xab   : > { %s4501_s11 = sand.u32 (!%p5374_p8), 1, %s4174_s18  }
  0xac   : > { %413 = sbr.rel (%p5374_p8) target bundleno = 2304 (0x900), region = 64  ;;  %s3126_s28 = sshll.u32 (!%p5374_p8), %s4501_s11, 7 }
  0xad   : > { %s416_s10 = scalar_lea.sflag (!%p5374_p8), [#allocation3], %s4501_s11  ;;  %s4507_s27 = scalar_lea.vmem (!%p5374_p8), [#allocation2], %s3126_s28 }
  0xb3   : > { %4149 = dma.done.wait (%p4441_p2), %s416_s10, 2048  }
  0xb4   : > { %4151 = vsyncadd (%p4441_p2), %s416_s10, 4294965248  ;;  %p5375_p6 = scmp.eq.s32.totalorder %s4283_s23, 0 }
  0xb6   : > { %4153 = dma.done.wait (%p5375_p6), [#allocation6], 5120   ;;  %p5376_p9 = pmov %p5375_p6 }
  0xb7   : > { %p5377_p4 = pmov %p5375_p6 }
  0xb8   : > { %4155 = vsyncadd (%p5376_p9), [#allocation6], 4294962176 }
  0xb9   : > { %4157 = dma.done.wait (%p5377_p4), [#allocation9], 5120   ;;  %p5378_p3 = pmov %p5377_p4 }
  0xbb   : > { %4159 = vsyncadd (%p5378_p3), [#allocation9], 4294962176  ;;  %p5379_p0 = pmov %p5378_p3 }
  0xbd   : > { %4161 = dma.done.wait (%p5379_p0), [#allocation12], 4096   ;;  %p5380_p5 = pmov %p5379_p0 }
  0xbe   : > { %v4526_v0 = vld [vmem:[%s4507_s27] sm:$0xff]  ;;  %v4529_v1 = vld [vmem:[%s4507_s27 + $0x8] sm:$0xff]  ;;  %v4538_v4 = vld [vmem:[%s4507_s27 + $0x10] sm:$0xff]  ;;  %v4198_v49 = vmov 0   ;;  %s5381_s25 = sld [smem:[#allocation19_spill]]  ;;  %s5382_s13 = sld [smem:[#allocation20_spill]] }
  0xbf   : > { %4163 = vsyncadd (%p5380_p5), [#allocation12], 4294963200  ;;  %497 = vadd.xlane.f32.xlu0 %v4526_v0  ;;  %v546_v2 = vmul.f32 %v4526_v0, %v4526_v0  ;;  %v547_v3 = vmul.f32 %v4529_v1, %v4529_v1  ;;  %v4541_v5 = vld [vmem:[%s4507_s27 + $0x18] sm:$0xff]  ;;  %v3668_v6 = vld [vmem:[#allocation7 + $0x4] ss:$12 sps:$4 sm:$0xff]   ;;  %v548_v7 = vmul.f32 %v4538_v4, %v4538_v4  ;;  %950 = vmatprep.mubr.bf16.mxu0 %v4198_v49  ;;  %s5241_s29 = scalar_lea.vmem [#allocation13], %s3126_s28 }
  0xc0   : > { %918 = vmatprep.subr.bf16.mxu0 %v3668_v6  ;;  %v549_v8 = vmul.f32 %v4541_v5, %v4541_v5  ;;  %v4550_v9 = vld [vmem:[%s4507_s27 + $0x20] sm:$0xff]  ;;  %v4553_v11 = vld [vmem:[%s4507_s27 + $0x28] sm:$0xff]  ;;  %v4562_v16 = vld [vmem:[%s4507_s27 + $0x30] sm:$0xff]  ;;  %s3239_s28 = sshll.u32 %s4283_s23, 11  ;;  %s2993_s12 = sshll.u32 %s5241_s29, 4  ;;  %s5292_s12 = int_to_ptr.vmem [resolvable:$true] %s2993_s12 }
  0xc1   : > { %562 = vadd.xlane.f32.xlu1 %v546_v2  ;;  %v3670_v10 = vld [vmem:[#allocation7] ss:$12 sps:$4 sm:$0xff]   ;;  %v3671_v12 = vld [vmem:[#allocation7 + $0x1c] ss:$12 sps:$4 sm:$0xff]   ;;  %v550_v13 = vmul.f32 %v4550_v9, %v4550_v9  ;;  %v3673_v14 = vld [vmem:[#allocation7 + $0x18] ss:$12 sps:$4 sm:$0xff]   ;;  %v551_v15 = vmul.f32 %v4553_v11, %v4553_v11  ;;  %v552_v23 = vmul.f32 %v4562_v16, %v4562_v16 }
  0xc2   : > { %919 = vmatpush1.bf16.msra.mxu0 %v3670_v10  ;;  %v3674_v17 = vld [vmem:[#allocation7 + $0x34] ss:$12 sps:$4 sm:$0xff]   ;;  %v3677_v19 = vld [vmem:[#allocation7 + $0x30] ss:$12 sps:$4 sm:$0xff]   ;;  %v3678_v21 = vld [vmem:[#allocation7 + $0x4c] ss:$12 sps:$4 sm:$0xff]  }
  0xc3   : > { %499 = vadd.xlane.f32.xlu0 %v4529_v1  ;;  %920 = vmatprep.subr.bf16.mxu0 %v3671_v12  ;;  %v3676_v18 = vld [vmem:[#allocation7 + $0x8] ss:$12 sps:$4 sm:$0xff]   ;;  %v4565_v20 = vld [vmem:[%s4507_s27 + $0x38] sm:$0xff]  ;;  %v3680_v22 = vld [vmem:[#allocation7 + $0x20] ss:$12 sps:$4 sm:$0xff]   ;;  %s5383_s10 = sld [smem:[#allocation21_spill]] }
  0xc4   : > { %3432 = vmatprep.subr.bf16.mxu1 %v3676_v18  ;;  %v3681_v24 = vld [vmem:[#allocation7 + $0x48] ss:$12 sps:$4 sm:$0xff]   ;;  %v553_v25 = vmul.f32 %v4565_v20, %v4565_v20  ;;  %v4574_v26 = vld [vmem:[%s4507_s27 + $0x40] sm:$0xff]  ;;  %v3688_v33 = vld [vmem:[#allocation7 + $0x50] ss:$12 sps:$4 sm:$0xff]   ;;  %s2980_s24 = scalar_lea.sflag [#allocation4], %s4501_s11 }
  0xc5   : > { %564 = vadd.xlane.f32.xlu1 %v547_v3  ;;  %3433 = vmatpush3.bf16.msra.mxu1 %v3676_v18  ;;  %v3682_v27 = vld [vmem:[#allocation7 + $0x64] ss:$12 sps:$4 sm:$0xff]   ;;  %v3685_v29 = vld [vmem:[#allocation7 + $0x60] ss:$12 sps:$4 sm:$0xff]   ;;  %v554_v31 = vmul.f32 %v4574_v26, %v4574_v26  ;;  %v3686_v32 = vld [vmem:[#allocation7 + $0x7c] ss:$12 sps:$4 sm:$0xff]  }
  0xc6   : > { %921 = vmatpush1.bf16.msra.mxu0 %v3673_v14  ;;  %3434 = vmatprep.subr.bf16.mxu1 %v3680_v22  ;;  %v3684_v28 = vld [vmem:[#allocation7 + $0x38] ss:$12 sps:$4 sm:$0xff]   ;;  %v4577_v30 = vld [vmem:[%s4507_s27 + $0x48] sm:$0xff]  ;;  %v4586_v36 = vld [vmem:[%s4507_s27 + $0x50] sm:$0xff]  ;;  %s4104_s23 = scalar_lea.vmem %s5292_s12, 2048  ;;  %p5384_p7 = scmp.ne.s32.totalorder %s5369_s30, 0 }
  0xc7   : > { %501 = vadd.xlane.f32.xlu0 %v4538_v4  ;;  %922 = vmatprep.subr.bf16.mxu0 %v3674_v17  ;;  %v3689_v34 = vld [vmem:[#allocation7 + $0x78] ss:$12 sps:$4 sm:$0xff]   ;;  %v555_v35 = vmul.f32 %v4577_v30, %v4577_v30  ;;  %v3690_v37 = vld [vmem:[#allocation7 + $0x94] ss:$12 sps:$4 sm:$0xff]   ;;  %v3693_v40 = vld [vmem:[#allocation7 + $0x90] ss:$12 sps:$4 sm:$0xff]   ;;  %v556_v41 = vmul.f32 %v4586_v36, %v4586_v36  ;;  %p4105_p2 = scmp.ne.s32.totalorder %s5292_s12, %s4104_s23 }
  0xc8   : > { %v3692_v38 = vld [vmem:[#allocation7 + $0x68] ss:$12 sps:$4 sm:$0xff]   ;;  %v4589_v39 = vld [vmem:[%s4507_s27 + $0x58] sm:$0xff]  ;;  %v3696_v43 = vld [vmem:[#allocation7 + $0x80] ss:$12 sps:$4 sm:$0xff]  }
  0xc9   : > { %503 = vadd.xlane.f32.xlu1 %v4541_v5  ;;  %3435 = vmatpush3.bf16.msra.mxu1 %v3680_v22  ;;  %v3694_v42 = vld [vmem:[#allocation7 + $0xac] ss:$12 sps:$4 sm:$0xff]   ;;  %v3697_v44 = vld [vmem:[#allocation7 + $0xa8] ss:$12 sps:$4 sm:$0xff]   ;;  %v557_v45 = vmul.f32 %v4589_v39, %v4589_v39  ;;  %v4598_v46 = vld [vmem:[%s4507_s27 + $0x60] sm:$0xff]  ;;  %p4106_p10 = pnand %p4105_p2, %p5384_p7 }
  0xca   : > { %923 = vmatpush1.bf16.msra.mxu0 %v3677_v19  ;;  %3436 = vmatprep.subr.bf16.mxu1 %v3684_v28  ;;  %v3698_v47 = vld [vmem:[#allocation7 + $0x98] ss:$12 sps:$4 sm:$0xff]   ;;  %v4601_v48 = vld [vmem:[%s4507_s27 + $0x68] sm:$0xff]  ;;  %v558_v50 = vmul.f32 %v4598_v46, %v4598_v46  ;;  %v3699_v51 = vld [vmem:[#allocation7 + $0xb0] ss:$12 sps:$4 sm:$0xff]  }
  0xcb   : > { %566 = vadd.xlane.f32.xlu0 %v548_v7  ;;  %924 = vmatprep.subr.bf16.mxu0 %v3678_v21  ;;  %v559_v52 = vmul.f32 %v4601_v48, %v4601_v48  ;;  %v4611_v53 = vld [vmem:[%s4507_s27 + $0x70] sm:$0xff]  ;;  %v4614_v54 = vld [vmem:[%s4507_s27 + $0x78] sm:$0xff]  ;;  %p4107_p1 = pneg %p4106_p10 }
  0xcc   : > { %v560_v55 = vmul.f32 %v4611_v53, %v4611_v53  ;;  %v561_v56 = vmul.f32 %v4614_v54, %v4614_v54 }
  0xcd   : > { %568 = vadd.xlane.f32.xlu1 %v549_v8  ;;  %3437 = vmatpush3.bf16.msra.mxu1 %v3684_v28 }
  0xce   : > { %925 = vmatpush1.bf16.msra.mxu0 %v3681_v24  ;;  %3438 = vmatprep.subr.bf16.mxu1 %v3688_v33 }
  0xcf   : > { %505 = vadd.xlane.f32.xlu0 %v4550_v9  ;;  %926 = vmatprep.subr.bf16.mxu0 %v3682_v27 }
  0xd1   : > { %507 = vadd.xlane.f32.xlu1 %v4553_v11  ;;  %3439 = vmatpush3.bf16.msra.mxu1 %v3688_v33 }
  0xd2   : > { %927 = vmatpush1.bf16.msra.mxu0 %v3685_v29  ;;  %3440 = vmatprep.subr.bf16.mxu1 %v3692_v38 }
  0xd3   : > { %570 = vadd.xlane.f32.xlu0 %v550_v13  ;;  %928 = vmatprep.subr.bf16.mxu0 %v3686_v32 }
  0xd5   : > { %572 = vadd.xlane.f32.xlu1 %v551_v15  ;;  %3441 = vmatpush3.bf16.msra.mxu1 %v3692_v38 }
  0xd6   : > { %929 = vmatpush1.bf16.msra.mxu0 %v3689_v34  ;;  %3442 = vmatprep.subr.bf16.mxu1 %v3696_v43 }
  0xd7   : > { %509 = vadd.xlane.f32.xlu0 %v4562_v16  ;;  %930 = vmatprep.subr.bf16.mxu0 %v3690_v37 }
  0xd9   : > { %511 = vadd.xlane.f32.xlu1 %v4565_v20  ;;  %3443 = vmatpush3.bf16.msra.mxu1 %v3696_v43  ;;  %v4632_v43 = vld [vmem:[%s5341_s2] ss:$0 sm:$0xff] }
  0xda   : > { %931 = vmatpush1.bf16.msra.mxu0 %v3693_v40  ;;  %3444 = vmatprep.subr.bf16.mxu1 %v3698_v47 }
  0xdb   : > { %574 = vadd.xlane.f32.xlu0 %v552_v23  ;;  %932 = vmatprep.subr.bf16.mxu0 %v3694_v42 }
  0xdd   : > { %576 = vadd.xlane.f32.xlu1 %v553_v25  ;;  %3445 = vmatpush3.bf16.msra.mxu1 %v3698_v47 }
  0xde   : > { %933 = vmatpush1.bf16.msra.mxu0 %v3697_v44  ;;  %3446 = vmatprep.subr.bf16.mxu1 %v3699_v51 }
  0xdf   : > { %513 = vadd.xlane.f32.xlu0 %v4574_v26 }
  0xe1   : > { %515 = vadd.xlane.f32.xlu1 %v4577_v30  ;;  %3447 = vmatpush3.bf16.msra.mxu1 %v3699_v51 }
  0xe3   : > { %578 = vadd.xlane.f32.xlu0 %v554_v31 }
  0xe5   : > { %580 = vadd.xlane.f32.xlu1 %v555_v35 }
  0xe7   : > { %517 = vadd.xlane.f32.xlu0 %v4586_v36 }
  0xe9   : > { %519 = vadd.xlane.f32.xlu1 %v4589_v39 }
  0xeb   : > { %582 = vadd.xlane.f32.xlu0 %v556_v41 }
  0xed   : > { %584 = vadd.xlane.f32.xlu1 %v557_v45 }
  0xef   : > { %521 = vadd.xlane.f32.xlu0 %v4598_v46 }
  0xf1   : > { %523 = vadd.xlane.f32.xlu1 %v4601_v48 }
  0xf3   : > { %586 = vadd.xlane.f32.xlu0 %v558_v50 }
  0xf5   : > { %588 = vadd.xlane.f32.xlu1 %v559_v52 }
  0xf7   : > { %525 = vadd.xlane.f32.xlu0 %v4611_v53 }
  0xf9   : > { %527 = vadd.xlane.f32.xlu1 %v4614_v54 }
  0xfb   : > { %590 = vadd.xlane.f32.xlu0 %v560_v55 }
  0xfd   : > { %592 = vadd.xlane.f32.xlu1 %v561_v56 }
 0x14c   : > { %v498_v57 = vpop.xlane.xlu0 %497 }
 0x14d   : > { %v530_v58 = vmul.f32 0.0078125, %v498_v57 }
 0x14e   : > { %v563_v59 = vpop.xlane.xlu1 %562 }
 0x14f   : > { %v610_v60 = vmul.f32 %v530_v58, %v530_v58  ;;  %v594_v61 = vmul.f32 0.0078125, %v563_v59  ;;  %v642_v32 = vsub.f32 %v4526_v0, %v530_v58 }
 0x150   : > { %v500_v62 = vpop.xlane.xlu0 %499 }
 0x151   : > { %v626_v63 = vsub.f32 %v594_v61, %v610_v60  ;;  %v531_v2 = vmul.f32 0.0078125, %v500_v62  ;;  %v4643_v60 = vld [vmem:[%s5342_s3] ss:$0 sm:$0xff] }
 0x152   : > { %v565_v3 = vpop.xlane.xlu1 %564 }
 0x153   : > { %v658_v6 = vadd.f32 1e-05, %v626_v63  ;;  %v611_v7 = vmul.f32 %v531_v2, %v531_v2  ;;  %v595_v8 = vmul.f32 0.0078125, %v565_v3  ;;  %v643_v0 = vsub.f32 %v4529_v1, %v531_v2 }
 0x154   : > { %v502_v10 = vpop.xlane.xlu0 %501 }
 0x155   : > { %3788 = vrsqrt.f32 %v658_v6  ;;  %v627_v12 = vsub.f32 %v595_v8, %v611_v7  ;;  %v532_v13 = vmul.f32 0.0078125, %v502_v10 }
 0x156   : > { %v504_v14 = vpop.xlane.xlu1 %503 }
 0x157   : > { %v659_v15 = vadd.f32 1e-05, %v627_v12  ;;  %v612_v17 = vmul.f32 %v532_v13, %v532_v13  ;;  %v533_v18 = vmul.f32 0.0078125, %v504_v14  ;;  %v644_v2 = vsub.f32 %v4538_v4, %v532_v13 }
 0x158   : > { %v567_v19 = vpop.xlane.xlu0 %566 }
 0x159   : > { %3790 = vrsqrt.f32 %v659_v15  ;;  %v596_v21 = vmul.f32 0.0078125, %v567_v19  ;;  %v613_v23 = vmul.f32 %v533_v18, %v533_v18  ;;  %v645_v14 = vsub.f32 %v4541_v5, %v533_v18 }
 0x15a   : > { %v569_v22 = vpop.xlane.xlu1 %568 }
 0x15b   : > { %v628_v24 = vsub.f32 %v596_v21, %v612_v17  ;;  %v597_v25 = vmul.f32 0.0078125, %v569_v22 }
 0x15c   : > { %v506_v27 = vpop.xlane.xlu0 %505 }
 0x15d   : > { %v660_v28 = vadd.f32 1e-05, %v628_v24  ;;  %v629_v29 = vsub.f32 %v597_v25, %v613_v23  ;;  %v4622_v31 = vmul.f32 0.0078125, %v506_v27 }
 0x15e   : > { %v508_v33 = vpop.xlane.xlu1 %507 }
 0x15f   : > { %v3789_v34 = vpop.eup %3788  ;;  %3792 = vrsqrt.f32 %v660_v28  ;;  %v661_v35 = vadd.f32 1e-05, %v629_v29  ;;  %v614_v37 = vmul.f32 %v4622_v31, %v4622_v31  ;;  %v4627_v38 = vmul.f32 0.0078125, %v508_v33 }
 0x160   : > { %v571_v40 = vpop.xlane.xlu0 %570  ;;  %v690_v41 = vmul.f32 %v3789_v34, %v642_v32  ;;  %v646_v34 = vsub.f32 %v4550_v9, %v4622_v31 }
 0x161   : > { %3794 = vrsqrt.f32 %v661_v35  ;;  %v598_v42 = vmul.f32 0.0078125, %v571_v40  ;;  %v615_v47 = vmul.f32 %v4627_v38, %v4627_v38 }
 0x162   : > { %v573_v44 = vpop.xlane.xlu1 %572  ;;  %v712_v56 = vmul.f32 %v4632_v43, %v690_v41 }
 0x163   : > { %v3791_v45 = vpop.eup %3790  ;;  %v630_v50 = vsub.f32 %v598_v42, %v614_v37  ;;  %v599_v51 = vmul.f32 0.0078125, %v573_v44  ;;  %v647_v44 = vsub.f32 %v4553_v11, %v4627_v38 }
 0x164   : > { %v510_v52 = vpop.xlane.xlu0 %509  ;;  %v691_v55 = vmul.f32 %v3791_v45, %v643_v0  ;;  %v734_v7 = vadd.f32 %v4643_v60, %v712_v56 }
 0x165   : > { %v662_v57 = vadd.f32 1e-05, %v630_v50  ;;  %v631_v58 = vsub.f32 %v599_v51, %v615_v47  ;;  %v4638_v59 = vmul.f32 0.0078125, %v510_v52 }
 0x166   : > { %v512_v1 = vpop.xlane.xlu1 %511  ;;  %v713_v61 = vmul.f32 %v4632_v43, %v691_v55 }
 0x167   : > { %3796 = vrsqrt.f32 %v662_v57  ;;  %v663_v62 = vadd.f32 1e-05, %v631_v58  ;;  %v616_v63 = vmul.f32 %v4638_v59, %v4638_v59  ;;  %v4649_v3 = vmul.f32 0.0078125, %v512_v1 }
 0x168   : > { %v575_v6 = vpop.xlane.xlu0 %574  ;;  %v735_v8 = vadd.f32 %v4643_v60, %v713_v61 }
 0x169   : > { %v3793_v10 = vpop.eup %3792  ;;  %3798 = vrsqrt.f32 %v663_v62  ;;  %v600_v12 = vmul.f32 0.0078125, %v575_v6  ;;  %v617_v22 = vmul.f32 %v4649_v3, %v4649_v3 }
 0x16a   : > { %v577_v15 = vpop.xlane.xlu1 %576  ;;  %v750_v17 = vpack.c.bf16 %v735_v8, %v734_v7  ;;  %v692_v19 = vmul.f32 %v3793_v10, %v644_v2  ;;  %v648_v2 = vsub.f32 %v4562_v16, %v4638_v59 }
 0x16b   : > { %v3795_v21 = vpop.eup %3794  ;;  %v632_v4 = vsub.f32 %v600_v12, %v616_v63  ;;  %v601_v13 = vmul.f32 0.0078125, %v577_v15  ;;  %v649_v15 = vsub.f32 %v4565_v20, %v4649_v3 }
 0x16c   : > { %v514_v23 = vpop.xlane.xlu0 %513  ;;  %951 = vmatmul.mubr.bf16.vlgmr.msra.gmra.mrb[0].mxu0 %v750_v17  ;;  %3448 = vmatprep.mubr.bf16.mxu1 %v750_v17  ;;  %v693_v24 = vmul.f32 %v3795_v21, %v645_v14  ;;  %v714_v25 = vmul.f32 %v4632_v43, %v692_v19 }
 0x16d   : > { %v664_v27 = vadd.f32 1e-05, %v632_v4  ;;  %v633_v28 = vsub.f32 %v601_v13, %v617_v22  ;;  %v4657_v29 = vmul.f32 0.0078125, %v514_v23  ;;  %960 = vmatprep.mubr.bf16.mxu0 %v4198_v49 }
 0x16e   : > { %v516_v5 = vpop.xlane.xlu1 %515  ;;  %v715_v18 = vmul.f32 %v4632_v43, %v693_v24  ;;  %v736_v40 = vadd.f32 %v4643_v60, %v714_v25 }
 0x16f   : > { %3800 = vrsqrt.f32 %v664_v27  ;;  %v665_v32 = vadd.f32 1e-05, %v633_v28  ;;  %v618_v33 = vmul.f32 %v4657_v29, %v4657_v29  ;;  %v4665_v35 = vmul.f32 0.0078125, %v516_v5 }
 0x170   : > { %v579_v37 = vpop.xlane.xlu0 %578  ;;  %v737_v41 = vadd.f32 %v4643_v60, %v715_v18 }
 0x171   : > { %v3797_v42 = vpop.eup %3796  ;;  %3802 = vrsqrt.f32 %v665_v32  ;;  %v602_v0 = vmul.f32 0.0078125, %v579_v37  ;;  %v619_v9 = vmul.f32 %v4665_v35, %v4665_v35  ;;  %v650_v32 = vsub.f32 %v4574_v26, %v4657_v29 }
 0x172   : > { %v581_v45 = vpop.xlane.xlu1 %580  ;;  %v751_v47 = vpack.c.bf16 %v737_v41, %v736_v40  ;;  %v694_v50 = vmul.f32 %v3797_v42, %v646_v34 }
 0x173   : > { %v3799_v51 = vpop.eup %3798  ;;  %v634_v31 = vsub.f32 %v602_v0, %v618_v33  ;;  %v603_v52 = vmul.f32 0.0078125, %v581_v45  ;;  %v651_v0 = vsub.f32 %v4577_v30, %v4665_v35 }
 0x174   : > { %v518_v55 = vpop.xlane.xlu0 %517  ;;  %961 = vmatmul.mubr.bf16.gmra.mrb[4].mxu0 %v751_v47  ;;  %3449 = vmatmul.mubr.bf16.vlgmr.msra.gmra.mrb[0].mxu1 %v751_v47  ;;  %v695_v56 = vmul.f32 %v3799_v51, %v647_v44  ;;  %v716_v57 = vmul.f32 %v4632_v43, %v694_v50 }
 0x175   : > { %v666_v58 = vadd.f32 1e-05, %v634_v31  ;;  %v635_v1 = vsub.f32 %v603_v52, %v619_v9  ;;  %v4674_v61 = vmul.f32 0.0078125, %v518_v55  ;;  %970 = vmatprep.mubr.bf16.mxu0 %v4198_v49 }
 0x176   : > { %v520_v11 = vpop.xlane.xlu1 %519  ;;  %v717_v38 = vmul.f32 %v4632_v43, %v695_v56  ;;  %v738_v8 = vadd.f32 %v4643_v60, %v716_v57 }
 0x177   : > { %3804 = vrsqrt.f32 %v666_v58  ;;  %v667_v62 = vadd.f32 1e-05, %v635_v1  ;;  %v620_v63 = vmul.f32 %v4674_v61, %v4674_v61  ;;  %v4682_v6 = vmul.f32 0.0078125, %v520_v11 }
 0x178   : > { %v583_v7 = vpop.xlane.xlu0 %582  ;;  %v739_v10 = vadd.f32 %v4643_v60, %v717_v38  ;;  %v652_v11 = vsub.f32 %v4586_v36, %v4674_v61 }
 0x179   : > { %v3801_v12 = vpop.eup %3800  ;;  %3806 = vrsqrt.f32 %v667_v62  ;;  %v604_v14 = vmul.f32 0.0078125, %v583_v7  ;;  %v621_v16 = vmul.f32 %v4682_v6, %v4682_v6 }
 0x17a   : > { %v585_v17 = vpop.xlane.xlu1 %584  ;;  %v752_v19 = vpack.c.bf16 %v739_v10, %v738_v8  ;;  %v696_v21 = vmul.f32 %v3801_v12, %v648_v2  ;;  %v653_v10 = vsub.f32 %v4589_v39, %v4682_v6 }
 0x17b   : > { %v3803_v22 = vpop.eup %3802  ;;  %v636_v59 = vsub.f32 %v604_v14, %v620_v63  ;;  %v605_v4 = vmul.f32 0.0078125, %v585_v17 }
 0x17c   : > { %v522_v13 = vpop.xlane.xlu0 %521  ;;  %971 = vmatmul.mubr.bf16.gmra.mrb[8].mxu0 %v752_v19  ;;  %3452 = vmatprep.mubr.bf16.mxu1 %v752_v19  ;;  %v697_v23 = vmul.f32 %v3803_v22, %v649_v15  ;;  %v718_v24 = vmul.f32 %v4632_v43, %v696_v21 }
 0x17d   : > { %v668_v25 = vadd.f32 1e-05, %v636_v59  ;;  %v637_v27 = vsub.f32 %v605_v4, %v621_v16  ;;  %v4691_v28 = vmul.f32 0.0078125, %v522_v13  ;;  %980 = vmatprep.mubr.bf16.mxu0 %v4198_v49 }
 0x17e   : > { %v524_v20 = vpop.xlane.xlu1 %523  ;;  %v719_v3 = vmul.f32 %v4632_v43, %v697_v23  ;;  %v740_v37 = vadd.f32 %v4643_v60, %v718_v24 }
 0x17f   : > { %3808 = vrsqrt.f32 %v668_v25  ;;  %v669_v5 = vadd.f32 1e-05, %v637_v27  ;;  %v622_v18 = vmul.f32 %v4691_v28, %v4691_v28  ;;  %v4699_v33 = vmul.f32 0.0078125, %v524_v20 }
 0x180   : > { %v587_v34 = vpop.xlane.xlu0 %586  ;;  %v741_v40 = vadd.f32 %v4643_v60, %v719_v3  ;;  %v654_v6 = vsub.f32 %v4598_v46, %v4691_v28 }
 0x181   : > { %v3805_v41 = vpop.eup %3804  ;;  %3810 = vrsqrt.f32 %v669_v5  ;;  %v606_v42 = vmul.f32 0.0078125, %v587_v34  ;;  %v623_v26 = vmul.f32 %v4699_v33, %v4699_v33  ;;  %v655_v25 = vsub.f32 %v4601_v48, %v4699_v33 }
 0x182   : > { %v589_v44 = vpop.xlane.xlu1 %588  ;;  %v753_v45 = vpack.c.bf16 %v741_v40, %v740_v37  ;;  %v698_v47 = vmul.f32 %v3805_v41, %v650_v32 }
 0x183   : > { %v3807_v50 = vpop.eup %3806  ;;  %v638_v29 = vsub.f32 %v606_v42, %v622_v18  ;;  %v607_v51 = vmul.f32 0.0078125, %v589_v44 }
 0x184   : > { %v526_v9 = vpop.xlane.xlu0 %525  ;;  %981 = vmatmul.mubr.bf16.gmra.mrb[12].mxu0 %v753_v45  ;;  %3453 = vmatmul.mubr.bf16.gmra.mrb[4].mxu1 %v753_v45  ;;  %v699_v31 = vmul.f32 %v3807_v50, %v651_v0  ;;  %v720_v52 = vmul.f32 %v4632_v43, %v698_v47 }
 0x185   : > { %v670_v55 = vadd.f32 1e-05, %v638_v29  ;;  %v639_v56 = vsub.f32 %v607_v51, %v623_v26  ;;  %v544_v57 = vmul.f32 0.0078125, %v526_v9  ;;  %990 = vmatprep.mubr.bf16.mxu0 %v4198_v49 }
 0x186   : > { %v528_v30 = vpop.xlane.xlu1 %527  ;;  %v721_v35 = vmul.f32 %v4632_v43, %v699_v31  ;;  %v742_v63 = vadd.f32 %v4643_v60, %v720_v52 }
 0x187   : > { %3812 = vrsqrt.f32 %v670_v55  ;;  %v671_v58 = vadd.f32 1e-05, %v639_v56  ;;  %v624_v1 = vmul.f32 %v544_v57, %v544_v57  ;;  %v545_v38 = vmul.f32 0.0078125, %v528_v30 }
 0x188   : > { %v591_v62 = vpop.xlane.xlu0 %590  ;;  %v743_v2 = vadd.f32 %v4643_v60, %v721_v35  ;;  %v656_v28 = vsub.f32 %v4611_v53, %v544_v57 }
 0x189   : > { %v3809_v7 = vpop.eup %3808  ;;  %3814 = vrsqrt.f32 %v671_v58  ;;  %v608_v8 = vmul.f32 0.0078125, %v591_v62  ;;  %v625_v19 = vmul.f32 %v545_v38, %v545_v38  ;;  %v657_v48 = vsub.f32 %v4614_v54, %v545_v38 }
 0x18a   : > { %v593_v12 = vpop.xlane.xlu1 %592  ;;  %v754_v14 = vpack.c.bf16 %v743_v2, %v742_v63  ;;  %v700_v15 = vmul.f32 %v3809_v7, %v652_v11 }
 0x18b   : > { %v3811_v17 = vpop.eup %3810  ;;  %v640_v21 = vsub.f32 %v608_v8, %v624_v1  ;;  %v609_v22 = vmul.f32 0.0078125, %v593_v12 }
 0x18c   : > { %991 = vmatmul.mubr.bf16.gmra.mrb[16].mxu0 %v754_v14  ;;  %3456 = vmatprep.mubr.bf16.mxu1 %v754_v14  ;;  %v701_v36 = vmul.f32 %v3811_v17, %v653_v10  ;;  %v722_v61 = vmul.f32 %v4632_v43, %v700_v15 }
 0x18d   : > { %v672_v16 = vadd.f32 1e-05, %v640_v21  ;;  %v641_v59 = vsub.f32 %v609_v22, %v625_v19  ;;  %1000 = vmatprep.mubr.bf16.mxu0 %v4198_v49 }
 0x18e   : > { %v723_v4 = vmul.f32 %v4632_v43, %v701_v36  ;;  %v744_v13 = vadd.f32 %v4643_v60, %v722_v61 }
 0x18f   : > { %3816 = vrsqrt.f32 %v672_v16  ;;  %v673_v39 = vadd.f32 1e-05, %v641_v59 }
 0x190   : > { %v745_v23 = vadd.f32 %v4643_v60, %v723_v4 }
 0x191   : > { %v3813_v24 = vpop.eup %3812  ;;  %3818 = vrsqrt.f32 %v673_v39 }
 0x192   : > { %v755_v27 = vpack.c.bf16 %v745_v23, %v744_v13  ;;  %v702_v20 = vmul.f32 %v3813_v24, %v654_v6 }
 0x193   : > { %v3815_v3 = vpop.eup %3814 }
 0x194   : > { %1001 = vmatmul.mubr.bf16.gmra.mrb[20].mxu0 %v755_v27  ;;  %3457 = vmatmul.mubr.bf16.gmra.mrb[8].mxu1 %v755_v27  ;;  %v703_v5 = vmul.f32 %v3815_v3, %v655_v25  ;;  %v724_v18 = vmul.f32 %v4632_v43, %v702_v20 }
 0x195   : > { %1010 = vmatprep.mubr.bf16.mxu0 %v4198_v49 }
 0x196   : > { %v725_v46 = vmul.f32 %v4632_v43, %v703_v5  ;;  %v746_v32 = vadd.f32 %v4643_v60, %v724_v18 }
 0x198   : > { %v747_v34 = vadd.f32 %v4643_v60, %v725_v46 }
 0x199   : > { %v3817_v37 = vpop.eup %3816 }
 0x19a   : > { %v756_v33 = vpack.c.bf16 %v747_v34, %v746_v32  ;;  %v704_v40 = vmul.f32 %v3817_v37, %v656_v28 }
 0x19b   : > { %v3819_v41 = vpop.eup %3818 }
 0x19c   : > { %1011 = vmatmul.mubr.bf16.gmra.mrb[24].mxu0 %v756_v33  ;;  %3460 = vmatprep.mubr.bf16.mxu1 %v756_v33  ;;  %v705_v42 = vmul.f32 %v3819_v41, %v657_v48  ;;  %v726_v0 = vmul.f32 %v4632_v43, %v704_v40 }
 0x19d   : > { %1020 = vmatprep.mubr.bf16.mxu0 %v4198_v49 }
 0x19e   : > { %v727_v44 = vmul.f32 %v4632_v43, %v705_v42  ;;  %v748_v53 = vadd.f32 %v4643_v60, %v726_v0 }
 0x1a0   : > { %v749_v45 = vadd.f32 %v4643_v60, %v727_v44 }
 0x1a2   : > { %v757_v47 = vpack.c.bf16 %v749_v45, %v748_v53 }
 0x1a4   : > { %1021 = vmatmul.mubr.bf16.gmra.mrb[28].mxu0 %v757_v47  ;;  %3461 = vmatmul.mubr.bf16.gmra.mrb[12].mxu1 %v757_v47 }
 0x23f   : > { %v952_v54 = vpop.f32.mrb[0].mxu0 }
 0x240   : > { %v954_v50 = vpop.f32.mrb[1].mxu0 }
 0x241   : > { %v956_v26 = vpop.f32.mrb[2].mxu0 }
 0x242   : > { %v1128_v29 = vpack.c.bf16 %v956_v26, %v952_v54  ;;  %v958_v51 = vpop.f32.mrb[3].mxu0 }
 0x243   : > { %v1129_v9 = vpack.c.bf16 %v958_v51, %v954_v50 }
 0x244   : > { %3480 = vmatprep.mubr.bf16.mxu0 %v1128_v29 }
 0x245   : > { %3464 = vmatprep.subr.bf16.mxu0 %v1129_v9 }
 0x246   : > { %3465 = vmatpush3.bf16.xpose.msra.mxu0 %v1129_v9 }
 0x247   : > { %v4737_v31 = vpop.f32.mrb[4].mxu0  ;;  %v3450_v52 = vpop.f32.mrb[0].mxu1 }
 0x248   : > { %v964_v43 = vpop.f32.mrb[5].mxu0  ;;  %v1065_v55 = vpop.f32.mrb[1].mxu1 }
 0x249   : > { %v4739_v56 = vpop.f32.mrb[6].mxu0  ;;  %v3451_v60 = vpop.f32.mrb[2].mxu1 }
 0x24a   : > { %v1131_v57 = vpack.c.bf16 %v4739_v56, %v4737_v31  ;;  %v1133_v30 = vpack.c.bf16 %v3451_v60, %v3450_v52  ;;  %v968_v35 = vpop.f32.mrb[7].mxu0  ;;  %v1068_v58 = vpop.f32.mrb[3].mxu1  ;;  %v1152_v60 = vld [vmem:[#allocation5] sm:$0xff] }
 0x24b   : > { %v1132_v1 = vpack.c.bf16 %v968_v35, %v964_v43  ;;  %v1130_v11 = vpack.c.bf16 %v1068_v58, %v1065_v55  ;;  %v1153_v58 = vld [vmem:[#allocation5 + $0x8] sm:$0xff] }
 0x24d   : > { %3466 = vmatprep.subr.bf16.mxu0 %v1132_v1  ;;  %3496 = vmatprep.subr.bf16.mxu1 %v1130_v11 }
 0x24e   : > { %3467 = vmatpush3.bf16.xpose.msra.mxu0 %v1132_v1  ;;  %3497 = vmatpush3.bf16.msra.mxu1 %v1130_v11 }
 0x24f   : > { %v4743_v38 = vpop.f32.mrb[8].mxu0  ;;  %3498 = vmatprep.subr.bf16.mxu1 %v1133_v30 }
 0x250   : > { %v974_v62 = vpop.f32.mrb[9].mxu0 }
 0x251   : > { %v4745_v63 = vpop.f32.mrb[10].mxu0 }
 0x252   : > { %v1134_v2 = vpack.c.bf16 %v4745_v63, %v4743_v38  ;;  %v978_v7 = vpop.f32.mrb[11].mxu0  ;;  %3499 = vmatpush3.bf16.msra.mxu1 %v1133_v30  ;;  %v1155_v38 = vld [vmem:[#allocation5 + $0x18] sm:$0xff]  ;;  %v1156_v63 = vld [vmem:[#allocation5 + $0x20] sm:$0xff] }
 0x253   : > { %v1135_v8 = vpack.c.bf16 %v978_v7, %v974_v62 }
 0x255   : > { %3468 = vmatprep.subr.bf16.mxu0 %v1135_v8 }
 0x256   : > { %3469 = vmatpush3.bf16.xpose.msra.mxu0 %v1135_v8 }
 0x257   : > { %v4749_v10 = vpop.f32.mrb[12].mxu0  ;;  %v3454_v12 = vpop.f32.mrb[4].mxu1 }
 0x258   : > { %v984_v14 = vpop.f32.mrb[13].mxu0  ;;  %v1081_v15 = vpop.f32.mrb[5].mxu1 }
 0x259   : > { %v4751_v17 = vpop.f32.mrb[14].mxu0  ;;  %v3455_v19 = vpop.f32.mrb[6].mxu1 }
 0x25a   : > { %v1137_v21 = vpack.c.bf16 %v4751_v17, %v4749_v10  ;;  %v1139_v22 = vpack.c.bf16 %v3455_v19, %v3454_v12  ;;  %v988_v36 = vpop.f32.mrb[15].mxu0  ;;  %v1084_v61 = vpop.f32.mrb[7].mxu1  ;;  %v1157_v10 = vld [vmem:[#allocation5 + $0x28] sm:$0xff] }
 0x25b   : > { %v1138_v16 = vpack.c.bf16 %v988_v36, %v984_v14  ;;  %v1136_v59 = vpack.c.bf16 %v1084_v61, %v1081_v15  ;;  %v1158_v15 = vld [vmem:[#allocation5 + $0x30] sm:$0xff]  ;;  %v1160_v36 = vld [vmem:[#allocation5 + $0x40] sm:$0xff] }
 0x25d   : > { %3470 = vmatprep.subr.bf16.mxu0 %v1138_v16  ;;  %3500 = vmatprep.subr.bf16.mxu1 %v1136_v59 }
 0x25e   : > { %3471 = vmatpush3.bf16.xpose.msra.mxu0 %v1138_v16  ;;  %3501 = vmatpush3.bf16.msra.mxu1 %v1136_v59 }
 0x25f   : > { %v992_v4 = vpop.f32.mrb[16].mxu0  ;;  %3502 = vmatprep.subr.bf16.mxu1 %v1139_v22 }
 0x260   : > { %v994_v39 = vpop.f32.mrb[17].mxu0 }
 0x261   : > { %v996_v6 = vpop.f32.mrb[18].mxu0 }
 0x262   : > { %v1140_v13 = vpack.c.bf16 %v996_v6, %v992_v4  ;;  %v998_v23 = vpop.f32.mrb[19].mxu0  ;;  %3503 = vmatpush3.bf16.msra.mxu1 %v1139_v22  ;;  %v1161_v4 = vld [vmem:[#allocation5 + $0x48] sm:$0xff] }
 0x263   : > { %v1141_v24 = vpack.c.bf16 %v998_v23, %v994_v39 }
 0x265   : > { %3472 = vmatprep.subr.bf16.mxu0 %v1141_v24 }
 0x266   : > { %3473 = vmatpush3.bf16.xpose.msra.mxu0 %v1141_v24 }
 0x267   : > { %v1002_v25 = vpop.f32.mrb[20].mxu0  ;;  %v3458_v27 = vpop.f32.mrb[8].mxu1 }
 0x268   : > { %v1004_v20 = vpop.f32.mrb[21].mxu0  ;;  %v1097_v3 = vpop.f32.mrb[9].mxu1 }
 0x269   : > { %v1006_v5 = vpop.f32.mrb[22].mxu0  ;;  %v3459_v18 = vpop.f32.mrb[10].mxu1 }
 0x26a   : > { %v1143_v46 = vpack.c.bf16 %v1006_v5, %v1002_v25  ;;  %v1145_v28 = vpack.c.bf16 %v3459_v18, %v3458_v27  ;;  %v1008_v32 = vpop.f32.mrb[23].mxu0  ;;  %v1100_v34 = vpop.f32.mrb[11].mxu1  ;;  %v1163_v25 = vld [vmem:[#allocation5 + $0x58] sm:$0xff] }
 0x26b   : > { %v1144_v37 = vpack.c.bf16 %v1008_v32, %v1004_v20  ;;  %v1142_v48 = vpack.c.bf16 %v1100_v34, %v1097_v3  ;;  %v1164_v20 = vld [vmem:[#allocation5 + $0x60] sm:$0xff]  ;;  %v1166_v34 = vld [vmem:[#allocation5 + $0x70] sm:$0xff] }
 0x26d   : > { %3474 = vmatprep.subr.bf16.mxu0 %v1144_v37  ;;  %3504 = vmatprep.subr.bf16.mxu1 %v1142_v48 }
 0x26e   : > { %3475 = vmatpush3.bf16.xpose.msra.mxu0 %v1144_v37  ;;  %3505 = vmatpush3.bf16.msra.mxu1 %v1142_v48 }
 0x26f   : > { %v1012_v33 = vpop.f32.mrb[24].mxu0  ;;  %3506 = vmatprep.subr.bf16.mxu1 %v1145_v28 }
 0x270   : > { %v1014_v40 = vpop.f32.mrb[25].mxu0 }
 0x271   : > { %v1016_v41 = vpop.f32.mrb[26].mxu0 }
 0x272   : > { %v1146_v42 = vpack.c.bf16 %v1016_v41, %v1012_v33  ;;  %v1018_v0 = vpop.f32.mrb[27].mxu0  ;;  %3507 = vmatpush3.bf16.msra.mxu1 %v1145_v28  ;;  %v1167_v33 = vld [vmem:[#allocation5 + $0x78] sm:$0xff] }
 0x273   : > { %v1147_v44 = vpack.c.bf16 %v1018_v0, %v1014_v40 }
 0x275   : > { %3476 = vmatprep.subr.bf16.mxu0 %v1147_v44 }
 0x276   : > { %3477 = vmatpush3.bf16.xpose.msra.mxu0 %v1147_v44 }
 0x277   : > { %v1022_v53 = vpop.f32.mrb[28].mxu0  ;;  %v3462_v45 = vpop.f32.mrb[12].mxu1 }
 0x278   : > { %v1024_v47 = vpop.f32.mrb[29].mxu0  ;;  %v1113_v54 = vpop.f32.mrb[13].mxu1 }
 0x279   : > { %v1026_v50 = vpop.f32.mrb[30].mxu0  ;;  %v3463_v26 = vpop.f32.mrb[14].mxu1 }
 0x27a   : > { %v1149_v29 = vpack.c.bf16 %v1026_v50, %v1022_v53  ;;  %v1151_v51 = vpack.c.bf16 %v3463_v26, %v3462_v45  ;;  %v1028_v9 = vpop.f32.mrb[31].mxu0  ;;  %v1116_v52 = vpop.f32.mrb[15].mxu1 }
 0x27b   : > { %v1150_v43 = vpack.c.bf16 %v1028_v9, %v1024_v47  ;;  %v1148_v55 = vpack.c.bf16 %v1116_v52, %v1113_v54 }
 0x27d   : > { %3478 = vmatprep.subr.bf16.mxu0 %v1150_v43  ;;  %3508 = vmatprep.subr.bf16.mxu1 %v1148_v55 }
 0x27e   : > { %3479 = vmatpush3.bf16.xpose.msra.mxu0 %v1150_v43  ;;  %3509 = vmatpush3.bf16.msra.mxu1 %v1148_v55 }
 0x27f   : > { %3510 = vmatprep.subr.bf16.mxu1 %v1151_v51 }
 0x282   : > { %3511 = vmatpush3.bf16.msra.mxu1 %v1151_v51 }
 0x285   : > { %3481 = vmatmul.mubr.bf16.vlgmr.msra.gmra.mrb[32].mxu0 %v1131_v57  ;;  %v1154_v57 = vld [vmem:[#allocation5 + $0x10] sm:$0xff] }
 0x286   : > { %3484 = vmatprep.mubr.bf16.mxu0 %v1134_v2 }
 0x28d   : > { %3485 = vmatmul.mubr.bf16.gmra.mrb[36].mxu0 %v1137_v21  ;;  %v1159_v21 = vld [vmem:[#allocation5 + $0x38] sm:$0xff] }
 0x28e   : > { %3488 = vmatprep.mubr.bf16.mxu0 %v1140_v13  ;;  %v1162_v13 = vld [vmem:[#allocation5 + $0x50] sm:$0xff] }
 0x295   : > { %3489 = vmatmul.mubr.bf16.gmra.mrb[40].mxu0 %v1143_v46  ;;  %v1165_v46 = vld [vmem:[#allocation5 + $0x68] sm:$0xff] }
 0x296   : > { %3492 = vmatprep.mubr.bf16.mxu0 %v1146_v42 }
 0x29d   : > { %3493 = vmatmul.mubr.bf16.gmra.mrb[44].mxu0 %v1149_v29 }
 0x29e   : > { %2200 = vmatprep.mubr.bf16.mxu0 %v4198_v49 }
 0x358   : > { %v3482_v30 = vpop.f32.mrb[32].mxu0 }
 0x359   : > { %v1202_v35 = vpop.f32.mrb[33].mxu0  ;;  %v4770_v62 = vadd.f32 %v3482_v30, %v1154_v57 }
 0x35a   : > { %v4765_v31 = vadd.f32 %v1202_v35, %v1152_v60  ;;  %v3483_v56 = vpop.f32.mrb[34].mxu0 }
 0x35b   : > { %v1205_v1 = vpop.f32.mrb[35].mxu0  ;;  %v4773_v2 = vadd.f32 %v3483_v56, %v1155_v38 }
 0x35c   : > { %v4767_v11 = vadd.f32 %v1205_v1, %v1153_v58  ;;  %1265 = vmax.xlane.f32.xlu0 %v4765_v31 }
 0x35e   : > { %1267 = vmax.xlane.f32.xlu1 %v4767_v11 }
 0x360   : > { %v3486_v7 = vpop.f32.mrb[36].mxu0  ;;  %1269 = vmax.xlane.f32.xlu0 %v4770_v62 }
 0x361   : > { %v1218_v8 = vpop.f32.mrb[37].mxu0  ;;  %v4782_v22 = vadd.f32 %v3486_v7, %v1158_v15 }
 0x362   : > { %v4776_v12 = vadd.f32 %v1218_v8, %v1156_v63  ;;  %v3487_v14 = vpop.f32.mrb[38].mxu0  ;;  %1271 = vmax.xlane.f32.xlu1 %v4773_v2 }
 0x363   : > { %v1221_v17 = vpop.f32.mrb[39].mxu0  ;;  %v4785_v61 = vadd.f32 %v3487_v14, %v1159_v21 }
 0x364   : > { %v4779_v19 = vadd.f32 %v1221_v17, %v1157_v10  ;;  %1273 = vmax.xlane.f32.xlu0 %v4776_v12 }
 0x366   : > { %1275 = vmax.xlane.f32.xlu1 %v4779_v19 }
 0x368   : > { %v3490_v16 = vpop.f32.mrb[40].mxu0  ;;  %1277 = vmax.xlane.f32.xlu0 %v4782_v22 }
 0x369   : > { %v1234_v59 = vpop.f32.mrb[41].mxu0  ;;  %v4794_v27 = vadd.f32 %v3490_v16, %v1162_v13 }
 0x36a   : > { %v4788_v39 = vadd.f32 %v1234_v59, %v1160_v36  ;;  %v3491_v6 = vpop.f32.mrb[42].mxu0  ;;  %1279 = vmax.xlane.f32.xlu1 %v4785_v61 }
 0x36b   : > { %v1237_v23 = vpop.f32.mrb[43].mxu0  ;;  %v4797_v3 = vadd.f32 %v3491_v6, %v1163_v25 }
 0x36c   : > { %v4791_v24 = vadd.f32 %v1237_v23, %v1161_v4  ;;  %1281 = vmax.xlane.f32.xlu0 %v4788_v39 }
 0x36e   : > { %1283 = vmax.xlane.f32.xlu1 %v4791_v24 }
 0x370   : > { %v3494_v5 = vpop.f32.mrb[44].mxu0  ;;  %1285 = vmax.xlane.f32.xlu0 %v4794_v27 }
 0x371   : > { %v1250_v18 = vpop.f32.mrb[45].mxu0  ;;  %v4806_v40 = vadd.f32 %v3494_v5, %v1166_v34 }
 0x372   : > { %v4800_v28 = vadd.f32 %v1250_v18, %v1164_v20  ;;  %v3495_v32 = vpop.f32.mrb[46].mxu0  ;;  %1287 = vmax.xlane.f32.xlu1 %v4797_v3 }
 0x373   : > { %v1253_v37 = vpop.f32.mrb[47].mxu0  ;;  %v4809_v41 = vadd.f32 %v3495_v32, %v1167_v33 }
 0x374   : > { %v4803_v48 = vadd.f32 %v1253_v37, %v1165_v46  ;;  %1289 = vmax.xlane.f32.xlu0 %v4800_v28 }
 0x376   : > { %1291 = vmax.xlane.f32.xlu1 %v4803_v48 }
 0x378   : > { %1293 = vmax.xlane.f32.xlu0 %v4806_v40 }
 0x37a   : > { %1295 = vmax.xlane.f32.xlu1 %v4809_v41 }
 0x3e9   : > { %v1266_v42 = vpop.xlane.xlu0 %1265 }
 0x3ea   : > { %v1297_v0 = vsub.f32 %v4765_v31, %v1266_v42 }
 0x3eb   : > { %v1268_v44 = vpop.xlane.xlu1 %1267 }
 0x3ec   : > { %v1313_v53 = vmul.f32 1.442695, %v1297_v0  ;;  %v1298_v45 = vsub.f32 %v4767_v11, %v1268_v44  ;;  %v3700_v0 = vld [vmem:[#allocation8] sm:$0xff]  }
 0x3ed   : > { %v1270_v47 = vpop.xlane.xlu0 %1269  ;;  %3528 = vmatprep.subr.bf16.mxu1 %v3700_v0 }
 0x3ee   : > { %3820 = vpow2.f32 %v1313_v53  ;;  %v1315_v54 = vmul.f32 1.442695, %v1298_v45  ;;  %v1299_v50 = vsub.f32 %v4770_v62, %v1270_v47 }
 0x3ef   : > { %v1272_v26 = vpop.xlane.xlu1 %1271 }
 0x3f0   : > { %3822 = vpow2.f32 %v1315_v54  ;;  %v1317_v29 = vmul.f32 1.442695, %v1299_v50  ;;  %v1300_v51 = vsub.f32 %v4773_v2, %v1272_v26 }
 0x3f1   : > { %v1274_v9 = vpop.xlane.xlu0 %1273 }
 0x3f2   : > { %3824 = vpow2.f32 %v1317_v29  ;;  %v1319_v52 = vmul.f32 1.442695, %v1300_v51  ;;  %v1301_v43 = vsub.f32 %v4776_v12, %v1274_v9 }
 0x3f3   : > { %v1276_v55 = vpop.xlane.xlu1 %1275 }
 0x3f4   : > { %3826 = vpow2.f32 %v1319_v52  ;;  %v1321_v60 = vmul.f32 1.442695, %v1301_v43  ;;  %v1302_v30 = vsub.f32 %v4779_v19, %v1276_v55 }
 0x3f5   : > { %v1278_v35 = vpop.xlane.xlu0 %1277 }
 0x3f6   : > { %3828 = vpow2.f32 %v1321_v60  ;;  %v1323_v58 = vmul.f32 1.442695, %v1302_v30  ;;  %v1303_v31 = vsub.f32 %v4782_v22, %v1278_v35 }
 0x3f7   : > { %v1280_v56 = vpop.xlane.xlu1 %1279 }
 0x3f8   : > { %v4820_v57 = vpop.eup %3820  ;;  %3830 = vpow2.f32 %v1323_v58  ;;  %v1325_v1 = vmul.f32 1.442695, %v1303_v31  ;;  %v1304_v11 = vsub.f32 %v4785_v61, %v1280_v56 }
 0x3f9   : > { %1345 = vadd.xlane.f32.xlu0 %v4820_v57  ;;  %v1282_v38 = vpop.xlane.xlu0 %1281 }
 0x3fa   : > { %v4824_v62 = vpop.eup %3822  ;;  %3832 = vpow2.f32 %v1325_v1  ;;  %v1327_v63 = vmul.f32 1.442695, %v1304_v11  ;;  %v1305_v2 = vsub.f32 %v4788_v39, %v1282_v38 }
 0x3fb   : > { %1347 = vadd.xlane.f32.xlu1 %v4824_v62  ;;  %v1284_v7 = vpop.xlane.xlu1 %1283 }
 0x3fc   : > { %v4828_v8 = vpop.eup %3824  ;;  %3834 = vpow2.f32 %v1327_v63  ;;  %v1329_v10 = vmul.f32 1.442695, %v1305_v2  ;;  %v1306_v12 = vsub.f32 %v4791_v24, %v1284_v7  ;;  %v3701_v63 = vld [vmem:[#allocation8 + $0x8] sm:$0xff]  }
 0x3fd   : > { %1349 = vadd.xlane.f32.xlu0 %v4828_v8  ;;  %v1286_v14 = vpop.xlane.xlu0 %1285 }
 0x3fe   : > { %v4832_v15 = vpop.eup %3826  ;;  %3836 = vpow2.f32 %v1329_v10  ;;  %v1331_v17 = vmul.f32 1.442695, %v1306_v12  ;;  %v1307_v19 = vsub.f32 %v4794_v27, %v1286_v14  ;;  %v3702_v14 = vld [vmem:[#allocation8 + $0x10] sm:$0xff]  }
 0x3ff   : > { %1351 = vadd.xlane.f32.xlu1 %v4832_v15  ;;  %v1288_v21 = vpop.xlane.xlu1 %1287 }
 0x400   : > { %v4836_v22 = vpop.eup %3828  ;;  %3838 = vpow2.f32 %v1331_v17  ;;  %v1333_v36 = vmul.f32 1.442695, %v1307_v19  ;;  %v1308_v61 = vsub.f32 %v4797_v3, %v1288_v21 }
 0x401   : > { %1353 = vadd.xlane.f32.xlu0 %v4836_v22  ;;  %v1290_v16 = vpop.xlane.xlu0 %1289 }
 0x402   : > { %v4840_v59 = vpop.eup %3830  ;;  %3840 = vpow2.f32 %v1333_v36  ;;  %v1335_v4 = vmul.f32 1.442695, %v1308_v61  ;;  %v1309_v39 = vsub.f32 %v4800_v28, %v1290_v16  ;;  %v3703_v16 = vld [vmem:[#allocation8 + $0x18] sm:$0xff]  }
 0x403   : > { %1355 = vadd.xlane.f32.xlu1 %v4840_v59  ;;  %v1292_v6 = vpop.xlane.xlu1 %1291 }
 0x404   : > { %v4844_v13 = vpop.eup %3832  ;;  %3842 = vpow2.f32 %v1335_v4  ;;  %v1337_v23 = vmul.f32 1.442695, %v1309_v39  ;;  %v1310_v24 = vsub.f32 %v4803_v48, %v1292_v6 }
 0x405   : > { %1357 = vadd.xlane.f32.xlu0 %v4844_v13  ;;  %v1294_v25 = vpop.xlane.xlu0 %1293 }
 0x406   : > { %v4848_v27 = vpop.eup %3834  ;;  %3844 = vpow2.f32 %v1337_v23  ;;  %v1339_v20 = vmul.f32 1.442695, %v1310_v24  ;;  %v1311_v3 = vsub.f32 %v4806_v40, %v1294_v25  ;;  %v3704_v24 = vld [vmem:[#allocation8 + $0x20] sm:$0xff]  }
 0x407   : > { %1359 = vadd.xlane.f32.xlu1 %v4848_v27  ;;  %v1296_v5 = vpop.xlane.xlu1 %1295 }
 0x408   : > { %v4852_v18 = vpop.eup %3836  ;;  %3846 = vpow2.f32 %v1339_v20  ;;  %v1341_v46 = vmul.f32 1.442695, %v1311_v3  ;;  %v1312_v28 = vsub.f32 %v4809_v41, %v1296_v5 }
 0x409   : > { %1361 = vadd.xlane.f32.xlu0 %v4852_v18 }
 0x40a   : > { %v4856_v32 = vpop.eup %3838  ;;  %3848 = vpow2.f32 %v1341_v46  ;;  %v1343_v34 = vmul.f32 1.442695, %v1312_v28  ;;  %v3705_v46 = vld [vmem:[#allocation8 + $0x28] sm:$0xff]  }
 0x40b   : > { %1363 = vadd.xlane.f32.xlu1 %v4856_v32 }
 0x40c   : > { %v4859_v37 = vpop.eup %3840  ;;  %3850 = vpow2.f32 %v1343_v34 }
 0x40d   : > { %1365 = vadd.xlane.f32.xlu0 %v4859_v37 }
 0x40e   : > { %v4862_v48 = vpop.eup %3842 }
 0x40f   : > { %1367 = vadd.xlane.f32.xlu1 %v4862_v48 }
 0x410   : > { %v4865_v33 = vpop.eup %3844 }
 0x411   : > { %1369 = vadd.xlane.f32.xlu0 %v4865_v33 }
 0x412   : > { %v4868_v40 = vpop.eup %3846 }
 0x413   : > { %1371 = vadd.xlane.f32.xlu1 %v4868_v40 }
 0x414   : > { %v4871_v41 = vpop.eup %3848 }
 0x415   : > { %1373 = vadd.xlane.f32.xlu0 %v4871_v41 }
 0x416   : > { %v4874_v42 = vpop.eup %3850 }
 0x417   : > { %1375 = vadd.xlane.f32.xlu1 %v4874_v42 }
 0x486   : > { %v1346_v44 = vpop.xlane.xlu0 %1345 }
 0x487   : > { %3852 = vrcp.f32 %v1346_v44  ;;  %v3706_v44 = vld [vmem:[#allocation8 + $0x30] sm:$0xff]  }
 0x488   : > { %v1348_v53 = vpop.xlane.xlu1 %1347 }
 0x489   : > { %3854 = vrcp.f32 %v1348_v53 }
 0x48a   : > { %v1350_v45 = vpop.xlane.xlu0 %1349 }
 0x48b   : > { %3856 = vrcp.f32 %v1350_v45 }
 0x48c   : > { %v1352_v47 = vpop.xlane.xlu1 %1351 }
 0x48d   : > { %3858 = vrcp.f32 %v1352_v47  ;;  %v3707_v47 = vld [vmem:[#allocation8 + $0x38] sm:$0xff]  }
 0x48e   : > { %v1354_v54 = vpop.xlane.xlu0 %1353 }
 0x48f   : > { %3860 = vrcp.f32 %v1354_v54 }
 0x490   : > { %v1356_v50 = vpop.xlane.xlu1 %1355 }
 0x491   : > { %v3853_v26 = vpop.eup %3852  ;;  %3862 = vrcp.f32 %v1356_v50 }
 0x492   : > { %v1358_v29 = vpop.xlane.xlu0 %1357  ;;  %v1393_v52 = vmul.f32 %v3853_v26, %v4820_v57 }
 0x493   : > { %v3855_v51 = vpop.eup %3854  ;;  %3864 = vrcp.f32 %v1358_v29 }
 0x494   : > { %v1360_v9 = vpop.xlane.xlu1 %1359  ;;  %v1394_v43 = vmul.f32 %v3855_v51, %v4824_v62 }
 0x495   : > { %v3857_v55 = vpop.eup %3856  ;;  %3866 = vrcp.f32 %v1360_v9 }
 0x496   : > { %v1362_v60 = vpop.xlane.xlu0 %1361  ;;  %v1409_v30 = vpack.c.bf16 %v1394_v43, %v1393_v52  ;;  %v1395_v58 = vmul.f32 %v3857_v55, %v4828_v8 }
 0x497   : > { %v3859_v35 = vpop.eup %3858  ;;  %3868 = vrcp.f32 %v1362_v60 }
 0x498   : > { %v1396_v31 = vmul.f32 %v3859_v35, %v4832_v15  ;;  %v1364_v56 = vpop.xlane.xlu1 %1363  ;;  %3512 = vmatprep.mubr.bf16.mxu1 %v1409_v30 }
 0x499   : > { %v3861_v1 = vpop.eup %3860  ;;  %3870 = vrcp.f32 %v1364_v56 }
 0x49a   : > { %v1366_v11 = vpop.xlane.xlu0 %1365  ;;  %v1410_v38 = vpack.c.bf16 %v1396_v31, %v1395_v58  ;;  %v1397_v2 = vmul.f32 %v3861_v1, %v4836_v22 }
 0x49b   : > { %v3863_v57 = vpop.eup %3862  ;;  %3872 = vrcp.f32 %v1366_v11 }
 0x49c   : > { %v1368_v62 = vpop.xlane.xlu1 %1367  ;;  %3513 = vmatmul.mubr.bf16.vlgmr.msra.gmra.mrb[16].mxu1 %v1410_v38  ;;  %v1398_v7 = vmul.f32 %v3863_v57, %v4840_v59 }
 0x49d   : > { %v3865_v10 = vpop.eup %3864  ;;  %3874 = vrcp.f32 %v1368_v62  ;;  %3529 = vmatpush3.bf16.msra.mxu1 %v3700_v0  ;;  %v3708_v62 = vld [vmem:[#allocation10] ss:$16 sps:$4 sm:$0xff]  }
 0x49e   : > { %v1370_v8 = vpop.xlane.xlu0 %1369  ;;  %v1411_v12 = vpack.c.bf16 %v1398_v7, %v1397_v2  ;;  %3530 = vmatprep.subr.bf16.mxu1 %v3701_v63  ;;  %v1399_v19 = vmul.f32 %v3865_v10, %v4844_v13  ;;  %v3710_v2 = vld [vmem:[#allocation10 + $0x4] ss:$16 sps:$4 sm:$0xff]   ;;  %v3711_v7 = vld [vmem:[#allocation10 + $0x8] ss:$16 sps:$4 sm:$0xff]   ;;  %v3713_v10 = vld [vmem:[#allocation10 + $0xc] ss:$16 sps:$4 sm:$0xff]  }
 0x49f   : > { %v3867_v15 = vpop.eup %3866  ;;  %3876 = vrcp.f32 %v1370_v8  ;;  %2168 = vmatprep.subr.bf16.mxu0 %v3710_v2  ;;  %v4897_v8 = vld [vmem:[%s5345_s6] ss:$0 sm:$0xff] }
 0x4a0   : > { %v1372_v17 = vpop.xlane.xlu1 %1371  ;;  %3516 = vmatprep.mubr.bf16.mxu1 %v1411_v12  ;;  %v1400_v21 = vmul.f32 %v3867_v15, %v4848_v27  ;;  %2169 = vmatpush1.bf16.msra.mxu0 %v3708_v62 }
 0x4a1   : > { %v3869_v36 = vpop.eup %3868  ;;  %3878 = vrcp.f32 %v1372_v17  ;;  %3531 = vmatpush3.bf16.msra.mxu1 %v3701_v63 }
 0x4a2   : > { %v1374_v22 = vpop.xlane.xlu0 %1373  ;;  %v1412_v61 = vpack.c.bf16 %v1400_v21, %v1399_v19  ;;  %3532 = vmatprep.subr.bf16.mxu1 %v3702_v14  ;;  %v1401_v39 = vmul.f32 %v3869_v36, %v4852_v18  ;;  %v3916_v21 = vld [vmem:[%s4507_s27] sm:$0xff] }
 0x4a3   : > { %v3871_v59 = vpop.eup %3870  ;;  %3880 = vrcp.f32 %v1374_v22 }
 0x4a4   : > { %v1376_v4 = vpop.xlane.xlu1 %1375  ;;  %3517 = vmatmul.mubr.bf16.gmra.mrb[20].mxu1 %v1412_v61  ;;  %v1402_v6 = vmul.f32 %v3871_v59, %v4856_v32  ;;  %v3917_v61 = vld [vmem:[%s4507_s27 + $0x8] sm:$0xff] }
 0x4a5   : > { %v3873_v23 = vpop.eup %3872  ;;  %3882 = vrcp.f32 %v1376_v4  ;;  %3533 = vmatpush3.bf16.msra.mxu1 %v3702_v14 }
 0x4a6   : > { %v1413_v13 = vpack.c.bf16 %v1402_v6, %v1401_v39  ;;  %3534 = vmatprep.subr.bf16.mxu1 %v3703_v16  ;;  %v1403_v27 = vmul.f32 %v3873_v23, %v4859_v37 }
 0x4a7   : > { %v3875_v25 = vpop.eup %3874 }
 0x4a8   : > { %3520 = vmatprep.mubr.bf16.mxu1 %v1413_v13  ;;  %v1404_v20 = vmul.f32 %v3875_v25, %v4862_v48 }
 0x4a9   : > { %v3877_v3 = vpop.eup %3876  ;;  %3535 = vmatpush3.bf16.msra.mxu1 %v3703_v16 }
 0x4aa   : > { %v1414_v5 = vpack.c.bf16 %v1404_v20, %v1403_v27  ;;  %3536 = vmatprep.subr.bf16.mxu1 %v3704_v24  ;;  %v1405_v28 = vmul.f32 %v3877_v3, %v4865_v33  ;;  %v3918_v27 = vld [vmem:[%s4507_s27 + $0x10] sm:$0xff]  ;;  %v3919_v3 = vld [vmem:[%s4507_s27 + $0x18] sm:$0xff] }
 0x4ab   : > { %v3879_v18 = vpop.eup %3878 }
 0x4ac   : > { %3521 = vmatmul.mubr.bf16.gmra.mrb[24].mxu1 %v1414_v5  ;;  %v1406_v32 = vmul.f32 %v3879_v18, %v4868_v40 }
 0x4ad   : > { %v3881_v34 = vpop.eup %3880  ;;  %3537 = vmatpush3.bf16.msra.mxu1 %v3704_v24 }
 0x4ae   : > { %v1415_v0 = vpack.c.bf16 %v1406_v32, %v1405_v28  ;;  %3538 = vmatprep.subr.bf16.mxu1 %v3705_v46  ;;  %v1407_v37 = vmul.f32 %v3881_v34, %v4871_v41 }
 0x4af   : > { %v3883_v53 = vpop.eup %3882 }
 0x4b0   : > { %3524 = vmatprep.mubr.bf16.mxu1 %v1415_v0  ;;  %v1408_v48 = vmul.f32 %v3883_v53, %v4874_v42 }
 0x4b1   : > { %3539 = vmatpush3.bf16.msra.mxu1 %v3705_v46 }
 0x4b2   : > { %v1416_v45 = vpack.c.bf16 %v1408_v48, %v1407_v37  ;;  %3540 = vmatprep.subr.bf16.mxu1 %v3706_v44  ;;  %v3920_v37 = vld [vmem:[%s4507_s27 + $0x20] sm:$0xff] }
 0x4b4   : > { %3525 = vmatmul.mubr.bf16.gmra.mrb[28].mxu1 %v1416_v45  ;;  %v3921_v45 = vld [vmem:[%s4507_s27 + $0x28] sm:$0xff] }
 0x4b5   : > { %3541 = vmatpush3.bf16.msra.mxu1 %v3706_v44 }
 0x4b6   : > { %3542 = vmatprep.subr.bf16.mxu1 %v3707_v47 }
 0x4b9   : > { %3543 = vmatpush3.bf16.msra.mxu1 %v3707_v47 }
 0x4ba   : > { %2281 = vmatprep.subr.bf16.mxu1 %v3713_v10 }
 0x56f   : > { %v3514_v33 = vpop.f32.mrb[16].mxu1 }
 0x570   : > { %v1451_v40 = vpop.f32.mrb[17].mxu1 }
 0x571   : > { %v3515_v54 = vpop.f32.mrb[18].mxu1 }
 0x572   : > { %v1515_v50 = vpack.c.bf16 %v3515_v54, %v3514_v33  ;;  %v1454_v26 = vpop.f32.mrb[19].mxu1  ;;  %v3716_v33 = vld [vmem:[#allocation10 + $0x24] ss:$16 sps:$4 sm:$0xff]   ;;  %v3714_v54 = vld [vmem:[#allocation10 + $0x20] ss:$16 sps:$4 sm:$0xff]  }
 0x573   : > { %v1514_v29 = vpack.c.bf16 %v1454_v26, %v1451_v40  ;;  %v3719_v40 = vld [vmem:[#allocation10 + $0x2c] ss:$16 sps:$4 sm:$0xff]   ;;  %2170 = vmatprep.subr.bf16.mxu0 %v3716_v33 }
 0x574   : > { %2171 = vmatpush1.bf16.msra.mxu0 %v3714_v54 }
 0x575   : > { %3544 = vmatprep.mubr.bf16.mxu1 %v1514_v29 }
 0x576   : > { %3545 = vmatmul.mubr.bf16.vlgmr.msra.gmra.mrb[32].mxu1 %v1515_v50  ;;  %v3717_v50 = vld [vmem:[#allocation10 + $0x28] ss:$16 sps:$4 sm:$0xff]  }
 0x577   : > { %v3518_v51 = vpop.f32.mrb[20].mxu1  ;;  %2282 = vmatpush1.bf16.msra.mxu1 %v3711_v7 }
 0x578   : > { %v1467_v41 = vpop.f32.mrb[21].mxu1  ;;  %2283 = vmatprep.subr.bf16.mxu1 %v3719_v40 }
 0x579   : > { %v3519_v9 = vpop.f32.mrb[22].mxu1 }
 0x57a   : > { %v1517_v42 = vpack.c.bf16 %v3519_v9, %v3518_v51  ;;  %v1470_v52 = vpop.f32.mrb[23].mxu1 }
 0x57b   : > { %v1516_v43 = vpack.c.bf16 %v1470_v52, %v1467_v41  ;;  %2284 = vmatpush1.bf16.msra.mxu1 %v3717_v50 }
 0x57d   : > { %3548 = vmatprep.mubr.bf16.mxu1 %v1516_v43  ;;  %v3722_v43 = vld [vmem:[#allocation10 + $0x44] ss:$16 sps:$4 sm:$0xff]  }
 0x57e   : > { %3549 = vmatmul.mubr.bf16.gmra.mrb[36].mxu1 %v1517_v42  ;;  %2172 = vmatprep.subr.bf16.mxu0 %v3722_v43 }
 0x57f   : > { %v3522_v55 = vpop.f32.mrb[24].mxu1 }
 0x580   : > { %v1483_v60 = vpop.f32.mrb[25].mxu1 }
 0x581   : > { %v3523_v30 = vpop.f32.mrb[26].mxu1 }
 0x582   : > { %v1519_v35 = vpack.c.bf16 %v3523_v30, %v3522_v55  ;;  %v1486_v58 = vpop.f32.mrb[27].mxu1  ;;  %v3725_v55 = vld [vmem:[#allocation10 + $0x4c] ss:$16 sps:$4 sm:$0xff]   ;;  %v3720_v30 = vld [vmem:[#allocation10 + $0x40] ss:$16 sps:$4 sm:$0xff]  }
 0x583   : > { %v1518_v31 = vpack.c.bf16 %v1486_v58, %v1483_v60  ;;  %v3922_v58 = vld [vmem:[%s4507_s27 + $0x30] sm:$0xff]  ;;  %2285 = vmatprep.subr.bf16.mxu1 %v3725_v55  ;;  %2173 = vmatpush1.bf16.msra.mxu0 %v3720_v30 }
 0x584   : > { %v3930_v30 = vld [vmem:[%s4507_s27 + $0x70] sm:$0xff] }
 0x585   : > { %3552 = vmatprep.mubr.bf16.mxu1 %v1518_v31 }
 0x586   : > { %3553 = vmatmul.mubr.bf16.gmra.mrb[40].mxu1 %v1519_v35  ;;  %v3723_v35 = vld [vmem:[#allocation10 + $0x48] ss:$16 sps:$4 sm:$0xff]  }
 0x587   : > { %v3526_v56 = vpop.f32.mrb[28].mxu1  ;;  %2286 = vmatpush1.bf16.msra.mxu1 %v3723_v35 }
 0x588   : > { %v1499_v1 = vpop.f32.mrb[29].mxu1 }
 0x589   : > { %v3527_v11 = vpop.f32.mrb[30].mxu1 }
 0x58a   : > { %v1521_v38 = vpack.c.bf16 %v3527_v11, %v3526_v56  ;;  %v1502_v63 = vpop.f32.mrb[31].mxu1  ;;  %v3923_v56 = vld [vmem:[%s4507_s27 + $0x38] sm:$0xff]  ;;  %v3728_v11 = vld [vmem:[#allocation10 + $0x64] ss:$16 sps:$4 sm:$0xff]  }
 0x58b   : > { %v1520_v57 = vpack.c.bf16 %v1502_v63, %v1499_v1  ;;  %v3726_v63 = vld [vmem:[#allocation10 + $0x60] ss:$16 sps:$4 sm:$0xff]   ;;  %2174 = vmatprep.subr.bf16.mxu0 %v3728_v11 }
 0x58c   : > { %2175 = vmatpush1.bf16.msra.mxu0 %v3726_v63  ;;  %v3758_v11 = vld [vmem:[#allocation11 + $0xc0] sm:$0xff]  }
 0x58d   : > { %3556 = vmatprep.mubr.bf16.mxu1 %v1520_v57  ;;  %v3729_v57 = vld [vmem:[#allocation10 + $0x68] ss:$16 sps:$4 sm:$0xff]  }
 0x58e   : > { %3557 = vmatmul.mubr.bf16.gmra.mrb[44].mxu1 %v1521_v38  ;;  %v3731_v38 = vld [vmem:[#allocation10 + $0x6c] ss:$16 sps:$4 sm:$0xff]  }
 0x58f   : > { %2313 = vmatprep.mubr.bf16.mxu1 %v4198_v49  ;;  %2287 = vmatprep.subr.bf16.mxu1 %v3731_v38 }
 0x590   : > { %2288 = vmatpush1.bf16.msra.mxu1 %v3729_v57 }
 0x649   : > { %v3546_v12 = vpop.f32.mrb[32].mxu1 }
 0x64a   : > { %v1627_v14 = vpop.f32.mrb[33].mxu1  ;;  %v1636_v59 = vadd.f32 %v3546_v12, %v4897_v8  ;;  %v3734_v12 = vld [vmem:[#allocation10 + $0x84] ss:$16 sps:$4 sm:$0xff]  }
 0x64b   : > { %v1628_v15 = vadd.f32 %v4897_v8, %v1627_v14  ;;  %v3547_v17 = vpop.f32.mrb[34].mxu1  ;;  %v3737_v14 = vld [vmem:[#allocation10 + $0x8c] ss:$16 sps:$4 sm:$0xff]   ;;  %2176 = vmatprep.subr.bf16.mxu0 %v3734_v12 }
 0x64c   : > { %v1630_v19 = vpop.f32.mrb[35].mxu1  ;;  %v1639_v23 = vadd.f32 %v3547_v17, %v4897_v8  ;;  %v4916_v20 = vadd.f32 %v3918_v27, %v1636_v59  ;;  %v3735_v17 = vld [vmem:[#allocation10 + $0x88] ss:$16 sps:$4 sm:$0xff]   ;;  %2289 = vmatprep.subr.bf16.mxu1 %v3737_v14  ;;  %v3740_v59 = vld [vmem:[#allocation10 + $0xa4] ss:$16 sps:$4 sm:$0xff]  }
 0x64d   : > { %v4901_v36 = vadd.f32 %v3916_v21, %v1628_v15  ;;  %v1631_v22 = vadd.f32 %v4897_v8, %v1630_v19  ;;  %v3732_v15 = vld [vmem:[#allocation10 + $0x80] ss:$16 sps:$4 sm:$0xff]   ;;  %2290 = vmatpush1.bf16.msra.mxu1 %v3735_v17  ;;  %v3746_v27 = vld [vmem:[#allocation10 + $0xc4] ss:$16 sps:$4 sm:$0xff]  }
 0x64e   : > { %v4919_v5 = vadd.f32 %v3919_v3, %v1639_v23  ;;  %v1756_v28 = vmul.f32 %v4916_v20, %v4916_v20  ;;  %v3924_v19 = vld [vmem:[%s4507_s27 + $0x40] sm:$0xff]  ;;  %2177 = vmatpush1.bf16.msra.mxu0 %v3732_v15  ;;  %v3749_v3 = vld [vmem:[#allocation10 + $0xcc] ss:$16 sps:$4 sm:$0xff]  }
 0x64f   : > { %v4905_v16 = vadd.f32 %v3917_v61, %v1631_v22  ;;  %1706 = vadd.xlane.f32.xlu0 %v4901_v36  ;;  %v1754_v39 = vmul.f32 %v4901_v36, %v4901_v36  ;;  %v3925_v22 = vld [vmem:[%s4507_s27 + $0x48] sm:$0xff]  ;;  %2178 = vmatprep.subr.bf16.mxu0 %v3740_v59 }
 0x650   : > { %v1757_v44 = vmul.f32 %v4919_v5, %v4919_v5 }
 0x651   : > { %v3550_v4 = vpop.f32.mrb[36].mxu1  ;;  %1708 = vadd.xlane.f32.xlu1 %v4905_v16  ;;  %v1755_v24 = vmul.f32 %v4905_v16, %v4905_v16 }
 0x652   : > { %v1643_v6 = vpop.f32.mrb[37].mxu1  ;;  %v1652_v26 = vadd.f32 %v3550_v4, %v4897_v8  ;;  %v3743_v4 = vld [vmem:[#allocation10 + $0xac] ss:$16 sps:$4 sm:$0xff]  }
 0x653   : > { %v3551_v13 = vpop.f32.mrb[38].mxu1  ;;  %1770 = vadd.xlane.f32.xlu0 %v1754_v39  ;;  %v1644_v46 = vadd.f32 %v4897_v8, %v1643_v6  ;;  %v3738_v39 = vld [vmem:[#allocation10 + $0xa0] ss:$16 sps:$4 sm:$0xff]   ;;  %v3741_v6 = vld [vmem:[#allocation10 + $0xa8] ss:$16 sps:$4 sm:$0xff]   ;;  %2291 = vmatprep.subr.bf16.mxu1 %v3743_v4 }
 0x654   : > { %v1646_v25 = vpop.f32.mrb[39].mxu1  ;;  %v1655_v9 = vadd.f32 %v3551_v13, %v4897_v8  ;;  %v4956_v31 = vadd.f32 %v3922_v58, %v1652_v26  ;;  %2179 = vmatpush1.bf16.msra.mxu0 %v3738_v39  ;;  %2292 = vmatpush1.bf16.msra.mxu1 %v3741_v6  ;;  %v3928_v26 = vld [vmem:[%s4507_s27 + $0x60] sm:$0xff]  ;;  %v3931_v58 = vld [vmem:[%s4507_s27 + $0x78] sm:$0xff] }
 0x655   : > { %1772 = vadd.xlane.f32.xlu1 %v1755_v24  ;;  %v1647_v34 = vadd.f32 %v4897_v8, %v1646_v25  ;;  %v4934_v48 = vadd.f32 %v3920_v37, %v1644_v46  ;;  %v3744_v46 = vld [vmem:[#allocation10 + $0xc0] ss:$16 sps:$4 sm:$0xff]   ;;  %2180 = vmatprep.subr.bf16.mxu0 %v3746_v27 }
 0x656   : > { %v4959_v1 = vadd.f32 %v3923_v56, %v1655_v9  ;;  %v1760_v2 = vmul.f32 %v4956_v31, %v4956_v31  ;;  %2293 = vmatprep.subr.bf16.mxu1 %v3749_v3  ;;  %v3750_v37 = vld [vmem:[#allocation10 + $0xe0] ss:$16 sps:$4 sm:$0xff]  }
 0x657   : > { %1710 = vadd.xlane.f32.xlu0 %v4916_v20  ;;  %v4937_v47 = vadd.f32 %v3921_v45, %v1647_v34  ;;  %v1758_v51 = vmul.f32 %v4934_v48, %v4934_v48  ;;  %v3927_v34 = vld [vmem:[%s4507_s27 + $0x58] sm:$0xff] }
 0x658   : > { %v1761_v10 = vmul.f32 %v4959_v1, %v4959_v1  ;;  %2181 = vmatpush1.bf16.msra.mxu0 %v3744_v46  ;;  %v3753_v45 = vld [vmem:[#allocation10 + $0xe8] ss:$16 sps:$4 sm:$0xff]  }
 0x659   : > { %v4923_v18 = vpop.f32.mrb[40].mxu1  ;;  %1712 = vadd.xlane.f32.xlu1 %v4919_v5  ;;  %v1759_v52 = vmul.f32 %v4937_v47, %v4937_v47 }
 0x65a   : > { %v1659_v32 = vpop.f32.mrb[41].mxu1  ;;  %v1668_v23 = vadd.f32 %v4923_v18, %v4897_v8  ;;  %v3747_v18 = vld [vmem:[#allocation10 + $0xc8] ss:$16 sps:$4 sm:$0xff]  }
 0x65b   : > { %v4929_v0 = vpop.f32.mrb[42].mxu1  ;;  %1774 = vadd.xlane.f32.xlu0 %v1756_v28  ;;  %v1660_v62 = vadd.f32 %v4897_v8, %v1659_v32  ;;  %v3926_v28 = vld [vmem:[%s4507_s27 + $0x50] sm:$0xff]  ;;  %2294 = vmatpush1.bf16.msra.mxu1 %v3747_v18 }
 0x65c   : > { %v1662_v53 = vpop.f32.mrb[43].mxu1  ;;  %v1671_v24 = vadd.f32 %v4929_v0, %v4897_v8  ;;  %v4986_v32 = vadd.f32 %v3926_v28, %v1668_v23  ;;  %v3752_v0 = vld [vmem:[#allocation10 + $0xe4] ss:$16 sps:$4 sm:$0xff]  }
 0x65d   : > { %1776 = vadd.xlane.f32.xlu1 %v1757_v44  ;;  %v1663_v7 = vadd.f32 %v4897_v8, %v1662_v53  ;;  %v4970_v21 = vadd.f32 %v3924_v19, %v1660_v62  ;;  %v3755_v53 = vld [vmem:[#allocation10 + $0xec] ss:$16 sps:$4 sm:$0xff]   ;;  %2182 = vmatprep.subr.bf16.mxu0 %v3752_v0 }
 0x65e   : > { %v4989_v44 = vadd.f32 %v3927_v34, %v1671_v24  ;;  %v1764_v40 = vmul.f32 %v4986_v32, %v4986_v32  ;;  %2295 = vmatprep.subr.bf16.mxu1 %v3755_v53  ;;  %2183 = vmatpush1.bf16.msra.mxu0 %v3750_v37 }
 0x65f   : > { %1714 = vadd.xlane.f32.xlu0 %v4934_v48  ;;  %v4973_v61 = vadd.f32 %v3925_v22, %v1663_v7  ;;  %v1762_v13 = vmul.f32 %v4970_v21, %v4970_v21  ;;  %2296 = vmatpush1.bf16.msra.mxu1 %v3753_v45 }
 0x660   : > { %v1765_v50 = vmul.f32 %v4989_v44, %v4989_v44  ;;  %3368 = vmatprep.subr.bf16.mxu1 %v3758_v11  ;;  %v5046_v11 = vld [vmem:[%s5341_s2] ss:$0 sm:$0xff] }
 0x661   : > { %1716 = vadd.xlane.f32.xlu1 %v4937_v47  ;;  %v4942_v29 = vpop.f32.mrb[44].mxu1  ;;  %v1763_v25 = vmul.f32 %v4973_v61, %v4973_v61 }
 0x662   : > { %v4946_v41 = vpop.f32.mrb[45].mxu1 }
 0x663   : > { %1778 = vadd.xlane.f32.xlu0 %v1758_v51  ;;  %v4949_v42 = vpop.f32.mrb[46].mxu1  ;;  %v1676_v33 = vadd.f32 %v4897_v8, %v4946_v41  ;;  %v3929_v41 = vld [vmem:[%s4507_s27 + $0x68] sm:$0xff]  ;;  %s5290_s27 = scalar_lea.hbm %s5383_s10, %s3239_s28 }
 0x664   : > { %v4953_v60 = vpop.f32.mrb[47].mxu1  ;;  %v1687_v55 = vadd.f32 %v4949_v42, %v4897_v8  ;;  %v3756_v42 = vld [vmem:[#allocation11 + $0x40] sm:$0xff]  }
 0x665   : > { %1780 = vadd.xlane.f32.xlu1 %v1759_v52  ;;  %v1679_v54 = vadd.f32 %v4897_v8, %v4953_v60  ;;  %v5002_v51 = vadd.f32 %v3928_v26, %v1676_v33  ;;  %v1684_v52 = vadd.f32 %v4942_v29, %v4897_v8  ;;  %3304 = vmatprep.subr.bf16.mxu0 %v3756_v42 }
 0x666   : > { %v5021_v56 = vadd.f32 %v3931_v58, %v1687_v55 }
 0x667   : > { %1718 = vadd.xlane.f32.xlu0 %v4956_v31  ;;  %v5005_v9 = vadd.f32 %v3929_v41, %v1679_v54  ;;  %v1766_v43 = vmul.f32 %v5002_v51, %v5002_v51  ;;  %v5018_v35 = vadd.f32 %v3930_v30, %v1684_v52 }
 0x668   : > { %v1769_v8 = vmul.f32 %v5021_v56, %v5021_v56 }
 0x669   : > { %1720 = vadd.xlane.f32.xlu1 %v4959_v1  ;;  %v1767_v60 = vmul.f32 %v5005_v9, %v5005_v9  ;;  %v1768_v29 = vmul.f32 %v5018_v35, %v5018_v35 }
 0x66b   : > { %1782 = vadd.xlane.f32.xlu0 %v1760_v2 }
 0x66d   : > { %1784 = vadd.xlane.f32.xlu1 %v1761_v10 }
 0x66f   : > { %1722 = vadd.xlane.f32.xlu0 %v4970_v21 }
 0x671   : > { %1724 = vadd.xlane.f32.xlu1 %v4973_v61 }
 0x673   : > { %1786 = vadd.xlane.f32.xlu0 %v1762_v13 }
 0x675   : > { %1788 = vadd.xlane.f32.xlu1 %v1763_v25 }
 0x677   : > { %1726 = vadd.xlane.f32.xlu0 %v4986_v32 }
 0x679   : > { %1728 = vadd.xlane.f32.xlu1 %v4989_v44 }
 0x67b   : > { %1790 = vadd.xlane.f32.xlu0 %v1764_v40 }
 0x67d   : > { %1792 = vadd.xlane.f32.xlu1 %v1765_v50 }
 0x67f   : > { %1730 = vadd.xlane.f32.xlu0 %v5002_v51 }
 0x681   : > { %1732 = vadd.xlane.f32.xlu1 %v5005_v9 }
 0x683   : > { %1794 = vadd.xlane.f32.xlu0 %v1766_v43 }
 0x685   : > { %1796 = vadd.xlane.f32.xlu1 %v1767_v60 }
 0x687   : > { %1734 = vadd.xlane.f32.xlu0 %v5018_v35 }
 0x689   : > { %1736 = vadd.xlane.f32.xlu1 %v5021_v56 }
 0x68b   : > { %1798 = vadd.xlane.f32.xlu0 %v1768_v29 }
 0x68d   : > { %1800 = vadd.xlane.f32.xlu1 %v1769_v8 }
 0x6dc   : > { %v1707_v38 = vpop.xlane.xlu0 %1706 }
 0x6dd   : > { %v1738_v63 = vmul.f32 0.0078125, %v1707_v38 }
 0x6de   : > { %v1709_v57 = vpop.xlane.xlu1 %1708 }
 0x6df   : > { %v1739_v62 = vmul.f32 0.0078125, %v1709_v57  ;;  %v1818_v7 = vmul.f32 %v1738_v63, %v1738_v63  ;;  %v1850_v33 = vsub.f32 %v4901_v36, %v1738_v63 }
 0x6e0   : > { %v1771_v2 = vpop.xlane.xlu0 %1770 }
 0x6e1   : > { %v1802_v10 = vmul.f32 0.0078125, %v1771_v2  ;;  %v1819_v14 = vmul.f32 %v1739_v62, %v1739_v62  ;;  %v1851_v52 = vsub.f32 %v4905_v16, %v1739_v62 }
 0x6e2   : > { %v1773_v12 = vpop.xlane.xlu1 %1772 }
 0x6e3   : > { %v1834_v15 = vsub.f32 %v1802_v10, %v1818_v7  ;;  %v1803_v17 = vmul.f32 0.0078125, %v1773_v12 }
 0x6e4   : > { %v1711_v19 = vpop.xlane.xlu0 %1710 }
 0x6e5   : > { %v1866_v22 = vadd.f32 1e-05, %v1834_v15  ;;  %v1835_v59 = vsub.f32 %v1803_v17, %v1819_v14  ;;  %v1740_v4 = vmul.f32 0.0078125, %v1711_v19  ;;  %v5058_v17 = vld [vmem:[%s5342_s3] ss:$0 sm:$0xff] }
 0x6e6   : > { %v1713_v39 = vpop.xlane.xlu1 %1712 }
 0x6e7   : > { %3884 = vrsqrt.f32 %v1866_v22  ;;  %v1867_v6 = vadd.f32 1e-05, %v1835_v59  ;;  %v5029_v23 = vmul.f32 0.0078125, %v1713_v39  ;;  %v1820_v24 = vmul.f32 %v1740_v4, %v1740_v4 }
 0x6e8   : > { %v1775_v13 = vpop.xlane.xlu0 %1774  ;;  %v1852_v12 = vsub.f32 %v4916_v20, %v1740_v4 }
 0x6e9   : > { %3886 = vrsqrt.f32 %v1867_v6  ;;  %v1804_v25 = vmul.f32 0.0078125, %v1775_v13  ;;  %v1821_v3 = vmul.f32 %v5029_v23, %v5029_v23  ;;  %v1853_v4 = vsub.f32 %v4919_v5, %v5029_v23 }
 0x6ea   : > { %v1777_v27 = vpop.xlane.xlu1 %1776 }
 0x6eb   : > { %v1836_v46 = vsub.f32 %v1804_v25, %v1820_v24  ;;  %v1805_v18 = vmul.f32 0.0078125, %v1777_v27  ;;  %v3757_v27 = vld [vmem:[#allocation11] sm:$0xff]  }
 0x6ec   : > { %v1715_v28 = vpop.xlane.xlu0 %1714 }
 0x6ed   : > { %v1868_v34 = vadd.f32 1e-05, %v1836_v46  ;;  %v1837_v0 = vsub.f32 %v1805_v18, %v1821_v3  ;;  %v5033_v53 = vmul.f32 0.0078125, %v1715_v28  ;;  %v3759_v3 = vld [vmem:[#allocation11 + $0x80] sm:$0xff]  }
 0x6ee   : > { %v1717_v37 = vpop.xlane.xlu1 %1716 }
 0x6ef   : > { %3888 = vrsqrt.f32 %v1868_v34  ;;  %v1869_v45 = vadd.f32 1e-05, %v1837_v0  ;;  %v5036_v40 = vmul.f32 0.0078125, %v1717_v37  ;;  %v1822_v26 = vmul.f32 %v5033_v53, %v5033_v53  ;;  %v3760_v0 = vld [vmem:[#allocation11 + $0x48] sm:$0xff]  }
 0x6f0   : > { %v1779_v54 = vpop.xlane.xlu0 %1778  ;;  %v3762_v37 = vld [vmem:[#allocation11 + $0xc8] sm:$0xff]  }
 0x6f1   : > { %v3885_v50 = vpop.eup %3884  ;;  %3890 = vrsqrt.f32 %v1869_v45  ;;  %v1806_v41 = vmul.f32 0.0078125, %v1779_v54  ;;  %v1823_v30 = vmul.f32 %v5036_v40, %v5036_v40 }
 0x6f2   : > { %v1898_v43 = vmul.f32 %v3885_v50, %v1850_v33  ;;  %v1781_v55 = vpop.xlane.xlu1 %1780 }
 0x6f3   : > { %v3887_v60 = vpop.eup %3886  ;;  %v1838_v58 = vsub.f32 %v1806_v41, %v1822_v26  ;;  %v1807_v29 = vmul.f32 0.0078125, %v1781_v55 }
 0x6f4   : > { %v1899_v8 = vmul.f32 %v3887_v60, %v1851_v52  ;;  %v1719_v42 = vpop.xlane.xlu0 %1718  ;;  %v1914_v38 = vmul.f32 %v5046_v11, %v1898_v43  ;;  %v3761_v43 = vld [vmem:[#allocation11 + $0x8] sm:$0xff]  }
 0x6f5   : > { %v1870_v63 = vadd.f32 1e-05, %v1838_v58  ;;  %v1839_v57 = vsub.f32 %v1807_v29, %v1823_v30  ;;  %v5049_v62 = vmul.f32 0.0078125, %v1719_v42  ;;  %v3763_v60 = vld [vmem:[#allocation11 + $0x88] sm:$0xff]   ;;  %v3764_v30 = vld [vmem:[#allocation11 + $0x50] sm:$0xff]   ;;  %v1854_v58 = vsub.f32 %v4934_v48, %v5033_v53 }
 0x6f6   : > { %v1721_v2 = vpop.xlane.xlu1 %1720  ;;  %v1915_v7 = vmul.f32 %v5046_v11, %v1899_v8  ;;  %v1930_v19 = vadd.f32 %v5058_v17, %v1914_v38  ;;  %v3765_v53 = vld [vmem:[#allocation11 + $0x10] sm:$0xff]  }
 0x6f7   : > { %3892 = vrsqrt.f32 %v1870_v63  ;;  %v1871_v10 = vadd.f32 1e-05, %v1839_v57  ;;  %v5053_v14 = vmul.f32 0.0078125, %v1721_v2  ;;  %v1824_v39 = vmul.f32 %v5049_v62, %v5049_v62 }
 0x6f8   : > { %v1783_v15 = vpop.xlane.xlu0 %1782  ;;  %v1931_v22 = vadd.f32 %v5058_v17, %v1915_v7  ;;  %v1855_v7 = vsub.f32 %v4937_v47, %v5036_v40 }
 0x6f9   : > { %v3889_v59 = vpop.eup %3888  ;;  %3894 = vrsqrt.f32 %v1871_v10  ;;  %v1808_v6 = vmul.f32 0.0078125, %v1783_v15  ;;  %v1825_v18 = vmul.f32 %v5053_v14, %v5053_v14 }
 0x6fa   : > { %v1785_v13 = vpop.xlane.xlu1 %1784  ;;  %v1946_v24 = vpack.c.bf16 %v1931_v22, %v1930_v19  ;;  %v1900_v25 = vmul.f32 %v3889_v59, %v1852_v12  ;;  %v3766_v19 = vld [vmem:[#allocation11 + $0xd0] sm:$0xff]  }
 0x6fb   : > { %v3891_v46 = vpop.eup %3890  ;;  %v1840_v28 = vsub.f32 %v1808_v6, %v1824_v39  ;;  %v1809_v34 = vmul.f32 0.0078125, %v1785_v13  ;;  %v3768_v13 = vld [vmem:[#allocation11 + $0x58] sm:$0xff]  }
 0x6fc   : > { %2201 = vmatmul.mubr.bf16.vlgmr.msra.gmra.mrb[48].mxu0 %v1946_v24  ;;  %v1723_v45 = vpop.xlane.xlu0 %1722  ;;  %2314 = vmatmul.mubr.bf16.vlgmr.msra.gmra.mrb[48].mxu1 %v1946_v24  ;;  %v1901_v33 = vmul.f32 %v3891_v46, %v1853_v4  ;;  %v1916_v54 = vmul.f32 %v5046_v11, %v1900_v25  ;;  %v3767_v4 = vld [vmem:[#allocation11 + $0x90] sm:$0xff]  }
 0x6fd   : > { %v1872_v23 = vadd.f32 1e-05, %v1840_v28  ;;  %v1841_v50 = vsub.f32 %v1809_v34, %v1825_v18  ;;  %v5069_v26 = vmul.f32 0.0078125, %v1723_v45  ;;  %2210 = vmatprep.mubr.bf16.mxu0 %v4198_v49  ;;  %2323 = vmatprep.mubr.bf16.mxu1 %v4198_v49  ;;  %v3771_v45 = vld [vmem:[#allocation11 + $0x98] sm:$0xff]  }
 0x6fe   : > { %v1725_v41 = vpop.xlane.xlu1 %1724  ;;  %v1917_v52 = vmul.f32 %v5046_v11, %v1901_v33  ;;  %3305 = vmatpush3.bf16.msra.mxu0 %v3757_v27  ;;  %3369 = vmatpush3.bf16.msra.mxu1 %v3759_v3  ;;  %v1932_v42 = vadd.f32 %v5058_v17, %v1916_v54  ;;  %v3770_v27 = vld [vmem:[#allocation11 + $0xd8] sm:$0xff]   ;;  %v3772_v33 = vld [vmem:[#allocation11 + $0x60] sm:$0xff]   ;;  %v1856_v54 = vsub.f32 %v4956_v31, %v5049_v62 }
 0x6ff   : > { %3896 = vrsqrt.f32 %v1872_v23  ;;  %v1873_v55 = vadd.f32 1e-05, %v1841_v50  ;;  %3306 = vmatprep.subr.bf16.mxu0 %v3760_v0  ;;  %3370 = vmatprep.subr.bf16.mxu1 %v3762_v37  ;;  %v5076_v29 = vmul.f32 0.0078125, %v1725_v41  ;;  %v1826_v57 = vmul.f32 %v5069_v26, %v5069_v26  ;;  %v3769_v0 = vld [vmem:[#allocation11 + $0x18] sm:$0xff]  }
 0x700   : > { %v1787_v8 = vpop.xlane.xlu0 %1786  ;;  %v1933_v38 = vadd.f32 %v5058_v17, %v1917_v52 }
 0x701   : > { %v3893_v63 = vpop.eup %3892  ;;  %3898 = vrsqrt.f32 %v1873_v55  ;;  %v1810_v2 = vmul.f32 0.0078125, %v1787_v8  ;;  %v1827_v59 = vmul.f32 %v5076_v29, %v5076_v29 }
 0x702   : > { %v1789_v10 = vpop.xlane.xlu1 %1788  ;;  %v1947_v12 = vpack.c.bf16 %v1933_v38, %v1932_v42  ;;  %v1902_v15 = vmul.f32 %v3893_v63, %v1854_v58  ;;  %3307 = vmatpush3.bf16.msra.mxu0 %v3761_v43  ;;  %3371 = vmatpush3.bf16.msra.mxu1 %v3763_v60  ;;  %v3773_v42 = vld [vmem:[#allocation11 + $0x20] sm:$0xff]  }
 0x703   : > { %v3895_v22 = vpop.eup %3894  ;;  %v1842_v39 = vsub.f32 %v1810_v2, %v1826_v57  ;;  %v1811_v6 = vmul.f32 0.0078125, %v1789_v10  ;;  %3308 = vmatprep.subr.bf16.mxu0 %v3764_v30  ;;  %3372 = vmatprep.subr.bf16.mxu1 %v3766_v19  ;;  %v1857_v30 = vsub.f32 %v4959_v1, %v5053_v14  ;;  %v3774_v38 = vld [vmem:[#allocation11 + $0xe0] sm:$0xff]   ;;  %v3778_v19 = vld [vmem:[#allocation11 + $0xe8] sm:$0xff]  }
 0x704   : > { %2211 = vmatmul.mubr.bf16.gmra.mrb[52].mxu0 %v1947_v12  ;;  %v1727_v24 = vpop.xlane.xlu0 %1726  ;;  %2324 = vmatmul.mubr.bf16.gmra.mrb[52].mxu1 %v1947_v12  ;;  %v1903_v40 = vmul.f32 %v3895_v22, %v1855_v7  ;;  %v1918_v25 = vmul.f32 %v5046_v11, %v1902_v15  ;;  %v3775_v10 = vld [vmem:[#allocation11 + $0xa0] sm:$0xff]   ;;  %v3776_v12 = vld [vmem:[#allocation11 + $0x68] sm:$0xff]  }
 0x705   : > { %v1874_v3 = vadd.f32 1e-05, %v1842_v39  ;;  %v1843_v46 = vsub.f32 %v1811_v6, %v1827_v59  ;;  %v5087_v18 = vmul.f32 0.0078125, %v1727_v24  ;;  %2220 = vmatprep.mubr.bf16.mxu0 %v4198_v49  ;;  %2333 = vmatprep.mubr.bf16.mxu1 %v4198_v49 }
 0x706   : > { %v1729_v28 = vpop.xlane.xlu1 %1728  ;;  %v1919_v34 = vmul.f32 %v5046_v11, %v1903_v40  ;;  %3309 = vmatpush3.bf16.msra.mxu0 %v3765_v53  ;;  %3373 = vmatpush3.bf16.msra.mxu1 %v3767_v4  ;;  %v1934_v41 = vadd.f32 %v5058_v17, %v1918_v25  ;;  %v3779_v40 = vld [vmem:[#allocation11 + $0xa8] sm:$0xff]   ;;  %v3780_v25 = vld [vmem:[#allocation11 + $0x70] sm:$0xff]  }
 0x707   : > { %3900 = vrsqrt.f32 %v1874_v3  ;;  %v1875_v37 = vadd.f32 1e-05, %v1843_v46  ;;  %3310 = vmatprep.subr.bf16.mxu0 %v3768_v13  ;;  %v5094_v23 = vmul.f32 0.0078125, %v1729_v28  ;;  %3374 = vmatprep.subr.bf16.mxu1 %v3770_v27  ;;  %v1828_v55 = vmul.f32 %v5087_v18, %v5087_v18  ;;  %v3777_v13 = vld [vmem:[#allocation11 + $0x28] sm:$0xff]  }
 0x708   : > { %v1791_v50 = vpop.xlane.xlu0 %1790  ;;  %v1935_v52 = vadd.f32 %v5058_v17, %v1919_v34  ;;  %v1858_v27 = vsub.f32 %v4970_v21, %v5069_v26 }
 0x709   : > { %v3897_v43 = vpop.eup %3896  ;;  %3902 = vrsqrt.f32 %v1875_v37  ;;  %v1812_v60 = vmul.f32 0.0078125, %v1791_v50  ;;  %v1829_v57 = vmul.f32 %v5094_v23, %v5094_v23 }
 0x70a   : > { %v1793_v58 = vpop.xlane.xlu1 %1792  ;;  %v1948_v8 = vpack.c.bf16 %v1935_v52, %v1934_v41  ;;  %v1904_v62 = vmul.f32 %v3897_v43, %v1856_v54  ;;  %3311 = vmatpush3.bf16.msra.mxu0 %v3769_v0  ;;  %3375 = vmatpush3.bf16.msra.mxu1 %v3771_v45  ;;  %v3781_v41 = vld [vmem:[#allocation11 + $0x30] sm:$0xff]  }
 0x70b   : > { %v3899_v63 = vpop.eup %3898  ;;  %v1844_v2 = vsub.f32 %v1812_v60, %v1828_v55  ;;  %v1813_v7 = vmul.f32 0.0078125, %v1793_v58  ;;  %3312 = vmatprep.subr.bf16.mxu0 %v3772_v33  ;;  %3376 = vmatprep.subr.bf16.mxu1 %v3774_v38  ;;  %v1859_v33 = vsub.f32 %v4973_v61, %v5076_v29  ;;  %v3782_v52 = vld [vmem:[#allocation11 + $0xf0] sm:$0xff]  }
 0x70c   : > { %2221 = vmatmul.mubr.bf16.gmra.mrb[56].mxu0 %v1948_v8  ;;  %2334 = vmatmul.mubr.bf16.gmra.mrb[56].mxu1 %v1948_v8  ;;  %v1731_v15 = vpop.xlane.xlu0 %1730  ;;  %v1905_v14 = vmul.f32 %v3899_v63, %v1857_v30  ;;  %v1920_v53 = vmul.f32 %v5046_v11, %v1904_v62  ;;  %v3783_v58 = vld [vmem:[#allocation11 + $0xb0] sm:$0xff]  }
 0x70d   : > { %v1876_v22 = vadd.f32 1e-05, %v1844_v2  ;;  %v1845_v59 = vsub.f32 %v1813_v7, %v1829_v57  ;;  %v5105_v39 = vmul.f32 0.0078125, %v1731_v15  ;;  %2230 = vmatprep.mubr.bf16.mxu0 %v4198_v49  ;;  %2343 = vmatprep.mubr.bf16.mxu1 %v4198_v49 }
 0x70e   : > { %v1733_v6 = vpop.xlane.xlu1 %1732  ;;  %v1921_v4 = vmul.f32 %v5046_v11, %v1905_v14  ;;  %3313 = vmatpush3.bf16.msra.mxu0 %v3773_v42  ;;  %3377 = vmatpush3.bf16.msra.mxu1 %v3775_v10  ;;  %v1936_v28 = vadd.f32 %v5058_v17, %v1920_v53  ;;  %v1860_v10 = vsub.f32 %v4986_v32, %v5087_v18 }
 0x70f   : > { %3904 = vrsqrt.f32 %v1876_v22  ;;  %v1877_v24 = vadd.f32 1e-05, %v1845_v59  ;;  %3314 = vmatprep.subr.bf16.mxu0 %v3776_v12  ;;  %v5112_v3 = vmul.f32 0.0078125, %v1733_v6  ;;  %3378 = vmatprep.subr.bf16.mxu1 %v3778_v19  ;;  %v1830_v37 = vmul.f32 %v5105_v39, %v5105_v39 }
 0x710   : > { %v1795_v46 = vpop.xlane.xlu0 %1794  ;;  %v1937_v34 = vadd.f32 %v5058_v17, %v1921_v4  ;;  %v1861_v6 = vsub.f32 %v4989_v44, %v5094_v23 }
 0x711   : > { %v3901_v0 = vpop.eup %3900  ;;  %3906 = vrsqrt.f32 %v1877_v24  ;;  %v1814_v45 = vmul.f32 0.0078125, %v1795_v46  ;;  %v1831_v55 = vmul.f32 %v5112_v3, %v5112_v3 }
 0x712   : > { %v1797_v54 = vpop.xlane.xlu1 %1796  ;;  %v1949_v50 = vpack.c.bf16 %v1937_v34, %v1936_v28  ;;  %v1906_v26 = vmul.f32 %v3901_v0, %v1858_v27  ;;  %3315 = vmatpush3.bf16.msra.mxu0 %v3777_v13  ;;  %3379 = vmatpush3.bf16.msra.mxu1 %v3779_v40 }
 0x713   : > { %v3903_v43 = vpop.eup %3902  ;;  %v1846_v60 = vsub.f32 %v1814_v45, %v1830_v37  ;;  %v1815_v30 = vmul.f32 0.0078125, %v1797_v54  ;;  %3316 = vmatprep.subr.bf16.mxu0 %v3780_v25  ;;  %3380 = vmatprep.subr.bf16.mxu1 %v3782_v52  ;;  %v1862_v45 = vsub.f32 %v5002_v51, %v5105_v39 }
 0x714   : > { %2231 = vmatmul.mubr.bf16.gmra.mrb[60].mxu0 %v1949_v50  ;;  %2344 = vmatmul.mubr.bf16.gmra.mrb[60].mxu1 %v1949_v50  ;;  %v1735_v8 = vpop.xlane.xlu0 %1734  ;;  %v1907_v62 = vmul.f32 %v3903_v43, %v1859_v33  ;;  %v1922_v29 = vmul.f32 %v5046_v11, %v1906_v26  ;;  %v1863_v26 = vsub.f32 %v5005_v9, %v5112_v3 }
 0x715   : > { %v1878_v42 = vadd.f32 1e-05, %v1846_v60  ;;  %v1847_v38 = vsub.f32 %v1815_v30, %v1831_v55  ;;  %v1752_v63 = vmul.f32 0.0078125, %v1735_v8  ;;  %2240 = vmatprep.mubr.bf16.mxu0 %v4198_v49  ;;  %2353 = vmatprep.mubr.bf16.mxu1 %v4198_v49 }
 0x716   : > { %v1737_v57 = vpop.xlane.xlu1 %1736  ;;  %v1923_v2 = vmul.f32 %v5046_v11, %v1907_v62  ;;  %3317 = vmatpush3.bf16.msra.mxu0 %v3781_v41  ;;  %3381 = vmatpush3.bf16.msra.mxu1 %v3783_v58  ;;  %v1938_v14 = vadd.f32 %v5058_v17, %v1922_v29 }
 0x717   : > { %3908 = vrsqrt.f32 %v1878_v42  ;;  %v1879_v7 = vadd.f32 1e-05, %v1847_v38  ;;  %v1753_v12 = vmul.f32 0.0078125, %v1737_v57  ;;  %v1832_v22 = vmul.f32 %v1752_v63, %v1752_v63 }
 0x718   : > { %v1799_v15 = vpop.xlane.xlu0 %1798  ;;  %v1939_v53 = vadd.f32 %v5058_v17, %v1923_v2  ;;  %v1864_v30 = vsub.f32 %v5018_v35, %v1752_v63 }
 0x719   : > { %v3905_v19 = vpop.eup %3904  ;;  %3910 = vrsqrt.f32 %v1879_v7  ;;  %v1816_v59 = vmul.f32 0.0078125, %v1799_v15  ;;  %v1833_v25 = vmul.f32 %v1753_v12, %v1753_v12  ;;  %v1865_v62 = vsub.f32 %v5021_v56, %v1753_v12  ;;  %v3784_v12 = vld [vmem:[#allocation11 + $0x78] sm:$0xff]  }
 0x71a   : > { %v1801_v4 = vpop.xlane.xlu1 %1800  ;;  %v1950_v13 = vpack.c.bf16 %v1939_v53, %v1938_v14  ;;  %v1908_v24 = vmul.f32 %v3905_v19, %v1860_v10  ;;  %v3786_v14 = vld [vmem:[#allocation11 + $0xf8] sm:$0xff]   ;;  %3318 = vmatprep.subr.bf16.mxu0 %v3784_v12 }
 0x71b   : > { %v3907_v40 = vpop.eup %3906  ;;  %v1848_v27 = vsub.f32 %v1816_v59, %v1832_v22  ;;  %v1817_v18 = vmul.f32 0.0078125, %v1801_v4  ;;  %v3785_v53 = vld [vmem:[#allocation11 + $0x38] sm:$0xff]   ;;  %3382 = vmatprep.subr.bf16.mxu1 %v3786_v14  ;;  %v1988_v22 = vlaneseq }
 0x71c   : > { %2241 = vmatmul.mubr.bf16.gmra.mrb[64].mxu0 %v1950_v13  ;;  %2354 = vmatmul.mubr.bf16.gmra.mrb[64].mxu1 %v1950_v13  ;;  %v1909_v46 = vmul.f32 %v3907_v40, %v1861_v6  ;;  %v1924_v28 = vmul.f32 %v5046_v11, %v1908_v24  ;;  %v3787_v19 = vld [vmem:[#allocation11 + $0xb8] sm:$0xff]  }
 0x71d   : > { %v1880_v34 = vadd.f32 1e-05, %v1848_v27  ;;  %v1849_v0 = vsub.f32 %v1817_v18, %v1833_v25  ;;  %2250 = vmatprep.mubr.bf16.mxu0 %v4198_v49  ;;  %2363 = vmatprep.mubr.bf16.mxu1 %v4198_v49  ;;  %v1989_v59 = vshrl.u32 %v1988_v22, 7 }
 0x71e   : > { %v1925_v23 = vmul.f32 %v5046_v11, %v1909_v46  ;;  %v1940_v33 = vadd.f32 %v5058_v17, %v1924_v28  ;;  %3319 = vmatpush3.bf16.msra.mxu0 %v3785_v53  ;;  %3383 = vmatpush3.bf16.msra.mxu1 %v3787_v19 }
 0x71f   : > { %3912 = vrsqrt.f32 %v1880_v34  ;;  %v1881_v37 = vadd.f32 1e-05, %v1849_v0  ;;  %v1998_v6 = vsub.s32 2, %v1989_v59  ;;  %v2002_v4 = vsub.s32 3, %v1989_v59 }
 0x720   : > { %v1941_v54 = vadd.f32 %v5058_v17, %v1925_v23 }
 0x721   : > { %v3909_v50 = vpop.eup %3908  ;;  %3914 = vrsqrt.f32 %v1881_v37 }
 0x722   : > { %v1951_v41 = vpack.c.bf16 %v1941_v54, %v1940_v33  ;;  %v1910_v52 = vmul.f32 %v3909_v50, %v1862_v45 }
 0x723   : > { %v3911_v43 = vpop.eup %3910 }
 0x724   : > { %2251 = vmatmul.mubr.bf16.gmra.mrb[68].mxu0 %v1951_v41  ;;  %2364 = vmatmul.mubr.bf16.gmra.mrb[68].mxu1 %v1951_v41  ;;  %v1911_v55 = vmul.f32 %v3911_v43, %v1863_v26  ;;  %v1926_v60 = vmul.f32 %v5046_v11, %v1910_v52 }
 0x725   : > { %2260 = vmatprep.mubr.bf16.mxu0 %v4198_v49  ;;  %2373 = vmatprep.mubr.bf16.mxu1 %v4198_v49 }
 0x726   : > { %v1927_v39 = vmul.f32 %v5046_v11, %v1911_v55  ;;  %v1942_v58 = vadd.f32 %v5058_v17, %v1926_v60 }
 0x728   : > { %v1943_v3 = vadd.f32 %v5058_v17, %v1927_v39 }
 0x729   : > { %v3913_v8 = vpop.eup %3912 }
 0x72a   : > { %v1952_v29 = vpack.c.bf16 %v1943_v3, %v1942_v58  ;;  %v1912_v42 = vmul.f32 %v3913_v8, %v1864_v30 }
 0x72b   : > { %v3915_v38 = vpop.eup %3914 }
 0x72c   : > { %2261 = vmatmul.mubr.bf16.gmra.mrb[72].mxu0 %v1952_v29  ;;  %2374 = vmatmul.mubr.bf16.gmra.mrb[72].mxu1 %v1952_v29  ;;  %v1913_v57 = vmul.f32 %v3915_v38, %v1865_v62  ;;  %v1928_v2 = vmul.f32 %v5046_v11, %v1912_v42 }
 0x72d   : > { %2270 = vmatprep.mubr.bf16.mxu0 %v4198_v49  ;;  %2383 = vmatprep.mubr.bf16.mxu1 %v4198_v49  ;;  %v1990_v49 = vsub.s32 0, %v1989_v59 }
 0x72e   : > { %v1929_v63 = vmul.f32 %v5046_v11, %v1913_v57  ;;  %v1944_v7 = vadd.f32 %v5058_v17, %v1928_v2  ;;  %v1986_v11 = vld [vmem:[%s5381_s25] sm:$0xf]  ;;  %s4199_s25 = smov [#allocation13]  }
 0x72f   : > { %v5159_v13 = vrot.slane %v1986_v11, %v1990_v49  ;;  %v5161_v24 = vrot.slane %v1986_v11, %v1998_v6  ;;  %v5165_v25 = vrot.slane %v1986_v11, %v2002_v4  ;;  %s4108_s26 = sshll.u32 %s4199_s25, 4  ;;  %s4109_s26 = int_to_ptr.vmem [resolvable:$false] %s4108_s26 }
 0x730   : > { %v1945_v10 = vadd.f32 %v5058_v17, %v1929_v63  ;;  %v1994_v17 = vsub.s32 1, %v1989_v59  ;;  %s4110_s8 = scalar_lea.vmem %s4109_s26, 4096  ;;  %p4111_p11 = scmp.lt.s32.totalorder %s5292_s12, %s4109_s26 }
 0x731   : > { %p4112_p12 = scmp.lt.s32.totalorder %s4110_s8, %s4104_s23 }
 0x732   : > { %v1953_v15 = vpack.c.bf16 %v1945_v10, %v1944_v7  ;;  %v5163_v40 = vrot.slane %v1986_v11, %v1994_v17 }
 0x733   : > { %p4113_p13 = por %p4112_p12, %p4111_p11 }
 0x734   : > { %2271 = vmatmul.mubr.bf16.gmra.mrb[76].mxu0 %v1953_v15  ;;  %2384 = vmatmul.mubr.bf16.gmra.mrb[76].mxu1 %v1953_v15 }
 0x735   : > { %p4114_p8 = pnand %p4113_p13, %p4107_p1 }
 0x7cf   : > { %v2202_v27 = vpop.f32.mrb[48].mxu0  ;;  %v2315_v18 = vpop.f32.mrb[48].mxu1 }
 0x7d0   : > { %v2203_v46 = vadd.f32 %v2202_v27, %v5159_v13  ;;  %v2316_v28 = vadd.f32 %v2315_v18, %v5161_v24  ;;  %v2204_v34 = vpop.f32.mrb[49].mxu0  ;;  %v2317_v0 = vpop.f32.mrb[49].mxu1 }
 0x7d1   : > { %v2205_v23 = vadd.f32 %v2204_v34, %v5163_v40  ;;  %v2318_v37 = vadd.f32 %v2317_v0, %v5165_v25  ;;  %v2206_v45 = vpop.f32.mrb[50].mxu0  ;;  %v2319_v33 = vpop.f32.mrb[50].mxu1 }
 0x7d2   : > { %v2207_v54 = vadd.f32 %v2206_v45, %v5159_v13  ;;  %v2320_v50 = vadd.f32 %v2319_v33, %v5161_v24  ;;  %v2208_v26 = vpop.f32.mrb[51].mxu0  ;;  %v2321_v41 = vpop.f32.mrb[51].mxu1  ;;  %v2394_v55 = vmax.f32 %v2203_v46, 0.0  ;;  %v2396_v60 = vmax.f32 %v2316_v28, 0.0 }
 0x7d3   : > { %v2209_v52 = vadd.f32 %v2208_v26, %v5163_v40  ;;  %v2322_v43 = vadd.f32 %v2321_v41, %v5165_v25  ;;  %v2395_v58 = vmax.f32 %v2205_v23, 0.0  ;;  %v2397_v3 = vmax.f32 %v2318_v37, 0.0 }
 0x7d4   : > { %v2398_v39 = vmax.f32 %v2207_v54, 0.0  ;;  %v2400_v30 = vmax.f32 %v2320_v50, 0.0 }
 0x7d5   : > { %v2399_v8 = vmax.f32 %v2209_v52, 0.0  ;;  %v2401_v62 = vmax.f32 %v2322_v43, 0.0 }
 0x7d6   : > { %v2458_v29 = vpack.c.bf16 %v2398_v39, %v2394_v55  ;;  %v2460_v42 = vpack.c.bf16 %v2400_v30, %v2396_v60 }
 0x7d7   : > { %v2459_v38 = vpack.c.bf16 %v2399_v8, %v2395_v58  ;;  %v2461_v57 = vpack.c.bf16 %v2401_v62, %v2397_v3  ;;  %v2212_v2 = vpop.f32.mrb[52].mxu0  ;;  %v2325_v63 = vpop.f32.mrb[52].mxu1 }
 0x7d8   : > { %v2213_v7 = vadd.f32 %v2212_v2, %v5159_v13  ;;  %v2326_v10 = vadd.f32 %v2325_v63, %v5161_v24  ;;  %v2214_v15 = vpop.f32.mrb[53].mxu0  ;;  %v2327_v12 = vpop.f32.mrb[53].mxu1 }
 0x7d9   : > { %v2215_v14 = vadd.f32 %v2214_v15, %v5163_v40  ;;  %v2328_v53 = vadd.f32 %v2327_v12, %v5165_v25  ;;  %v2216_v19 = vpop.f32.mrb[54].mxu0  ;;  %v2329_v22 = vpop.f32.mrb[54].mxu1  ;;  %2785 = vmatprep.mubr.bf16.mxu0 %v2459_v38  ;;  %2882 = vmatprep.mubr.bf16.mxu1 %v2461_v57 }
 0x7da   : > { %v2217_v59 = vadd.f32 %v2216_v19, %v5159_v13  ;;  %v2330_v49 = vadd.f32 %v2329_v22, %v5161_v24  ;;  %v2218_v6 = vpop.f32.mrb[55].mxu0  ;;  %v2331_v11 = vpop.f32.mrb[55].mxu1  ;;  %2786 = vmatmul.mubr.bf16.vlgmr.msra.gmra.mrb[80].mxu0 %v2458_v29  ;;  %2883 = vmatmul.mubr.bf16.vlgmr.msra.gmra.mrb[80].mxu1 %v2460_v42  ;;  %v2402_v27 = vmax.f32 %v2213_v7, 0.0  ;;  %v2404_v18 = vmax.f32 %v2326_v10, 0.0 }
 0x7db   : > { %v2219_v17 = vadd.f32 %v2218_v6, %v5163_v40  ;;  %v2332_v4 = vadd.f32 %v2331_v11, %v5165_v25  ;;  %v2403_v34 = vmax.f32 %v2215_v14, 0.0  ;;  %v2405_v0 = vmax.f32 %v2328_v53, 0.0 }
 0x7dc   : > { %v2406_v46 = vmax.f32 %v2217_v59, 0.0  ;;  %v2408_v28 = vmax.f32 %v2330_v49, 0.0 }
 0x7dd   : > { %v2407_v23 = vmax.f32 %v2219_v17, 0.0  ;;  %v2409_v37 = vmax.f32 %v2332_v4, 0.0 }
 0x7de   : > { %v2462_v45 = vpack.c.bf16 %v2406_v46, %v2402_v27  ;;  %v2464_v33 = vpack.c.bf16 %v2408_v28, %v2404_v18 }
 0x7df   : > { %v2463_v54 = vpack.c.bf16 %v2407_v23, %v2403_v34  ;;  %v2465_v50 = vpack.c.bf16 %v2409_v37, %v2405_v0  ;;  %v2222_v26 = vpop.f32.mrb[56].mxu0  ;;  %v2335_v41 = vpop.f32.mrb[56].mxu1 }
 0x7e0   : > { %v2223_v52 = vadd.f32 %v2222_v26, %v5159_v13  ;;  %v2336_v43 = vadd.f32 %v2335_v41, %v5161_v24  ;;  %v2224_v55 = vpop.f32.mrb[57].mxu0  ;;  %v2337_v60 = vpop.f32.mrb[57].mxu1 }
 0x7e1   : > { %v2225_v39 = vadd.f32 %v2224_v55, %v5163_v40  ;;  %v2338_v30 = vadd.f32 %v2337_v60, %v5165_v25  ;;  %v2226_v58 = vpop.f32.mrb[58].mxu0  ;;  %v2339_v3 = vpop.f32.mrb[58].mxu1  ;;  %2793 = vmatprep.mubr.bf16.mxu0 %v2463_v54  ;;  %2890 = vmatprep.mubr.bf16.mxu1 %v2465_v50 }
 0x7e2   : > { %v2227_v8 = vadd.f32 %v2226_v58, %v5159_v13  ;;  %v2340_v62 = vadd.f32 %v2339_v3, %v5161_v24  ;;  %v2228_v29 = vpop.f32.mrb[59].mxu0  ;;  %v2341_v42 = vpop.f32.mrb[59].mxu1  ;;  %2794 = vmatmul.mubr.bf16.gmra.mrb[84].mxu0 %v2462_v45  ;;  %2891 = vmatmul.mubr.bf16.gmra.mrb[84].mxu1 %v2464_v33  ;;  %v2410_v2 = vmax.f32 %v2223_v52, 0.0  ;;  %v2412_v63 = vmax.f32 %v2336_v43, 0.0 }
 0x7e3   : > { %v2229_v38 = vadd.f32 %v2228_v29, %v5163_v40  ;;  %v2342_v57 = vadd.f32 %v2341_v42, %v5165_v25  ;;  %v2411_v15 = vmax.f32 %v2225_v39, 0.0  ;;  %v2413_v12 = vmax.f32 %v2338_v30, 0.0 }
 0x7e4   : > { %v2414_v7 = vmax.f32 %v2227_v8, 0.0  ;;  %v2416_v10 = vmax.f32 %v2340_v62, 0.0 }
 0x7e5   : > { %v2415_v14 = vmax.f32 %v2229_v38, 0.0  ;;  %v2417_v53 = vmax.f32 %v2342_v57, 0.0 }
 0x7e6   : > { %v2466_v19 = vpack.c.bf16 %v2414_v7, %v2410_v2  ;;  %v2468_v22 = vpack.c.bf16 %v2416_v10, %v2412_v63 }
 0x7e7   : > { %v2467_v59 = vpack.c.bf16 %v2415_v14, %v2411_v15  ;;  %v2469_v49 = vpack.c.bf16 %v2417_v53, %v2413_v12  ;;  %v2232_v6 = vpop.f32.mrb[60].mxu0  ;;  %v2345_v11 = vpop.f32.mrb[60].mxu1 }
 0x7e8   : > { %v2233_v17 = vadd.f32 %v2232_v6, %v5159_v13  ;;  %v2346_v4 = vadd.f32 %v2345_v11, %v5161_v24  ;;  %v2234_v27 = vpop.f32.mrb[61].mxu0  ;;  %v2347_v18 = vpop.f32.mrb[61].mxu1 }
 0x7e9   : > { %v2235_v46 = vadd.f32 %v2234_v27, %v5163_v40  ;;  %v2348_v28 = vadd.f32 %v2347_v18, %v5165_v25  ;;  %v2236_v34 = vpop.f32.mrb[62].mxu0  ;;  %v2349_v0 = vpop.f32.mrb[62].mxu1  ;;  %2801 = vmatprep.mubr.bf16.mxu0 %v2467_v59  ;;  %2898 = vmatprep.mubr.bf16.mxu1 %v2469_v49 }
 0x7ea   : > { %v2237_v23 = vadd.f32 %v2236_v34, %v5159_v13  ;;  %v2350_v37 = vadd.f32 %v2349_v0, %v5161_v24  ;;  %v2238_v45 = vpop.f32.mrb[63].mxu0  ;;  %v2351_v33 = vpop.f32.mrb[63].mxu1  ;;  %2802 = vmatmul.mubr.bf16.gmra.mrb[88].mxu0 %v2466_v19  ;;  %2899 = vmatmul.mubr.bf16.gmra.mrb[88].mxu1 %v2468_v22  ;;  %v2418_v26 = vmax.f32 %v2233_v17, 0.0  ;;  %v2420_v41 = vmax.f32 %v2346_v4, 0.0 }
 0x7eb   : > { %v2239_v54 = vadd.f32 %v2238_v45, %v5163_v40  ;;  %v2352_v50 = vadd.f32 %v2351_v33, %v5165_v25  ;;  %v2419_v55 = vmax.f32 %v2235_v46, 0.0  ;;  %v2421_v60 = vmax.f32 %v2348_v28, 0.0 }
 0x7ec   : > { %v2422_v52 = vmax.f32 %v2237_v23, 0.0  ;;  %v2424_v43 = vmax.f32 %v2350_v37, 0.0 }
 0x7ed   : > { %v2423_v39 = vmax.f32 %v2239_v54, 0.0  ;;  %v2425_v30 = vmax.f32 %v2352_v50, 0.0 }
 0x7ee   : > { %v2470_v58 = vpack.c.bf16 %v2422_v52, %v2418_v26  ;;  %v2472_v3 = vpack.c.bf16 %v2424_v43, %v2420_v41 }
 0x7ef   : > { %v2471_v8 = vpack.c.bf16 %v2423_v39, %v2419_v55  ;;  %v2473_v62 = vpack.c.bf16 %v2425_v30, %v2421_v60  ;;  %v2242_v29 = vpop.f32.mrb[64].mxu0  ;;  %v2355_v42 = vpop.f32.mrb[64].mxu1 }
 0x7f0   : > { %v2243_v38 = vadd.f32 %v2242_v29, %v5159_v13  ;;  %v2356_v57 = vadd.f32 %v2355_v42, %v5161_v24  ;;  %v2244_v2 = vpop.f32.mrb[65].mxu0  ;;  %v2357_v63 = vpop.f32.mrb[65].mxu1 }
 0x7f1   : > { %v2245_v7 = vadd.f32 %v2244_v2, %v5163_v40  ;;  %v2358_v10 = vadd.f32 %v2357_v63, %v5165_v25  ;;  %v2246_v15 = vpop.f32.mrb[66].mxu0  ;;  %v2359_v12 = vpop.f32.mrb[66].mxu1  ;;  %2809 = vmatprep.mubr.bf16.mxu0 %v2471_v8  ;;  %2906 = vmatprep.mubr.bf16.mxu1 %v2473_v62 }
 0x7f2   : > { %v2247_v14 = vadd.f32 %v2246_v15, %v5159_v13  ;;  %v2360_v53 = vadd.f32 %v2359_v12, %v5161_v24  ;;  %v2248_v19 = vpop.f32.mrb[67].mxu0  ;;  %v2361_v22 = vpop.f32.mrb[67].mxu1  ;;  %2810 = vmatmul.mubr.bf16.gmra.mrb[92].mxu0 %v2470_v58  ;;  %2907 = vmatmul.mubr.bf16.gmra.mrb[92].mxu1 %v2472_v3  ;;  %v2426_v6 = vmax.f32 %v2243_v38, 0.0  ;;  %v2428_v11 = vmax.f32 %v2356_v57, 0.0 }
 0x7f3   : > { %v2249_v59 = vadd.f32 %v2248_v19, %v5163_v40  ;;  %v2362_v49 = vadd.f32 %v2361_v22, %v5165_v25  ;;  %v2427_v27 = vmax.f32 %v2245_v7, 0.0  ;;  %v2429_v18 = vmax.f32 %v2358_v10, 0.0 }
 0x7f4   : > { %v2430_v17 = vmax.f32 %v2247_v14, 0.0  ;;  %v2432_v4 = vmax.f32 %v2360_v53, 0.0 }
 0x7f5   : > { %v2431_v46 = vmax.f32 %v2249_v59, 0.0  ;;  %v2433_v28 = vmax.f32 %v2362_v49, 0.0 }
 0x7f6   : > { %v2474_v34 = vpack.c.bf16 %v2430_v17, %v2426_v6  ;;  %v2476_v0 = vpack.c.bf16 %v2432_v4, %v2428_v11 }
 0x7f7   : > { %v2475_v23 = vpack.c.bf16 %v2431_v46, %v2427_v27  ;;  %v2477_v37 = vpack.c.bf16 %v2433_v28, %v2429_v18  ;;  %v2252_v45 = vpop.f32.mrb[68].mxu0  ;;  %v2365_v33 = vpop.f32.mrb[68].mxu1 }
 0x7f8   : > { %v2253_v54 = vadd.f32 %v2252_v45, %v5159_v13  ;;  %v2366_v50 = vadd.f32 %v2365_v33, %v5161_v24  ;;  %v2254_v26 = vpop.f32.mrb[69].mxu0  ;;  %v2367_v41 = vpop.f32.mrb[69].mxu1 }
 0x7f9   : > { %v2255_v52 = vadd.f32 %v2254_v26, %v5163_v40  ;;  %v2368_v43 = vadd.f32 %v2367_v41, %v5165_v25  ;;  %v2256_v55 = vpop.f32.mrb[70].mxu0  ;;  %v2369_v60 = vpop.f32.mrb[70].mxu1  ;;  %2817 = vmatprep.mubr.bf16.mxu0 %v2475_v23  ;;  %2914 = vmatprep.mubr.bf16.mxu1 %v2477_v37 }
 0x7fa   : > { %v2257_v39 = vadd.f32 %v2256_v55, %v5159_v13  ;;  %v2370_v30 = vadd.f32 %v2369_v60, %v5161_v24  ;;  %v2258_v58 = vpop.f32.mrb[71].mxu0  ;;  %v2371_v3 = vpop.f32.mrb[71].mxu1  ;;  %2818 = vmatmul.mubr.bf16.gmra.mrb[96].mxu0 %v2474_v34  ;;  %2915 = vmatmul.mubr.bf16.gmra.mrb[96].mxu1 %v2476_v0  ;;  %v2434_v29 = vmax.f32 %v2253_v54, 0.0  ;;  %v2436_v42 = vmax.f32 %v2366_v50, 0.0 }
 0x7fb   : > { %v2259_v8 = vadd.f32 %v2258_v58, %v5163_v40  ;;  %v2372_v62 = vadd.f32 %v2371_v3, %v5165_v25  ;;  %v2435_v2 = vmax.f32 %v2255_v52, 0.0  ;;  %v2437_v63 = vmax.f32 %v2368_v43, 0.0 }
 0x7fc   : > { %v2438_v38 = vmax.f32 %v2257_v39, 0.0  ;;  %v2440_v57 = vmax.f32 %v2370_v30, 0.0 }
 0x7fd   : > { %v2439_v7 = vmax.f32 %v2259_v8, 0.0  ;;  %v2441_v10 = vmax.f32 %v2372_v62, 0.0 }
 0x7fe   : > { %v2478_v15 = vpack.c.bf16 %v2438_v38, %v2434_v29  ;;  %v2480_v12 = vpack.c.bf16 %v2440_v57, %v2436_v42 }
 0x7ff   : > { %v2479_v14 = vpack.c.bf16 %v2439_v7, %v2435_v2  ;;  %v2481_v53 = vpack.c.bf16 %v2441_v10, %v2437_v63  ;;  %v2262_v19 = vpop.f32.mrb[72].mxu0  ;;  %v2375_v22 = vpop.f32.mrb[72].mxu1 }
 0x800   : > { %v2263_v59 = vadd.f32 %v2262_v19, %v5159_v13  ;;  %v2376_v49 = vadd.f32 %v2375_v22, %v5161_v24  ;;  %v2264_v6 = vpop.f32.mrb[73].mxu0  ;;  %v2377_v11 = vpop.f32.mrb[73].mxu1 }
 0x801   : > { %v2265_v17 = vadd.f32 %v2264_v6, %v5163_v40  ;;  %v2378_v4 = vadd.f32 %v2377_v11, %v5165_v25  ;;  %v2266_v27 = vpop.f32.mrb[74].mxu0  ;;  %v2379_v18 = vpop.f32.mrb[74].mxu1  ;;  %2825 = vmatprep.mubr.bf16.mxu0 %v2479_v14  ;;  %2922 = vmatprep.mubr.bf16.mxu1 %v2481_v53 }
 0x802   : > { %v2267_v46 = vadd.f32 %v2266_v27, %v5159_v13  ;;  %v2380_v28 = vadd.f32 %v2379_v18, %v5161_v24  ;;  %v2268_v34 = vpop.f32.mrb[75].mxu0  ;;  %v2381_v0 = vpop.f32.mrb[75].mxu1  ;;  %2826 = vmatmul.mubr.bf16.gmra.mrb[100].mxu0 %v2478_v15  ;;  %2923 = vmatmul.mubr.bf16.gmra.mrb[100].mxu1 %v2480_v12  ;;  %v2442_v45 = vmax.f32 %v2263_v59, 0.0  ;;  %v2444_v33 = vmax.f32 %v2376_v49, 0.0 }
 0x803   : > { %v2269_v23 = vadd.f32 %v2268_v34, %v5163_v40  ;;  %v2382_v37 = vadd.f32 %v2381_v0, %v5165_v25  ;;  %v2443_v26 = vmax.f32 %v2265_v17, 0.0  ;;  %v2445_v41 = vmax.f32 %v2378_v4, 0.0 }
 0x804   : > { %v2446_v54 = vmax.f32 %v2267_v46, 0.0  ;;  %v2448_v50 = vmax.f32 %v2380_v28, 0.0 }
 0x805   : > { %v2447_v52 = vmax.f32 %v2269_v23, 0.0  ;;  %v2449_v43 = vmax.f32 %v2382_v37, 0.0 }
 0x806   : > { %v2482_v55 = vpack.c.bf16 %v2446_v54, %v2442_v45  ;;  %v2484_v60 = vpack.c.bf16 %v2448_v50, %v2444_v33 }
 0x807   : > { %v2483_v39 = vpack.c.bf16 %v2447_v52, %v2443_v26  ;;  %v2485_v30 = vpack.c.bf16 %v2449_v43, %v2445_v41  ;;  %v2272_v58 = vpop.f32.mrb[76].mxu0  ;;  %v2385_v3 = vpop.f32.mrb[76].mxu1 }
 0x808   : > { %v2273_v8 = vadd.f32 %v2272_v58, %v5159_v13  ;;  %v2386_v62 = vadd.f32 %v2385_v3, %v5161_v24  ;;  %v2274_v29 = vpop.f32.mrb[77].mxu0  ;;  %v2387_v42 = vpop.f32.mrb[77].mxu1 }
 0x809   : > { %v2275_v38 = vadd.f32 %v2274_v29, %v5163_v40  ;;  %v2388_v57 = vadd.f32 %v2387_v42, %v5165_v25  ;;  %v2276_v2 = vpop.f32.mrb[78].mxu0  ;;  %v2389_v63 = vpop.f32.mrb[78].mxu1  ;;  %2833 = vmatprep.mubr.bf16.mxu0 %v2483_v39  ;;  %2930 = vmatprep.mubr.bf16.mxu1 %v2485_v30 }
 0x80a   : > { %v2277_v7 = vadd.f32 %v2276_v2, %v5159_v13  ;;  %v2390_v10 = vadd.f32 %v2389_v63, %v5161_v24  ;;  %v2278_v15 = vpop.f32.mrb[79].mxu0  ;;  %v2391_v12 = vpop.f32.mrb[79].mxu1  ;;  %2834 = vmatmul.mubr.bf16.gmra.mrb[104].mxu0 %v2482_v55  ;;  %2931 = vmatmul.mubr.bf16.gmra.mrb[104].mxu1 %v2484_v60  ;;  %v2450_v19 = vmax.f32 %v2273_v8, 0.0  ;;  %v2452_v22 = vmax.f32 %v2386_v62, 0.0 }
 0x80b   : > { %v2279_v14 = vadd.f32 %v2278_v15, %v5163_v40  ;;  %v2392_v53 = vadd.f32 %v2391_v12, %v5165_v25  ;;  %v2451_v6 = vmax.f32 %v2275_v38, 0.0  ;;  %v2453_v11 = vmax.f32 %v2388_v57, 0.0  ;;  %v5234_v25 = vld [vmem:[%s5382_s13] ss:$0 sm:$0xff] }
 0x80c   : > { %v2454_v59 = vmax.f32 %v2277_v7, 0.0  ;;  %v2456_v49 = vmax.f32 %v2390_v10, 0.0 }
 0x80d   : > { %v2455_v17 = vmax.f32 %v2279_v14, 0.0  ;;  %v2457_v4 = vmax.f32 %v2392_v53, 0.0 }
 0x80e   : > { %v2486_v27 = vpack.c.bf16 %v2454_v59, %v2450_v19  ;;  %v2488_v13 = vpack.c.bf16 %v2456_v49, %v2452_v22 }
 0x80f   : > { %v2487_v18 = vpack.c.bf16 %v2455_v17, %v2451_v6  ;;  %v2489_v24 = vpack.c.bf16 %v2457_v4, %v2453_v11 }
 0x811   : > { %2841 = vmatprep.mubr.bf16.mxu0 %v2487_v18  ;;  %2938 = vmatprep.mubr.bf16.mxu1 %v2489_v24 }
 0x812   : > { %2842 = vmatmul.mubr.bf16.gmra.mrb[108].mxu0 %v2486_v27  ;;  %2939 = vmatmul.mubr.bf16.gmra.mrb[108].mxu1 %v2488_v13 }
 0x8ad   : > { %v3320_v46 = vpop.f32.mrb[80].mxu0  ;;  %v3384_v40 = vpop.f32.mrb[80].mxu1 }
 0x8ae   : > { %v3321_v28 = vpop.f32.mrb[81].mxu0  ;;  %v3385_v34 = vpop.f32.mrb[81].mxu1 }
 0x8af   : > { %v3322_v0 = vadd.f32 %v3321_v28, %v3320_v46  ;;  %v3386_v23 = vadd.f32 %v3385_v34, %v3384_v40  ;;  %v3323_v37 = vpop.f32.mrb[82].mxu0  ;;  %v3387_v45 = vpop.f32.mrb[82].mxu1 }
 0x8b0   : > { %v3324_v33 = vpop.f32.mrb[83].mxu0  ;;  %v3388_v54 = vpop.f32.mrb[83].mxu1 }
 0x8b1   : > { %v2788_v50 = vadd.f32 %v3322_v0, %v5234_v25  ;;  %v3325_v26 = vadd.f32 %v3324_v33, %v3323_v37  ;;  %v3389_v41 = vadd.f32 %v3388_v54, %v3387_v45 }
 0x8b3   : > { %v2885_v52 = vadd.f32 %v3386_v23, %v2788_v50  ;;  %v2791_v43 = vadd.f32 %v3325_v26, %v5234_v25 }
 0x8b5   : > { %v2947_v55 = vadd.f32 %v2885_v52, %v4901_v36  ;;  %v2888_v60 = vadd.f32 %v3389_v41, %v2791_v43  ;;  %v3326_v39 = vpop.f32.mrb[84].mxu0  ;;  %v3390_v30 = vpop.f32.mrb[84].mxu1 }
 0x8b6   : > { %v3327_v58 = vpop.f32.mrb[85].mxu0  ;;  %v3391_v3 = vpop.f32.mrb[85].mxu1 }
 0x8b7   : > { %2963 = vst [vmem:[%s5241_s29] sm:$0xff] %v2947_v55  ;;  %v2948_v8 = vadd.f32 %v2888_v60, %v4905_v16  ;;  %v3328_v62 = vadd.f32 %v3327_v58, %v3326_v39  ;;  %v3392_v29 = vadd.f32 %v3391_v3, %v3390_v30  ;;  %v3329_v42 = vpop.f32.mrb[86].mxu0  ;;  %v3393_v38 = vpop.f32.mrb[86].mxu1 }
 0x8b8   : > { %v3330_v57 = vpop.f32.mrb[87].mxu0  ;;  %v3394_v36 = vpop.f32.mrb[87].mxu1 }
 0x8b9   : > { %2964 = vst [vmem:[%s5241_s29 + $0x8] sm:$0xff] %v2948_v8  ;;  %v2796_v2 = vadd.f32 %v3328_v62, %v5234_v25  ;;  %v3331_v63 = vadd.f32 %v3330_v57, %v3329_v42  ;;  %v3395_v7 = vadd.f32 %v3394_v36, %v3393_v38 }
 0x8bb   : > { %v2893_v10 = vadd.f32 %v3392_v29, %v2796_v2  ;;  %v2799_v15 = vadd.f32 %v3331_v63, %v5234_v25 }
 0x8bd   : > { %v2949_v12 = vadd.f32 %v2893_v10, %v4916_v20  ;;  %v2896_v14 = vadd.f32 %v3395_v7, %v2799_v15  ;;  %v3332_v16 = vpop.f32.mrb[88].mxu0  ;;  %v3396_v53 = vpop.f32.mrb[88].mxu1 }
 0x8be   : > { %v3333_v19 = vpop.f32.mrb[89].mxu0  ;;  %v3397_v22 = vpop.f32.mrb[89].mxu1 }
 0x8bf   : > { %2965 = vst [vmem:[%s5241_s29 + $0x10] sm:$0xff] %v2949_v12  ;;  %v2950_v59 = vadd.f32 %v2896_v14, %v4919_v5  ;;  %v3334_v49 = vadd.f32 %v3333_v19, %v3332_v16  ;;  %v3398_v6 = vadd.f32 %v3397_v22, %v3396_v53  ;;  %v3335_v11 = vpop.f32.mrb[90].mxu0  ;;  %v3399_v17 = vpop.f32.mrb[90].mxu1 }
 0x8c0   : > { %v3336_v4 = vpop.f32.mrb[91].mxu0  ;;  %v3400_v27 = vpop.f32.mrb[91].mxu1 }
 0x8c1   : > { %2966 = vst [vmem:[%s5241_s29 + $0x18] sm:$0xff] %v2950_v59  ;;  %v2804_v13 = vadd.f32 %v3334_v49, %v5234_v25  ;;  %v3337_v18 = vadd.f32 %v3336_v4, %v3335_v11  ;;  %v3401_v20 = vadd.f32 %v3400_v27, %v3399_v17 }
 0x8c3   : > { %v2901_v24 = vadd.f32 %v3398_v6, %v2804_v13  ;;  %v2807_v46 = vadd.f32 %v3337_v18, %v5234_v25 }
 0x8c5   : > { %v2951_v40 = vadd.f32 %v2901_v24, %v4934_v48  ;;  %v2904_v28 = vadd.f32 %v3401_v20, %v2807_v46  ;;  %v3338_v5 = vpop.f32.mrb[92].mxu0  ;;  %v3402_v34 = vpop.f32.mrb[92].mxu1 }
 0x8c6   : > { %v3339_v0 = vpop.f32.mrb[93].mxu0  ;;  %v3403_v23 = vpop.f32.mrb[93].mxu1 }
 0x8c7   : > { %2967 = vst [vmem:[%s5241_s29 + $0x20] sm:$0xff] %v2951_v40  ;;  %v2952_v37 = vadd.f32 %v2904_v28, %v4937_v47  ;;  %v3340_v45 = vadd.f32 %v3339_v0, %v3338_v5  ;;  %v3404_v33 = vadd.f32 %v3403_v23, %v3402_v34  ;;  %v3341_v54 = vpop.f32.mrb[94].mxu0  ;;  %v3405_v50 = vpop.f32.mrb[94].mxu1 }
 0x8c8   : > { %v3342_v26 = vpop.f32.mrb[95].mxu0  ;;  %v3406_v41 = vpop.f32.mrb[95].mxu1 }
 0x8c9   : > { %2968 = vst [vmem:[%s5241_s29 + $0x28] sm:$0xff] %v2952_v37  ;;  %v2812_v52 = vadd.f32 %v3340_v45, %v5234_v25  ;;  %v3343_v43 = vadd.f32 %v3342_v26, %v3341_v54  ;;  %v3407_v48 = vadd.f32 %v3406_v41, %v3405_v50 }
 0x8cb   : > { %v2909_v55 = vadd.f32 %v3404_v33, %v2812_v52  ;;  %v2815_v60 = vadd.f32 %v3343_v43, %v5234_v25 }
 0x8cd   : > { %v2953_v39 = vadd.f32 %v2909_v55, %v4956_v31  ;;  %v2912_v30 = vadd.f32 %v3407_v48, %v2815_v60  ;;  %v3344_v47 = vpop.f32.mrb[96].mxu0  ;;  %v3408_v58 = vpop.f32.mrb[96].mxu1 }
 0x8ce   : > { %v3345_v3 = vpop.f32.mrb[97].mxu0  ;;  %v3409_v8 = vpop.f32.mrb[97].mxu1 }
 0x8cf   : > { %2969 = vst [vmem:[%s5241_s29 + $0x30] sm:$0xff] %v2953_v39  ;;  %v2954_v62 = vadd.f32 %v2912_v30, %v4959_v1  ;;  %v3346_v29 = vadd.f32 %v3345_v3, %v3344_v47  ;;  %v3410_v42 = vadd.f32 %v3409_v8, %v3408_v58  ;;  %v3347_v38 = vpop.f32.mrb[98].mxu0  ;;  %v3411_v57 = vpop.f32.mrb[98].mxu1 }
 0x8d0   : > { %v3348_v36 = vpop.f32.mrb[99].mxu0  ;;  %v3412_v2 = vpop.f32.mrb[99].mxu1 }
 0x8d1   : > { %2970 = vst [vmem:[%s5241_s29 + $0x38] sm:$0xff] %v2954_v62  ;;  %v2820_v63 = vadd.f32 %v3346_v29, %v5234_v25  ;;  %v3349_v7 = vadd.f32 %v3348_v36, %v3347_v38  ;;  %v3413_v31 = vadd.f32 %v3412_v2, %v3411_v57 }
 0x8d3   : > { %v2917_v10 = vadd.f32 %v3410_v42, %v2820_v63  ;;  %v2823_v15 = vadd.f32 %v3349_v7, %v5234_v25 }
 0x8d5   : > { %v2955_v12 = vadd.f32 %v2917_v10, %v4970_v21  ;;  %v2920_v14 = vadd.f32 %v3413_v31, %v2823_v15  ;;  %v3350_v1 = vpop.f32.mrb[100].mxu0  ;;  %v3414_v16 = vpop.f32.mrb[100].mxu1 }
 0x8d6   : > { %v3351_v53 = vpop.f32.mrb[101].mxu0  ;;  %v3415_v19 = vpop.f32.mrb[101].mxu1 }
 0x8d7   : > { %2971 = vst [vmem:[%s5241_s29 + $0x40] sm:$0xff] %v2955_v12  ;;  %v2956_v22 = vadd.f32 %v2920_v14, %v4973_v61  ;;  %v3352_v59 = vadd.f32 %v3351_v53, %v3350_v1  ;;  %v3416_v49 = vadd.f32 %v3415_v19, %v3414_v16  ;;  %v3353_v6 = vpop.f32.mrb[102].mxu0  ;;  %v3417_v11 = vpop.f32.mrb[102].mxu1 }
 0x8d8   : > { %v3354_v17 = vpop.f32.mrb[103].mxu0  ;;  %v3418_v4 = vpop.f32.mrb[103].mxu1 }
 0x8d9   : > { %2972 = vst [vmem:[%s5241_s29 + $0x48] sm:$0xff] %v2956_v22  ;;  %v2828_v27 = vadd.f32 %v3352_v59, %v5234_v25  ;;  %v3355_v13 = vadd.f32 %v3354_v17, %v3353_v6  ;;  %v3419_v21 = vadd.f32 %v3418_v4, %v3417_v11 }
 0x8db   : > { %v2925_v18 = vadd.f32 %v3416_v49, %v2828_v27  ;;  %v2831_v20 = vadd.f32 %v3355_v13, %v5234_v25 }
 0x8dd   : > { %v2957_v24 = vadd.f32 %v2925_v18, %v4986_v32  ;;  %v2928_v46 = vadd.f32 %v3419_v21, %v2831_v20  ;;  %v3356_v61 = vpop.f32.mrb[104].mxu0  ;;  %v3420_v40 = vpop.f32.mrb[104].mxu1 }
 0x8de   : > { %v3357_v28 = vpop.f32.mrb[105].mxu0  ;;  %v3421_v5 = vpop.f32.mrb[105].mxu1 }
 0x8df   : > { %2973 = vst [vmem:[%s5241_s29 + $0x50] sm:$0xff] %v2957_v24  ;;  %v2958_v34 = vadd.f32 %v2928_v46, %v4989_v44  ;;  %v3358_v0 = vadd.f32 %v3357_v28, %v3356_v61  ;;  %v3422_v23 = vadd.f32 %v3421_v5, %v3420_v40  ;;  %v3359_v37 = vpop.f32.mrb[106].mxu0  ;;  %v3423_v45 = vpop.f32.mrb[106].mxu1 }
 0x8e0   : > { %v3360_v33 = vpop.f32.mrb[107].mxu0  ;;  %v3424_v54 = vpop.f32.mrb[107].mxu1 }
 0x8e1   : > { %2974 = vst [vmem:[%s5241_s29 + $0x58] sm:$0xff] %v2958_v34  ;;  %v2836_v50 = vadd.f32 %v3358_v0, %v5234_v25  ;;  %v3361_v26 = vadd.f32 %v3360_v33, %v3359_v37  ;;  %v3425_v32 = vadd.f32 %v3424_v54, %v3423_v45 }
 0x8e3   : > { %v2933_v41 = vadd.f32 %v3422_v23, %v2836_v50  ;;  %v2839_v52 = vadd.f32 %v3361_v26, %v5234_v25 }
 0x8e5   : > { %v2959_v43 = vadd.f32 %v2933_v41, %v5002_v51  ;;  %v2936_v48 = vadd.f32 %v3425_v32, %v2839_v52  ;;  %v3362_v44 = vpop.f32.mrb[108].mxu0  ;;  %v3426_v55 = vpop.f32.mrb[108].mxu1 }
 0x8e6   : > { %v3363_v60 = vpop.f32.mrb[109].mxu0  ;;  %v3427_v39 = vpop.f32.mrb[109].mxu1 }
 0x8e7   : > { %2975 = vst [vmem:[%s5241_s29 + $0x60] sm:$0xff] %v2959_v43  ;;  %v2960_v30 = vadd.f32 %v2936_v48, %v5005_v9  ;;  %v3364_v47 = vadd.f32 %v3363_v60, %v3362_v44  ;;  %v3428_v58 = vadd.f32 %v3427_v39, %v3426_v55  ;;  %v3365_v3 = vpop.f32.mrb[110].mxu0  ;;  %v3429_v8 = vpop.f32.mrb[110].mxu1 }
 0x8e8   : > { %v3366_v62 = vpop.f32.mrb[111].mxu0  ;;  %v3430_v29 = vpop.f32.mrb[111].mxu1 }
 0x8e9   : > { %2976 = vst [vmem:[%s5241_s29 + $0x68] sm:$0xff] %v2960_v30  ;;  %v2844_v51 = vadd.f32 %v3364_v47, %v5234_v25  ;;  %v3367_v42 = vadd.f32 %v3366_v62, %v3365_v3  ;;  %v3431_v38 = vadd.f32 %v3430_v29, %v3429_v8 }
 0x8eb   : > { %v2941_v57 = vadd.f32 %v3428_v58, %v2844_v51  ;;  %v2847_v36 = vadd.f32 %v3367_v42, %v5234_v25 }
 0x8ed   : > { %v2961_v9 = vadd.f32 %v2941_v57, %v5018_v35  ;;  %v2944_v2 = vadd.f32 %v3431_v38, %v2847_v36 }
 0x8ef   : > { %2977 = vst [vmem:[%s5241_s29 + $0x70] sm:$0xff] %v2961_v9  ;;  %v2962_v63 = vadd.f32 %v2944_v2, %v5021_v56 }
 0x8f1   : > { %2978 = vst [vmem:[%s5241_s29 + $0x78] sm:$0xff] %v2962_v63 }
 0x8f2   : > { %4117 = shalt.err (!%p4114_p8)
}
 0x8f3   : > { %s4118_s13 = scalar_lea.hbm %s5290_s27, 2048  ;;  %s4122_s14 = scalar_lea.hbm %s5383_s10, 4096 }
 0x8f4   : > { %p4119_p6 = scmp.ne.s32.totalorder %s5290_s27, %s4118_s13  ;;  %p4123_p3 = scmp.lt.u32.totalorder %s5290_s27, %s5383_s10 }
 0x8f5   : > { %p4124_p0 = scmp.lt.u32.totalorder %s4122_s14, %s4118_s13  ;;  %p4126_p2 = scmp.lt.u32.totalorder %s4118_s13, %s5290_s27 }
 0x8f6   : > { %p4120_p9 = pnand %p4119_p6, %p5384_p7 }
 0x8f7   : > { %p4125_p5 = por %p4124_p0, %p4123_p3 }
 0x8f8   : > { %p4121_p4 = pneg %p4120_p9 }
 0x8f9   : > { %p4127_p10 = por %p4126_p2, %p4125_p5 }
 0x8fb   : > { %p4128_p1 = pnand %p4127_p10, %p4121_p4 }
 0x8fd   : > { %4131 = shalt.err (!%p4128_p1)
}
 0x8fe   : > { %s4200_s23 = smov 128   ;;  %s4201_s26 = smov 8  }
 0x8ff   : > { %3582 = dma.vmem_to_hbm [thread:$0]  (%p5384_p7), %s5292_s12, 2048, %s5290_s27, %s2980_s24, %s4200_s23, %s4200_s23, %s4201_s26  }
 0x900 PF: > { %s3008_s8 = sand.u32 1, %s4170_s17   ;;  %p5385_p11 = scmp.ne.s32.totalorder %s5370_s22, 0 }
 0x901   : > { %p5386_p12 = scmp.ge.s32.totalorder %s4182_s20, 2  ;;  %s3009_s13 = scalar_lea.sflag [#allocation4], %s3008_s8 }
 0x903   : > { %p3605_p13 = pnand %p5386_p12, %p5385_p11 }
 0x905   : > { %4165 = dma.done.wait (!%p3605_p13), %s3009_s13, 2048  }
 0x906   : > { %4167 = vsyncadd (!%p3605_p13), %s3009_s13, 4294965248  ;;  %p27_p8 = scmp.ge.s32.totalorder %s4425_s16, 4   ;;  %s5387_s17 = smov %s4174_s18 }
 0x907   : > { %s5388_s18 = smov %s4178_s19  ;;  %s5389_s19 = smov %s4437_s15 }
 0x908   : > { %s5390_s20 = smov %s4425_s16  ;;  %29 = sbr.rel (!%p27_p8) target bundleno = 12 (0xc), region = 129 }
 0x90f   :  { %3014 = vsyncpa [#allocation3], 1 }
 0x910   :  { %3016 = vsyncpa [#allocation3 + $0x1], 1 }
 0x911   :  { %3017 = vsyncpa [#allocation6], 1 }
 0x912   :  { %3018 = vsyncpa [#allocation9], 1 }
 0x913   :  { %3019 = vsyncpa [#allocation12], 1 }
 0x914   :  { %3020 = vsyncpa [#allocation4], 1 }
 0x915   :  { %3022 = vsyncpa [#allocation4 + $0x1], 1 }

</bundles_post_ra>
